<compile_context>
chip_gen: v7x
topology: tpu7x:2x2x1
jax: 0.10.0
libtpu: 0.0.40
codegen_flags: <defaults>
</compile_context>

<pallas_src>
import functools

import jax
import jax.numpy as jnp
from jax import lax
from jax.experimental import pallas as pl
from jax.experimental.pallas import tpu as pltpu


# ----------------------------------------------------------------------------
# helpers
# ----------------------------------------------------------------------------
def _round_up(x, m):
    return ((x + m - 1) // m) * m


def _pick_tm(m):
    """Tile M so the grid has ~2 parallel steps (v7x dual-TC) with big tiles."""
    if m <= 8:
        return 8
    return min(1024, _round_up(-(-m // 2), 8))


def _apply_act(x, act):
    if act == "relu":
        return jnp.maximum(x, 0.0)
    if act == "sigmoid":
        return jax.nn.sigmoid(x)
    return x


# ----------------------------------------------------------------------------
# Pallas kernels
# ----------------------------------------------------------------------------
def _mm_bias_act_kernel(x_ref, w_ref, b_ref, o_ref, *, act):
    acc = jnp.dot(x_ref[...], w_ref[...], preferred_element_type=jnp.float32)
    acc = acc + b_ref[0:1, :]                 # (TM, Np) + (1, Np) broadcast
    acc = _apply_act(acc, act)
    o_ref[...] = acc.astype(o_ref.dtype)


def _bottleneck_kernel(x_ref, w3_ref, b3_ref, w4_ref, b4_ref, o_ref):
    # encoder conv3 (no act) followed by decoder convT1 (+ ReLU), both as
    # plain matmuls; the (TM, 128) latent never leaves VMEM/registers.
    h = jnp.dot(x_ref[...], w3_ref[...], preferred_element_type=jnp.float32)
    h = h + b3_ref[0:1, :]
    y = jnp.dot(h, w4_ref[...], preferred_element_type=jnp.float32)
    y = y + b4_ref[0:1, :]
    o_ref[...] = jnp.maximum(y, 0.0).astype(o_ref.dtype)


# ----------------------------------------------------------------------------
# pallas_call wrappers
# ----------------------------------------------------------------------------
_VMEM_LIMIT = 32 * 1024 * 1024


def pallas_matmul_bias_act(x, layer, act):
    """x: (M, K) f32, layer['w']: (K, Np), layer['b']: (8, Np) -> (M, N)."""
    M, K = x.shape
    wp, bp, N = layer["w"], layer["b"], layer["n"]
    Np = wp.shape[1]
    TM = _pick_tm(M)
    Mp = _round_up(M, TM)
    xp = jnp.pad(x, ((0, Mp - M), (0, 0)))
    grid = (pl.cdiv(Mp, TM),)

    cost = pl.CostEstimate(
        flops=2 * M * K * N,
        transcendentals=M * N if act == "sigmoid" else 0,
        bytes_accessed=4 * (Mp * K + K * Np + 8 * Np + Mp * Np))

    out = pl.pallas_call(
        functools.partial(_mm_bias_act_kernel, act=act),
        out_shape=jax.ShapeDtypeStruct((Mp, Np), jnp.float32),
        grid=grid,
        in_specs=[
            pl.BlockSpec((TM, K), lambda i: (i, 0)),
            pl.BlockSpec((K, Np), lambda i: (0, 0)),
            pl.BlockSpec((8, Np), lambda i: (0, 0)),
        ],
        out_specs=pl.BlockSpec((TM, Np), lambda i: (i, 0)),
        compiler_params=pltpu.CompilerParams(
            dimension_semantics=("parallel",),
            vmem_limit_bytes=_VMEM_LIMIT),
        cost_estimate=cost,
    )(xp, wp, bp)
    return out[:M, :N]


def pallas_bottleneck(x, e3, d1):
    """Fused: relu((x @ W_e3 + b_e3) @ W_d1 + b_d1).  x: (B, 1568)."""
    M, K = x.shape
    n1p = e3["w"].shape[1]
    n2p = d1["w"].shape[1]
    TM = _pick_tm(M)
    Mp = _round_up(M, TM)
    xp = jnp.pad(x, ((0, Mp - M), (0, 0)))

    cost = pl.CostEstimate(
        flops=2 * M * K * e3["n"] + 2 * M * e3["n"] * d1["n"],
        transcendentals=0,
        bytes_accessed=4 * (Mp * K + K * n1p + n1p * n2p + Mp * n2p + 8 * (n1p + n2p)))

    out = pl.pallas_call(
        _bottleneck_kernel,
        out_shape=jax.ShapeDtypeStruct((Mp, n2p), jnp.float32),
        grid=(pl.cdiv(Mp, TM),),
        in_specs=[
            pl.BlockSpec((TM, K), lambda i: (i, 0)),
            pl.BlockSpec((K, n1p), lambda i: (0, 0)),
            pl.BlockSpec((8, n1p), lambda i: (0, 0)),
            pl.BlockSpec((n1p, n2p), lambda i: (0, 0)),
            pl.BlockSpec((8, n2p), lambda i: (0, 0)),
        ],
        out_specs=pl.BlockSpec((TM, n2p), lambda i: (i, 0)),
        compiler_params=pltpu.CompilerParams(
            dimension_semantics=("parallel",),
            vmem_limit_bytes=_VMEM_LIMIT),
        cost_estimate=cost,
    )(xp, e3["w"], e3["b"], d1["w"], d1["b"])
    return out[:M, :d1["n"]]


# ----------------------------------------------------------------------------
# NHWC im2col glue (fused by XLA; no transposes — tap windows concat on lanes)
# ----------------------------------------------------------------------------
def _extract_patches(x, kh, kw, stride):
    """x: (B, H, W, C) (already padded/dilated) -> ((B*Ho*Wo, kh*kw*C), Ho, Wo).
    Column order is (tap_i, tap_j, c) — matches prepared weight layout."""
    B, H, W, C = x.shape
    Ho = (H - kh) // stride + 1
    Wo = (W - kw) // stride + 1
    cols = []
    for i in range(kh):
        for j in range(kw):
            cols.append(x[:, i:i + stride * Ho:stride, j:j + stride * Wo:stride, :])
    patches = jnp.concatenate(cols, axis=-1)          # (B, Ho, Wo, kh*kw*C)
    return patches.reshape(B * Ho * Wo, kh * kw * C), Ho, Wo


def conv3x3_s2(x, layer, act):
    """NHWC Conv2d, k=3, stride=2, padding=1."""
    B = x.shape[0]
    xp = jnp.pad(x, ((0, 0), (1, 1), (1, 1), (0, 0)))
    patches, Ho, Wo = _extract_patches(xp, 3, 3, 2)
    out = pallas_matmul_bias_act(patches, layer, act)
    return out.reshape(B, Ho, Wo, layer["n"])


def convT3x3_s2(x, layer, act):
    """NHWC ConvTranspose2d, k=3, stride=2, padding=1, output_padding=1,
    rewritten as a stride-1 conv on the zero-dilated, padded input with the
    (precomputed) flipped/IO-swapped weight."""
    B = x.shape[0]
    zero = jnp.array(0.0, x.dtype)
    # (lo, hi, interior) = (k-1-p, k-1-p+op, stride-1) = (1, 2, 1)
    xd = lax.pad(x, zero, ((0, 0, 0), (1, 2, 1), (1, 2, 1), (0, 0, 0)))
    patches, Ho, Wo = _extract_patches(xd, 3, 3, 1)
    out = pallas_matmul_bias_act(patches, layer, act)
    return out.reshape(B, Ho, Wo, layer["n"])


# ----------------------------------------------------------------------------
# one-time weight preparation (hoisted out of the forward path)
# ----------------------------------------------------------------------------
def prepare_params(p):
    def pad_cols(m):
        n = m.shape[1]
        npad = _round_up(n, 128)
        return jnp.pad(m.astype(jnp.float32), ((0, 0), (0, npad - n)))

    def prep_bias(b, npad):
        bp = jnp.pad(b.astype(jnp.float32), (0, npad - b.shape[0]))
        return jnp.tile(bp.reshape(1, npad), (8, 1))      # sublane-aligned (8, Np)

    def conv_layer(w, b):        # Conv2d weight (Cout, Cin, kh, kw)
        cout = int(w.shape[0])
        k = jnp.transpose(w, (2, 3, 1, 0)).reshape(-1, cout)   # rows = (i, j, c)
        wp = pad_cols(k)
        return {"w": wp, "b": prep_bias(b, wp.shape[1]), "n": cout}

    def convT_layer(w, b):       # ConvTranspose2d weight (Cin, Cout, kh, kw)
        cout = int(w.shape[1])
        k = jnp.transpose(jnp.flip(w, (2, 3)), (2, 3, 0, 1)).reshape(-1, cout)
        wp = pad_cols(k)
        return {"w": wp, "b": prep_bias(b, wp.shape[1]), "n": cout}

    prep = {
        "e1": conv_layer(p["e1_w"], p["e1_b"]),
        "e2": conv_layer(p["e2_w"], p["e2_b"]),
        "e3": conv_layer(p["e3_w"], p["e3_b"]),       # pure matmul: (1568 -> 64)
        "d2": convT_layer(p["d2_w"], p["d2_b"]),
        "d3": convT_layer(p["d3_w"], p["d3_b"]),
    }

    # d1: ConvTranspose2d(64, 32, 7) on a 1x1 spatial map == matmul (64 -> 7*7*32);
    # output column order (i, j, cout) so the result reshapes straight to NHWC.
    w, b = p["d1_w"], p["d1_b"]
    cin, cout, kh, kw = (int(s) for s in w.shape)
    k = jnp.transpose(w, (0, 2, 3, 1)).reshape(cin, kh * kw * cout).astype(jnp.float32)
    n1p = prep["e3"]["w"].shape[1]                    # padded latent width (128)
    n2 = kh * kw * cout
    n2p = _round_up(n2, 128)
    kp = jnp.pad(k, ((0, n1p - cin), (0, n2p - n2)))
    bfull = jnp.tile(b.astype(jnp.float32), kh * kw)  # bias[o] at every (i, j)
    prep["d1"] = {"w": kp, "b": jnp.tile(jnp.pad(bfull, (0, n2p - n2)).reshape(1, n2p), (8, 1)),
                  "n": n2, "hw": (kh, kw), "cout": cout}
    return prep


# ----------------------------------------------------------------------------
# Autoencoder forward (Pallas)
# ----------------------------------------------------------------------------
def autoencoder_forward(x_nchw, prep):
    x = jnp.transpose(x_nchw, (0, 2, 3, 1)).astype(jnp.float32)   # -> NHWC once
    B = x.shape[0]

    # encoder
    x = conv3x3_s2(x, prep["e1"], "relu")             # (B, 14, 14, 16)
    x = conv3x3_s2(x, prep["e2"], "relu")             # (B,  7,  7, 32)

    # bottleneck: Conv2d(32,64,7) + ConvTranspose2d(64,32,7) + ReLU, one kernel
    z = x.reshape(B, -1)                              # (B, 1568), (h, w, c) order
    h = pallas_bottleneck(z, prep["e3"], prep["d1"])  # (B, 7*7*32)
    kh, kw = prep["d1"]["hw"]
    x = h.reshape(B, kh, kw, prep["d1"]["cout"])      # (B, 7, 7, 32)

    # decoder tail
    x = convT3x3_s2(x, prep["d2"], "relu")            # (B, 14, 14, 16)
    x = convT3x3_s2(x, prep["d3"], "sigmoid")         # (B, 28, 28, 1)

    return jnp.transpose(x, (0, 3, 1, 2))             # -> NCHW once


# ----------------------------------------------------------------------------
# Pure-JAX reference (lax.conv_general_dilated) for correctness check
# ----------------------------------------------------------------------------
def _ref_conv(x, w, b, stride, padding):
    dn = lax.conv_dimension_numbers(x.shape, w.shape, ("NCHW", "OIHW", "NCHW"))
    y = lax.conv_general_dilated(x, w, (stride, stride),
                                 [(padding, padding)] * 2, dimension_numbers=dn)
    return y + b[None, :, None, None]


def _ref_convT(x, w, b, stride, padding, output_padding):
    kh = w.shape[2]
    w_eq = jnp.flip(w, axis=(2, 3)).transpose(1, 0, 2, 3)
    dn = lax.conv_dimension_numbers(x.shape, w_eq.shape, ("NCHW", "OIHW", "NCHW"))
    y = lax.conv_general_dilated(
        x, w_eq, (1, 1),
        [(kh - 1 - padding, kh - 1 - padding + output_padding)] * 2,
        lhs_dilation=(stride, stride), dimension_numbers=dn)
    return y + b[None, :, None, None]


def autoencoder_reference(x, p):
    x = jax.nn.relu(_ref_conv(x, p["e1_w"], p["e1_b"], 2, 1))
    x = jax.nn.relu(_ref_conv(x, p["e2_w"], p["e2_b"], 2, 1))
    x = _ref_conv(x, p["e3_w"], p["e3_b"], 1, 0)
    x = jax.nn.relu(_ref_convT(x, p["d1_w"], p["d1_b"], 1, 0, 0))
    x = jax.nn.relu(_ref_convT(x, p["d2_w"], p["d2_b"], 2, 1, 1))
    x = jax.nn.sigmoid(_ref_convT(x, p["d3_w"], p["d3_b"], 2, 1, 1))
    return x


# ----------------------------------------------------------------------------
def init_params(key):
    ks = jax.random.split(key, 12)

    def w_init(k, shape, fan_in):
        return (jax.random.normal(k, shape, jnp.float32) / jnp.sqrt(fan_in)).astype(jnp.float32)

    return {
        # encoder: Conv2d weights are (Cout, Cin, kh, kw)
        "e1_w": w_init(ks[0], (16, 1, 3, 3), 1 * 9),    "e1_b": w_init(ks[1], (16,), 9),
        "e2_w": w_init(ks[2], (32, 16, 3, 3), 16 * 9),  "e2_b": w_init(ks[3], (32,), 16 * 9),
        "e3_w": w_init(ks[4], (64, 32, 7, 7), 32 * 49), "e3_b": w_init(ks[5], (64,), 32 * 49),
        # decoder: ConvTranspose2d weights are (Cin, Cout, kh, kw)
        "d1_w": w_init(ks[6], (64, 32, 7, 7), 64 * 49), "d1_b": w_init(ks[7], (32,), 64 * 49),
        "d2_w": w_init(ks[8], (32, 16, 3, 3), 32 * 9),  "d2_b": w_init(ks[9], (16,), 32 * 9),
        "d3_w": w_init(ks[10], (16, 1, 3, 3), 16 * 9),  "d3_b": w_init(ks[11], (1,), 16 * 9),
    }


if __name__ == "__main__":
    key = jax.random.PRNGKey(0)
    kx, kp = jax.random.split(key)
    params = init_params(kp)

    # Weight preprocessing done ONCE, outside the forward path.
    prep = prepare_params(params)

    # MNIST-like input implied by the 7x7 bottleneck conv: (B, 1, 28, 28)
    x = jax.random.uniform(kx, (2, 1, 28, 28), jnp.float32)

    fwd = jax.jit(lambda inp: autoencoder_forward(inp, prep))
    out = jax.block_until_ready(fwd(x))
    ref = jax.block_until_ready(autoencoder_reference(x, params))

    assert out.shape == (2, 1, 28, 28), out.shape
    max_err = float(jnp.max(jnp.abs(out - ref)))
    assert jnp.allclose(out, ref, rtol=1e-4, atol=1e-4), max_err

    print("KERNEL_OK")
</pallas_src>

<mosaic_0001>
module attributes {stable_mosaic.version = 11 : i64} {
  func.func @_mm_bias_act_kernel(%arg0: i32, %arg1: memref<200x9xf32, #tpu.memory_space<vmem>>, %arg2: memref<9x128xf32, #tpu.memory_space<vmem>>, %arg3: memref<8x128xf32, #tpu.memory_space<vmem>>, %arg4: memref<200x128xf32, #tpu.memory_space<vmem>>) attributes {dimension_semantics = [#tpu.dimension_semantics<parallel>], iteration_bounds = array<i64: 2>, scalar_prefetch = 0 : i64, scratch_operands = 0 : i64, tpu.core_type = #tpu.core_type<tc>, window_params = [{transform_indices = @transform_0, window_bounds = array<i64: 200, 9>}, {pipeline_mode = #tpu.pipeline_mode<synchronous>, transform_indices = @transform_1, window_bounds = array<i64: 9, 128>}, {pipeline_mode = #tpu.pipeline_mode<synchronous>, transform_indices = @transform_2, window_bounds = array<i64: 8, 128>}, {transform_indices = @transform_3, window_bounds = array<i64: 200, 128>}]} {
    %c0 = arith.constant 0 : index
    %c0_0 = arith.constant 0 : index
    %0 = vector.load %arg1[%c0, %c0_0] : memref<200x9xf32, #tpu.memory_space<vmem>>, vector<200x9xf32>
    %c0_1 = arith.constant 0 : index
    %c0_2 = arith.constant 0 : index
    %1 = vector.load %arg2[%c0_1, %c0_2] : memref<9x128xf32, #tpu.memory_space<vmem>>, vector<9x128xf32>
    %cst = arith.constant dense<0.000000e+00> : vector<200x128xf32>
    %2 = tpu.matmul %0, %1, %cst {dimension_numbers = #tpu.dot_dimension_numbers<[1], [0], [0], [1], [0, 0, 1, 1], [], []>} : vector<200x9xf32>, vector<9x128xf32>, vector<200x128xf32> -> vector<200x128xf32>
    %c0_3 = arith.constant 0 : index
    %c0_4 = arith.constant 0 : index
    %3 = vector.load %arg3[%c0_3, %c0_4] : memref<8x128xf32, #tpu.memory_space<vmem>>, vector<1x128xf32>
    %4 = vector.broadcast %3 : vector<1x128xf32> to vector<200x128xf32>
    %5 = arith.addf %2, %4 : vector<200x128xf32>
    %cst_5 = arith.constant 0.000000e+00 : f32
    %6 = vector.broadcast %cst_5 : f32 to vector<200x128xf32>
    %7 = arith.maximumf %5, %6 : vector<200x128xf32>
    %c0_6 = arith.constant 0 : index
    %c0_7 = arith.constant 0 : index
    %8 = vector.load %arg4[%c0_6, %c0_7] : memref<200x128xf32, #tpu.memory_space<vmem>>, vector<200x128xf32>
    tpu.vector_store %arg4[%c0_6, %c0_7], %7 {strides = array<i32>} : memref<200x128xf32, #tpu.memory_space<vmem>>, vector<200x128xf32>,
    return
  }
  func.func @transform_0(%arg0: i32) -> (i32, i32) {
    %c0_i32 = arith.constant 0 : i32
    %c0_i32_0 = arith.constant 0 : i32
    return %arg0, %c0_i32 : i32, i32
  }
  func.func @transform_1(%arg0: i32) -> (i32, i32) {
    %c0_i32 = arith.constant 0 : i32
    %c0_i32_0 = arith.constant 0 : i32
    %c0_i32_1 = arith.constant 0 : i32
    return %c0_i32, %c0_i32_0 : i32, i32
  }
  func.func @transform_2(%arg0: i32) -> (i32, i32) {
    %c0_i32 = arith.constant 0 : i32
    %c0_i32_0 = arith.constant 0 : i32
    %c0_i32_1 = arith.constant 0 : i32
    return %c0_i32, %c0_i32_0 : i32, i32
  }
  func.func @transform_3(%arg0: i32) -> (i32, i32) {
    %c0_i32 = arith.constant 0 : i32
    %c0_i32_0 = arith.constant 0 : i32
    return %arg0, %c0_i32 : i32, i32
  }
}

module attributes {stable_mosaic.version = 11 : i64} {
  func.func @_mm_bias_act_kernel(%arg0: i32, %arg1: memref<56x144xf32, #tpu.memory_space<vmem>>, %arg2: memref<144x128xf32, #tpu.memory_space<vmem>>, %arg3: memref<8x128xf32, #tpu.memory_space<vmem>>, %arg4: memref<56x128xf32, #tpu.memory_space<vmem>>) attributes {dimension_semantics = [#tpu.dimension_semantics<parallel>], iteration_bounds = array<i64: 2>, scalar_prefetch = 0 : i64, scratch_operands = 0 : i64, tpu.core_type = #tpu.core_type<tc>, window_params = [{transform_indices = @transform_0, window_bounds = array<i64: 56, 144>}, {pipeline_mode = #tpu.pipeline_mode<synchronous>, transform_indices = @transform_1, window_bounds = array<i64: 144, 128>}, {pipeline_mode = #tpu.pipeline_mode<synchronous>, transform_indices = @transform_2, window_bounds = array<i64: 8, 128>}, {transform_indices = @transform_3, window_bounds = array<i64: 56, 128>}]} {
    %c0 = arith.constant 0 : index
    %c0_0 = arith.constant 0 : index
    %0 = vector.load %arg1[%c0, %c0_0] : memref<56x144xf32, #tpu.memory_space<vmem>>, vector<56x144xf32>
    %c0_1 = arith.constant 0 : index
    %c0_2 = arith.constant 0 : index
    %1 = vector.load %arg2[%c0_1, %c0_2] : memref<144x128xf32, #tpu.memory_space<vmem>>, vector<144x128xf32>
    %cst = arith.constant dense<0.000000e+00> : vector<56x128xf32>
    %2 = tpu.matmul %0, %1, %cst {dimension_numbers = #tpu.dot_dimension_numbers<[1], [0], [0], [1], [0, 0, 1, 1], [], []>} : vector<56x144xf32>, vector<144x128xf32>, vector<56x128xf32> -> vector<56x128xf32>
    %c0_3 = arith.constant 0 : index
    %c0_4 = arith.constant 0 : index
    %3 = vector.load %arg3[%c0_3, %c0_4] : memref<8x128xf32, #tpu.memory_space<vmem>>, vector<1x128xf32>
    %4 = vector.broadcast %3 : vector<1x128xf32> to vector<56x128xf32>
    %5 = arith.addf %2, %4 : vector<56x128xf32>
    %cst_5 = arith.constant 0.000000e+00 : f32
    %6 = vector.broadcast %cst_5 : f32 to vector<56x128xf32>
    %7 = arith.maximumf %5, %6 : vector<56x128xf32>
    %c0_6 = arith.constant 0 : index
    %c0_7 = arith.constant 0 : index
    %8 = vector.load %arg4[%c0_6, %c0_7] : memref<56x128xf32, #tpu.memory_space<vmem>>, vector<56x128xf32>
    tpu.vector_store %arg4[%c0_6, %c0_7], %7 {strides = array<i32>} : memref<56x128xf32, #tpu.memory_space<vmem>>, vector<56x128xf32>,
    return
  }
  func.func @transform_0(%arg0: i32) -> (i32, i32) {
    %c0_i32 = arith.constant 0 : i32
    %c0_i32_0 = arith.constant 0 : i32
    return %arg0, %c0_i32 : i32, i32
  }
  func.func @transform_1(%arg0: i32) -> (i32, i32) {
    %c0_i32 = arith.constant 0 : i32
    %c0_i32_0 = arith.constant 0 : i32
    %c0_i32_1 = arith.constant 0 : i32
    return %c0_i32, %c0_i32_0 : i32, i32
  }
  func.func @transform_2(%arg0: i32) -> (i32, i32) {
    %c0_i32 = arith.constant 0 : i32
    %c0_i32_0 = arith.constant 0 : i32
    %c0_i32_1 = arith.constant 0 : i32
    return %c0_i32, %c0_i32_0 : i32, i32
  }
  func.func @transform_3(%arg0: i32) -> (i32, i32) {
    %c0_i32 = arith.constant 0 : i32
    %c0_i32_0 = arith.constant 0 : i32
    return %arg0, %c0_i32 : i32, i32
  }
}

module attributes {stable_mosaic.version = 11 : i64} {
  func.func @_bottleneck_kernel(%arg0: i32, %arg1: memref<8x1568xf32, #tpu.memory_space<vmem>>, %arg2: memref<1568x128xf32, #tpu.memory_space<vmem>>, %arg3: memref<8x128xf32, #tpu.memory_space<vmem>>, %arg4: memref<128x1664xf32, #tpu.memory_space<vmem>>, %arg5: memref<8x1664xf32, #tpu.memory_space<vmem>>, %arg6: memref<8x1664xf32, #tpu.memory_space<vmem>>) attributes {dimension_semantics = [#tpu.dimension_semantics<parallel>], iteration_bounds = array<i64: 1>, scalar_prefetch = 0 : i64, scratch_operands = 0 : i64, tpu.core_type = #tpu.core_type<tc>, window_params = [{transform_indices = @transform_0, window_bounds = array<i64: 8, 1568>}, {pipeline_mode = #tpu.pipeline_mode<synchronous>, transform_indices = @transform_1, window_bounds = array<i64: 1568, 128>}, {pipeline_mode = #tpu.pipeline_mode<synchronous>, transform_indices = @transform_2, window_bounds = array<i64: 8, 128>}, {pipeline_mode = #tpu.pipeline_mode<synchronous>, transform_indices = @transform_3, window_bounds = array<i64: 128, 1664>}, {pipeline_mode = #tpu.pipeline_mode<synchronous>, transform_indices = @transform_4, window_bounds = array<i64: 8, 1664>}, {transform_indices = @transform_5, window_bounds = array<i64: 8, 1664>}]} {
    %c0 = arith.constant 0 : index
    %c0_0 = arith.constant 0 : index
    %0 = vector.load %arg1[%c0, %c0_0] : memref<8x1568xf32, #tpu.memory_space<vmem>>, vector<8x1568xf32>
    %c0_1 = arith.constant 0 : index
    %c0_2 = arith.constant 0 : index
    %1 = vector.load %arg2[%c0_1, %c0_2] : memref<1568x128xf32, #tpu.memory_space<vmem>>, vector<1568x128xf32>
    %cst = arith.constant dense<0.000000e+00> : vector<8x128xf32>
    %2 = tpu.matmul %0, %1, %cst {dimension_numbers = #tpu.dot_dimension_numbers<[1], [0], [0], [1], [0, 0, 1, 1], [], []>} : vector<8x1568xf32>, vector<1568x128xf32>, vector<8x128xf32> -> vector<8x128xf32>
    %c0_3 = arith.constant 0 : index
    %c0_4 = arith.constant 0 : index
    %3 = vector.load %arg3[%c0_3, %c0_4] : memref<8x128xf32, #tpu.memory_space<vmem>>, vector<1x128xf32>
    %4 = vector.broadcast %3 : vector<1x128xf32> to vector<8x128xf32>
    %5 = arith.addf %2, %4 : vector<8x128xf32>
    %c0_5 = arith.constant 0 : index
    %c0_6 = arith.constant 0 : index
    %6 = vector.load %arg4[%c0_5, %c0_6] : memref<128x1664xf32, #tpu.memory_space<vmem>>, vector<128x1664xf32>
    %cst_7 = arith.constant dense<0.000000e+00> : vector<8x1664xf32>
    %7 = tpu.matmul %5, %6, %cst_7 {dimension_numbers = #tpu.dot_dimension_numbers<[1], [0], [0], [1], [0, 0, 1, 1], [], []>} : vector<8x128xf32>, vector<128x1664xf32>, vector<8x1664xf32> -> vector<8x1664xf32>
    %c0_8 = arith.constant 0 : index
    %c0_9 = arith.constant 0 : index
    %8 = vector.load %arg5[%c0_8, %c0_9] : memref<8x1664xf32, #tpu.memory_space<vmem>>, vector<1x1664xf32>
    %9 = vector.broadcast %8 : vector<1x1664xf32> to vector<8x1664xf32>
    %10 = arith.addf %7, %9 : vector<8x1664xf32>
    %cst_10 = arith.constant 0.000000e+00 : f32
    %11 = vector.broadcast %cst_10 : f32 to vector<8x1664xf32>
    %12 = arith.maximumf %10, %11 : vector<8x1664xf32>
    %c0_11 = arith.constant 0 : index
    %c0_12 = arith.constant 0 : index
    %13 = vector.load %arg6[%c0_11, %c0_12] : memref<8x1664xf32, #tpu.memory_space<vmem>>, vector<8x1664xf32>
    tpu.vector_store %arg6[%c0_11, %c0_12], %12 {strides = array<i32>} : memref<8x1664xf32, #tpu.memory_space<vmem>>, vector<8x1664xf32>,
    return
  }
  func.func @transform_0(%arg0: i32) -> (i32, i32) {
    %c0_i32 = arith.constant 0 : i32
    %c0_i32_0 = arith.constant 0 : i32
    return %arg0, %c0_i32 : i32, i32
  }
  func.func @transform_1(%arg0: i32) -> (i32, i32) {
    %c0_i32 = arith.constant 0 : i32
    %c0_i32_0 = arith.constant 0 : i32
    %c0_i32_1 = arith.constant 0 : i32
    return %c0_i32, %c0_i32_0 : i32, i32
  }
  func.func @transform_2(%arg0: i32) -> (i32, i32) {
    %c0_i32 = arith.constant 0 : i32
    %c0_i32_0 = arith.constant 0 : i32
    %c0_i32_1 = arith.constant 0 : i32
    return %c0_i32, %c0_i32_0 : i32, i32
  }
  func.func @transform_3(%arg0: i32) -> (i32, i32) {
    %c0_i32 = arith.constant 0 : i32
    %c0_i32_0 = arith.constant 0 : i32
    %c0_i32_1 = arith.constant 0 : i32
    return %c0_i32, %c0_i32_0 : i32, i32
  }
  func.func @transform_4(%arg0: i32) -> (i32, i32) {
    %c0_i32 = arith.constant 0 : i32
    %c0_i32_0 = arith.constant 0 : i32
    %c0_i32_1 = arith.constant 0 : i32
    return %c0_i32, %c0_i32_0 : i32, i32
  }
  func.func @transform_5(%arg0: i32) -> (i32, i32) {
    %c0_i32 = arith.constant 0 : i32
    %c0_i32_0 = arith.constant 0 : i32
    return %arg0, %c0_i32 : i32, i32
  }
}

module attributes {stable_mosaic.version = 11 : i64} {
  func.func @_mm_bias_act_kernel(%arg0: i32, %arg1: memref<200x288xf32, #tpu.memory_space<vmem>>, %arg2: memref<288x128xf32, #tpu.memory_space<vmem>>, %arg3: memref<8x128xf32, #tpu.memory_space<vmem>>, %arg4: memref<200x128xf32, #tpu.memory_space<vmem>>) attributes {dimension_semantics = [#tpu.dimension_semantics<parallel>], iteration_bounds = array<i64: 2>, scalar_prefetch = 0 : i64, scratch_operands = 0 : i64, tpu.core_type = #tpu.core_type<tc>, window_params = [{transform_indices = @transform_0, window_bounds = array<i64: 200, 288>}, {pipeline_mode = #tpu.pipeline_mode<synchronous>, transform_indices = @transform_1, window_bounds = array<i64: 288, 128>}, {pipeline_mode = #tpu.pipeline_mode<synchronous>, transform_indices = @transform_2, window_bounds = array<i64: 8, 128>}, {transform_indices = @transform_3, window_bounds = array<i64: 200, 128>}]} {
    %c0 = arith.constant 0 : index
    %c0_0 = arith.constant 0 : index
    %0 = vector.load %arg1[%c0, %c0_0] : memref<200x288xf32, #tpu.memory_space<vmem>>, vector<200x288xf32>
    %c0_1 = arith.constant 0 : index
    %c0_2 = arith.constant 0 : index
    %1 = vector.load %arg2[%c0_1, %c0_2] : memref<288x128xf32, #tpu.memory_space<vmem>>, vector<288x128xf32>
    %cst = arith.constant dense<0.000000e+00> : vector<200x128xf32>
    %2 = tpu.matmul %0, %1, %cst {dimension_numbers = #tpu.dot_dimension_numbers<[1], [0], [0], [1], [0, 0, 1, 1], [], []>} : vector<200x288xf32>, vector<288x128xf32>, vector<200x128xf32> -> vector<200x128xf32>
    %c0_3 = arith.constant 0 : index
    %c0_4 = arith.constant 0 : index
    %3 = vector.load %arg3[%c0_3, %c0_4] : memref<8x128xf32, #tpu.memory_space<vmem>>, vector<1x128xf32>
    %4 = vector.broadcast %3 : vector<1x128xf32> to vector<200x128xf32>
    %5 = arith.addf %2, %4 : vector<200x128xf32>
    %cst_5 = arith.constant 0.000000e+00 : f32
    %6 = vector.broadcast %cst_5 : f32 to vector<200x128xf32>
    %7 = arith.maximumf %5, %6 : vector<200x128xf32>
    %c0_6 = arith.constant 0 : index
    %c0_7 = arith.constant 0 : index
    %8 = vector.load %arg4[%c0_6, %c0_7] : memref<200x128xf32, #tpu.memory_space<vmem>>, vector<200x128xf32>
    tpu.vector_store %arg4[%c0_6, %c0_7], %7 {strides = array<i32>} : memref<200x128xf32, #tpu.memory_space<vmem>>, vector<200x128xf32>,
    return
  }
  func.func @transform_0(%arg0: i32) -> (i32, i32) {
    %c0_i32 = arith.constant 0 : i32
    %c0_i32_0 = arith.constant 0 : i32
    return %arg0, %c0_i32 : i32, i32
  }
  func.func @transform_1(%arg0: i32) -> (i32, i32) {
    %c0_i32 = arith.constant 0 : i32
    %c0_i32_0 = arith.constant 0 : i32
    %c0_i32_1 = arith.constant 0 : i32
    return %c0_i32, %c0_i32_0 : i32, i32
  }
  func.func @transform_2(%arg0: i32) -> (i32, i32) {
    %c0_i32 = arith.constant 0 : i32
    %c0_i32_0 = arith.constant 0 : i32
    %c0_i32_1 = arith.constant 0 : i32
    return %c0_i32, %c0_i32_0 : i32, i32
  }
  func.func @transform_3(%arg0: i32) -> (i32, i32) {
    %c0_i32 = arith.constant 0 : i32
    %c0_i32_0 = arith.constant 0 : i32
    return %arg0, %c0_i32 : i32, i32
  }
}

module attributes {stable_mosaic.version = 11 : i64} {
  func.func @_mm_bias_act_kernel(%arg0: i32, %arg1: memref<784x144xf32, #tpu.memory_space<vmem>>, %arg2: memref<144x128xf32, #tpu.memory_space<vmem>>, %arg3: memref<8x128xf32, #tpu.memory_space<vmem>>, %arg4: memref<784x128xf32, #tpu.memory_space<vmem>>) attributes {dimension_semantics = [#tpu.dimension_semantics<parallel>], iteration_bounds = array<i64: 2>, scalar_prefetch = 0 : i64, scratch_operands = 0 : i64, tpu.core_type = #tpu.core_type<tc>, window_params = [{transform_indices = @transform_0, window_bounds = array<i64: 784, 144>}, {pipeline_mode = #tpu.pipeline_mode<synchronous>, transform_indices = @transform_1, window_bounds = array<i64: 144, 128>}, {pipeline_mode = #tpu.pipeline_mode<synchronous>, transform_indices = @transform_2, window_bounds = array<i64: 8, 128>}, {transform_indices = @transform_3, window_bounds = array<i64: 784, 128>}]} {
    %c0 = arith.constant 0 : index
    %c0_0 = arith.constant 0 : index
    %0 = vector.load %arg1[%c0, %c0_0] : memref<784x144xf32, #tpu.memory_space<vmem>>, vector<784x144xf32>
    %c0_1 = arith.constant 0 : index
    %c0_2 = arith.constant 0 : index
    %1 = vector.load %arg2[%c0_1, %c0_2] : memref<144x128xf32, #tpu.memory_space<vmem>>, vector<144x128xf32>
    %cst = arith.constant dense<0.000000e+00> : vector<784x128xf32>
    %2 = tpu.matmul %0, %1, %cst {dimension_numbers = #tpu.dot_dimension_numbers<[1], [0], [0], [1], [0, 0, 1, 1], [], []>} : vector<784x144xf32>, vector<144x128xf32>, vector<784x128xf32> -> vector<784x128xf32>
    %c0_3 = arith.constant 0 : index
    %c0_4 = arith.constant 0 : index
    %3 = vector.load %arg3[%c0_3, %c0_4] : memref<8x128xf32, #tpu.memory_space<vmem>>, vector<1x128xf32>
    %4 = vector.broadcast %3 : vector<1x128xf32> to vector<784x128xf32>
    %5 = arith.addf %2, %4 : vector<784x128xf32>
    %6 = arith.negf %5 : vector<784x128xf32>
    %7 = math.exp %6 : vector<784x128xf32>
    %cst_5 = arith.constant 1.000000e+00 : f32
    %8 = vector.broadcast %cst_5 : f32 to vector<784x128xf32>
    %9 = arith.addf %8, %7 : vector<784x128xf32>
    %10 = arith.divf %8, %9 : vector<784x128xf32>
    %c0_6 = arith.constant 0 : index
    %c0_7 = arith.constant 0 : index
    %11 = vector.load %arg4[%c0_6, %c0_7] : memref<784x128xf32, #tpu.memory_space<vmem>>, vector<784x128xf32>
    tpu.vector_store %arg4[%c0_6, %c0_7], %10 {strides = array<i32>} : memref<784x128xf32, #tpu.memory_space<vmem>>, vector<784x128xf32>,
    return
  }
  func.func @transform_0(%arg0: i32) -> (i32, i32) {
    %c0_i32 = arith.constant 0 : i32
    %c0_i32_0 = arith.constant 0 : i32
    return %arg0, %c0_i32 : i32, i32
  }
  func.func @transform_1(%arg0: i32) -> (i32, i32) {
    %c0_i32 = arith.constant 0 : i32
    %c0_i32_0 = arith.constant 0 : i32
    %c0_i32_1 = arith.constant 0 : i32
    return %c0_i32, %c0_i32_0 : i32, i32
  }
  func.func @transform_2(%arg0: i32) -> (i32, i32) {
    %c0_i32 = arith.constant 0 : i32
    %c0_i32_0 = arith.constant 0 : i32
    %c0_i32_1 = arith.constant 0 : i32
    return %c0_i32, %c0_i32_0 : i32, i32
  }
  func.func @transform_3(%arg0: i32) -> (i32, i32) {
    %c0_i32 = arith.constant 0 : i32
    %c0_i32_0 = arith.constant 0 : i32
    return %arg0, %c0_i32 : i32, i32
  }
}

</mosaic_0001>

<bundles_post_ra>
// kernel: _lambda_.5
= control target key start
LH: loop header
LB: loop body
LE: loop exit
PB: predicated region body
PF: predicated region fallthrough
CT: control target
= control target key end

     0   :  { %s774_s12 = smov 0   ;;  %s963_s0 = inlined_call_operand.vmem [shape: f32[400,9], index: 0, kind: input, shape index: {}]   ;;  %s964_s1 = inlined_call_operand.vmem [shape: f32[9,128], index: 1, kind: input, shape index: {}]   ;;  %s965_s2 = inlined_call_operand.vmem [shape: f32[8,128], index: 2, kind: input, shape index: {}]   ;;  %s966_s3 = inlined_call_operand.vmem [shape: f32[400,128], index: 3, kind: output, shape index: {}]  }
   0x1 LB: > { %s582_s13 = sadd.s32 4294967295, %s748_s12   ;;  %p586_p0 = scmp.ge.s32.totalorder %s748_s12, 1  ;;  %s748_s12 = sphi %s774_s12, %s13_s12  }
   0x2   : > { %p138_p1 = scmp.lt.s32.totalorder %s748_s12, 3 }
   0x4   : > { %p139_p2 = pnand %p586_p0, %p138_p1 }
   0x5   : > { %v199_v0 = vld [vmem:[%s964_s1] sm:$0xff] (!%p139_p2)  ;;  %v200_v1 = vld [vmem:[%s964_s1 + $0x8] sm:$0x1] (!%p139_p2)  ;;  %vm282_vm0 = vcmask (!%p139_p2), 1040384   ;;  %v750_v2 = vmov (!%p139_p2), 0.0|0.0   ;;  %vm751_vm1 = vmmov (!%p139_p2), 1  }
   0x6   : > { %142 = sbr.rel (%p139_p2) target bundleno = 282 (0x11a), region = 32  ;;  %724 = vmatprep.subr.bf16.mxu0 (!%p139_p2), %v750_v2  ;;  %v725_v3 = vpack.c.bf16 (!%p139_p2), %v200_v1, %v199_v0  ;;  %vm726_vm2 = vmpackc.low (!%p139_p2), %vm282_vm0, %vm751_vm1  ;;  %728 = vmatprep.subr.bf16.mxu1 (!%p139_p2), %v750_v2  ;;  %vm752_vm3 = vmmov (!%p139_p2), 0   ;;  %v753_v4 = vmov (!%p139_p2), 0.0   ;;  %vm206_vm4 = vcmask (!%p139_p2), 72704   ;;  %v901_v30 = vld [vmem:[%s965_s2] ss:$0 sm:$0xff] (!%p139_p2) }
   0x7   : > { %s162_s18 = smul.u32 (!%p139_p2), 25, %s582_s13  ;;  %649 = vmatprep.mubr.msk.f32.mxu0 (!%p139_p2), %vm752_vm3, %v753_v4  ;;  %688 = vmatprep.mubr.msk.f32.mxu1 (!%p139_p2), %vm752_vm3, %v753_v4 }
   0x8   : > { %727 = vmatpush3.bf16.msk.msra.mxu0 (!%p139_p2), %vm726_vm2, %v725_v3  ;;  %729 = vmatpush3.bf16.msk.msra.mxu1 (!%p139_p2), %vm726_vm2, %v725_v3 }
   0x9   : > { %p163_p3 = scmp.lt.s32.totalorder (!%p139_p2), %s162_s18, 49 }
   0xd   : > { %s968_s18 = smov (!%p163_p3, %s162_s18), 49 }
   0xe   : > { %s587_s19 = sshll.u32 %s968_s18, 3 }
   0xf   : > { %s800_s22 = scalar_lea.vmem %s963_s0, %s587_s19  ;;  %s910_s27 = scalar_lea.vmem %s966_s3, %s587_s19 }
  0x10   : > { %v174_v5 = vld [vmem:[%s800_s22] sm:$0xff]  ;;  %v187_v6 = vld [vmem:[%s800_s22 + $0x68] sm:$0xff]  ;;  %v188_v8 = vld [vmem:[%s800_s22 + $0x70] sm:$0xff] }
  0x11   : > { %650 = vmatmul.mubr.msk.f32.vlgmr.msra.gmra.mrb[0].mxu0 %vm206_vm4, %v174_v5  ;;  %689 = vmatmul.mubr.msk.f32.vlgmr.msra.gmra.mrb[0].mxu1 %vm206_vm4, %v187_v6  ;;  %v175_v7 = vld [vmem:[%s800_s22 + $0x8] sm:$0xff]  ;;  %v176_v9 = vld [vmem:[%s800_s22 + $0x10] sm:$0xff]  ;;  %v189_v10 = vld [vmem:[%s800_s22 + $0x78] sm:$0xff] }
  0x12   : > { %652 = vmatprep.mubr.msk.f32.mxu0 %vm752_vm3, %v753_v4  ;;  %691 = vmatprep.mubr.msk.f32.mxu1 %vm752_vm3, %v753_v4  ;;  %v177_v11 = vld [vmem:[%s800_s22 + $0x18] sm:$0xff]  ;;  %v190_v12 = vld [vmem:[%s800_s22 + $0x80] sm:$0xff]  ;;  %v191_v14 = vld [vmem:[%s800_s22 + $0x88] sm:$0xff] }
  0x13   : > { %v178_v13 = vld [vmem:[%s800_s22 + $0x20] sm:$0xff]  ;;  %v179_v15 = vld [vmem:[%s800_s22 + $0x28] sm:$0xff]  ;;  %v192_v16 = vld [vmem:[%s800_s22 + $0x90] sm:$0xff] }
  0x14   : > { %v180_v17 = vld [vmem:[%s800_s22 + $0x30] sm:$0xff]  ;;  %v193_v18 = vld [vmem:[%s800_s22 + $0x98] sm:$0xff]  ;;  %v194_v20 = vld [vmem:[%s800_s22 + $0xa0] sm:$0xff] }
  0x15   : > { %653 = vmatmul.mubr.msk.f32.gmra.mrb[2].mxu0 %vm206_vm4, %v175_v7  ;;  %692 = vmatmul.mubr.msk.f32.gmra.mrb[2].mxu1 %vm206_vm4, %v188_v8  ;;  %v181_v19 = vld [vmem:[%s800_s22 + $0x38] sm:$0xff]  ;;  %v182_v21 = vld [vmem:[%s800_s22 + $0x40] sm:$0xff]  ;;  %v195_v22 = vld [vmem:[%s800_s22 + $0xa8] sm:$0xff] }
  0x16   : > { %655 = vmatprep.mubr.msk.f32.mxu0 %vm752_vm3, %v753_v4  ;;  %694 = vmatprep.mubr.msk.f32.mxu1 %vm752_vm3, %v753_v4  ;;  %v183_v23 = vld [vmem:[%s800_s22 + $0x48] sm:$0xff]  ;;  %v196_v24 = vld [vmem:[%s800_s22 + $0xb0] sm:$0xff]  ;;  %v197_v26 = vld [vmem:[%s800_s22 + $0xb8] sm:$0xff] }
  0x17   : > { %v184_v25 = vld [vmem:[%s800_s22 + $0x50] sm:$0xff]  ;;  %v185_v27 = vld [vmem:[%s800_s22 + $0x58] sm:$0xff]  ;;  %v198_v28 = vld [vmem:[%s800_s22 + $0xc0] sm:$0xff] }
  0x18   : > { %v186_v29 = vld [vmem:[%s800_s22 + $0x60] sm:$0xff] }
  0x19   : > { %656 = vmatmul.mubr.msk.f32.gmra.mrb[4].mxu0 %vm206_vm4, %v176_v9  ;;  %695 = vmatmul.mubr.msk.f32.gmra.mrb[4].mxu1 %vm206_vm4, %v189_v10 }
  0x1a   : > { %658 = vmatprep.mubr.msk.f32.mxu0 %vm752_vm3, %v753_v4  ;;  %697 = vmatprep.mubr.msk.f32.mxu1 %vm752_vm3, %v753_v4 }
  0x1d   : > { %659 = vmatmul.mubr.msk.f32.gmra.mrb[6].mxu0 %vm206_vm4, %v177_v11  ;;  %698 = vmatmul.mubr.msk.f32.gmra.mrb[6].mxu1 %vm206_vm4, %v190_v12 }
  0x1e   : > { %661 = vmatprep.mubr.msk.f32.mxu0 %vm752_vm3, %v753_v4  ;;  %700 = vmatprep.mubr.msk.f32.mxu1 %vm752_vm3, %v753_v4 }
  0x21   : > { %662 = vmatmul.mubr.msk.f32.gmra.mrb[8].mxu0 %vm206_vm4, %v178_v13  ;;  %701 = vmatmul.mubr.msk.f32.gmra.mrb[8].mxu1 %vm206_vm4, %v191_v14 }
  0x22   : > { %664 = vmatprep.mubr.msk.f32.mxu0 %vm752_vm3, %v753_v4  ;;  %703 = vmatprep.mubr.msk.f32.mxu1 %vm752_vm3, %v753_v4 }
  0x25   : > { %665 = vmatmul.mubr.msk.f32.gmra.mrb[10].mxu0 %vm206_vm4, %v179_v15  ;;  %704 = vmatmul.mubr.msk.f32.gmra.mrb[10].mxu1 %vm206_vm4, %v192_v16 }
  0x26   : > { %667 = vmatprep.mubr.msk.f32.mxu0 %vm752_vm3, %v753_v4  ;;  %706 = vmatprep.mubr.msk.f32.mxu1 %vm752_vm3, %v753_v4 }
  0x29   : > { %668 = vmatmul.mubr.msk.f32.gmra.mrb[12].mxu0 %vm206_vm4, %v180_v17  ;;  %707 = vmatmul.mubr.msk.f32.gmra.mrb[12].mxu1 %vm206_vm4, %v193_v18 }
  0x2a   : > { %670 = vmatprep.mubr.msk.f32.mxu0 %vm752_vm3, %v753_v4  ;;  %709 = vmatprep.mubr.msk.f32.mxu1 %vm752_vm3, %v753_v4 }
  0x2d   : > { %671 = vmatmul.mubr.msk.f32.gmra.mrb[14].mxu0 %vm206_vm4, %v181_v19  ;;  %710 = vmatmul.mubr.msk.f32.gmra.mrb[14].mxu1 %vm206_vm4, %v194_v20 }
  0x2e   : > { %673 = vmatprep.mubr.msk.f32.mxu0 %vm752_vm3, %v753_v4  ;;  %712 = vmatprep.mubr.msk.f32.mxu1 %vm752_vm3, %v753_v4 }
  0x31   : > { %674 = vmatmul.mubr.msk.f32.gmra.mrb[16].mxu0 %vm206_vm4, %v182_v21  ;;  %713 = vmatmul.mubr.msk.f32.gmra.mrb[16].mxu1 %vm206_vm4, %v195_v22 }
  0x32   : > { %676 = vmatprep.mubr.msk.f32.mxu0 %vm752_vm3, %v753_v4  ;;  %715 = vmatprep.mubr.msk.f32.mxu1 %vm752_vm3, %v753_v4 }
  0x35   : > { %677 = vmatmul.mubr.msk.f32.gmra.mrb[18].mxu0 %vm206_vm4, %v183_v23  ;;  %716 = vmatmul.mubr.msk.f32.gmra.mrb[18].mxu1 %vm206_vm4, %v196_v24 }
  0x36   : > { %679 = vmatprep.mubr.msk.f32.mxu0 %vm752_vm3, %v753_v4  ;;  %718 = vmatprep.mubr.msk.f32.mxu1 %vm752_vm3, %v753_v4 }
  0x39   : > { %680 = vmatmul.mubr.msk.f32.gmra.mrb[20].mxu0 %vm206_vm4, %v184_v25  ;;  %719 = vmatmul.mubr.msk.f32.gmra.mrb[20].mxu1 %vm206_vm4, %v197_v26 }
  0x3a   : > { %682 = vmatprep.mubr.msk.f32.mxu0 %vm752_vm3, %v753_v4  ;;  %721 = vmatprep.mubr.msk.f32.mxu1 %vm752_vm3, %v753_v4 }
  0x3d   : > { %683 = vmatmul.mubr.msk.f32.gmra.mrb[22].mxu0 %vm206_vm4, %v185_v27  ;;  %722 = vmatmul.mubr.msk.f32.gmra.mrb[22].mxu1 %vm206_vm4, %v198_v28 }
  0x3e   : > { %685 = vmatprep.mubr.msk.f32.mxu0 %vm752_vm3, %v753_v4 }
  0x41   : > { %686 = vmatmul.mubr.msk.f32.gmra.mrb[24].mxu0 %vm206_vm4, %v186_v29 }
  0xe4   : > { %v352_v31 = vpop.f32.mrb[0].mxu0  ;;  %v417_v32 = vpop.f32.mrb[0].mxu1 }
  0xe5   : > { %v353_v33 = vadd.f32 %v901_v30, %v352_v31  ;;  %v651_v34 = vpop.f32.mrb[1].mxu0  ;;  %v418_v35 = vadd.f32 %v901_v30, %v417_v32  ;;  %v690_v36 = vpop.f32.mrb[1].mxu1 }
  0xe7   : > { %v476_v37 = vmax.f32 %v353_v33, 0.0  ;;  %v489_v38 = vmax.f32 %v418_v35, 0.0 }
  0xe8   : > { %v357_v39 = vpop.f32.mrb[2].mxu0  ;;  %v422_v40 = vpop.f32.mrb[2].mxu1 }
  0xe9   : > { %501 = vst [vmem:[%s910_s27] sm:$0xff] %v476_v37  ;;  %514 = vst [vmem:[%s910_s27 + $0x68] sm:$0xff] %v489_v38  ;;  %v358_v41 = vadd.f32 %v901_v30, %v357_v39  ;;  %v654_v42 = vpop.f32.mrb[3].mxu0  ;;  %v423_v43 = vadd.f32 %v901_v30, %v422_v40  ;;  %v693_v44 = vpop.f32.mrb[3].mxu1 }
  0xeb   : > { %v477_v45 = vmax.f32 %v358_v41, 0.0  ;;  %v490_v46 = vmax.f32 %v423_v43, 0.0 }
  0xec   : > { %v362_v47 = vpop.f32.mrb[4].mxu0  ;;  %v427_v48 = vpop.f32.mrb[4].mxu1 }
  0xed   : > { %502 = vst [vmem:[%s910_s27 + $0x8] sm:$0xff] %v477_v45  ;;  %515 = vst [vmem:[%s910_s27 + $0x70] sm:$0xff] %v490_v46  ;;  %v363_v49 = vadd.f32 %v901_v30, %v362_v47  ;;  %v657_v50 = vpop.f32.mrb[5].mxu0  ;;  %v428_v51 = vadd.f32 %v901_v30, %v427_v48  ;;  %v696_v52 = vpop.f32.mrb[5].mxu1 }
  0xef   : > { %v478_v53 = vmax.f32 %v363_v49, 0.0  ;;  %v491_v54 = vmax.f32 %v428_v51, 0.0 }
  0xf0   : > { %v367_v55 = vpop.f32.mrb[6].mxu0  ;;  %v432_v56 = vpop.f32.mrb[6].mxu1 }
  0xf1   : > { %503 = vst [vmem:[%s910_s27 + $0x10] sm:$0xff] %v478_v53  ;;  %516 = vst [vmem:[%s910_s27 + $0x78] sm:$0xff] %v491_v54  ;;  %v368_v57 = vadd.f32 %v901_v30, %v367_v55  ;;  %v660_v58 = vpop.f32.mrb[7].mxu0  ;;  %v433_v59 = vadd.f32 %v901_v30, %v432_v56  ;;  %v699_v60 = vpop.f32.mrb[7].mxu1 }
  0xf3   : > { %v479_v61 = vmax.f32 %v368_v57, 0.0  ;;  %v492_v62 = vmax.f32 %v433_v59, 0.0 }
  0xf4   : > { %v372_v63 = vpop.f32.mrb[8].mxu0  ;;  %v437_v0 = vpop.f32.mrb[8].mxu1 }
  0xf5   : > { %504 = vst [vmem:[%s910_s27 + $0x18] sm:$0xff] %v479_v61  ;;  %517 = vst [vmem:[%s910_s27 + $0x80] sm:$0xff] %v492_v62  ;;  %v373_v1 = vadd.f32 %v901_v30, %v372_v63  ;;  %v663_v2 = vpop.f32.mrb[9].mxu0  ;;  %v438_v3 = vadd.f32 %v901_v30, %v437_v0  ;;  %v702_v4 = vpop.f32.mrb[9].mxu1 }
  0xf7   : > { %v480_v5 = vmax.f32 %v373_v1, 0.0  ;;  %v493_v6 = vmax.f32 %v438_v3, 0.0 }
  0xf8   : > { %v377_v7 = vpop.f32.mrb[10].mxu0  ;;  %v442_v8 = vpop.f32.mrb[10].mxu1 }
  0xf9   : > { %505 = vst [vmem:[%s910_s27 + $0x20] sm:$0xff] %v480_v5  ;;  %518 = vst [vmem:[%s910_s27 + $0x88] sm:$0xff] %v493_v6  ;;  %v378_v9 = vadd.f32 %v901_v30, %v377_v7  ;;  %v666_v10 = vpop.f32.mrb[11].mxu0  ;;  %v443_v11 = vadd.f32 %v901_v30, %v442_v8  ;;  %v705_v12 = vpop.f32.mrb[11].mxu1 }
  0xfb   : > { %v481_v13 = vmax.f32 %v378_v9, 0.0  ;;  %v494_v14 = vmax.f32 %v443_v11, 0.0 }
  0xfc   : > { %v382_v15 = vpop.f32.mrb[12].mxu0  ;;  %v447_v16 = vpop.f32.mrb[12].mxu1 }
  0xfd   : > { %506 = vst [vmem:[%s910_s27 + $0x28] sm:$0xff] %v481_v13  ;;  %519 = vst [vmem:[%s910_s27 + $0x90] sm:$0xff] %v494_v14  ;;  %v383_v17 = vadd.f32 %v901_v30, %v382_v15  ;;  %v669_v18 = vpop.f32.mrb[13].mxu0  ;;  %v448_v19 = vadd.f32 %v901_v30, %v447_v16  ;;  %v708_v20 = vpop.f32.mrb[13].mxu1 }
  0xff   : > { %v482_v21 = vmax.f32 %v383_v17, 0.0  ;;  %v495_v22 = vmax.f32 %v448_v19, 0.0 }
 0x100   : > { %v387_v23 = vpop.f32.mrb[14].mxu0  ;;  %v452_v24 = vpop.f32.mrb[14].mxu1 }
 0x101   : > { %507 = vst [vmem:[%s910_s27 + $0x30] sm:$0xff] %v482_v21  ;;  %520 = vst [vmem:[%s910_s27 + $0x98] sm:$0xff] %v495_v22  ;;  %v388_v25 = vadd.f32 %v901_v30, %v387_v23  ;;  %v672_v26 = vpop.f32.mrb[15].mxu0  ;;  %v453_v27 = vadd.f32 %v901_v30, %v452_v24  ;;  %v711_v28 = vpop.f32.mrb[15].mxu1 }
 0x103   : > { %v483_v29 = vmax.f32 %v388_v25, 0.0  ;;  %v496_v31 = vmax.f32 %v453_v27, 0.0 }
 0x104   : > { %v392_v32 = vpop.f32.mrb[16].mxu0  ;;  %v457_v33 = vpop.f32.mrb[16].mxu1 }
 0x105   : > { %508 = vst [vmem:[%s910_s27 + $0x38] sm:$0xff] %v483_v29  ;;  %521 = vst [vmem:[%s910_s27 + $0xa0] sm:$0xff] %v496_v31  ;;  %v393_v34 = vadd.f32 %v901_v30, %v392_v32  ;;  %v675_v35 = vpop.f32.mrb[17].mxu0  ;;  %v458_v36 = vadd.f32 %v901_v30, %v457_v33  ;;  %v714_v37 = vpop.f32.mrb[17].mxu1 }
 0x107   : > { %v484_v38 = vmax.f32 %v393_v34, 0.0  ;;  %v497_v39 = vmax.f32 %v458_v36, 0.0 }
 0x108   : > { %v397_v40 = vpop.f32.mrb[18].mxu0  ;;  %v462_v41 = vpop.f32.mrb[18].mxu1 }
 0x109   : > { %509 = vst [vmem:[%s910_s27 + $0x40] sm:$0xff] %v484_v38  ;;  %522 = vst [vmem:[%s910_s27 + $0xa8] sm:$0xff] %v497_v39  ;;  %v398_v42 = vadd.f32 %v901_v30, %v397_v40  ;;  %v678_v43 = vpop.f32.mrb[19].mxu0  ;;  %v463_v44 = vadd.f32 %v901_v30, %v462_v41  ;;  %v717_v45 = vpop.f32.mrb[19].mxu1 }
 0x10b   : > { %v485_v46 = vmax.f32 %v398_v42, 0.0  ;;  %v498_v47 = vmax.f32 %v463_v44, 0.0 }
 0x10c   : > { %v402_v48 = vpop.f32.mrb[20].mxu0  ;;  %v467_v49 = vpop.f32.mrb[20].mxu1 }
 0x10d   : > { %510 = vst [vmem:[%s910_s27 + $0x48] sm:$0xff] %v485_v46  ;;  %523 = vst [vmem:[%s910_s27 + $0xb0] sm:$0xff] %v498_v47  ;;  %v403_v50 = vadd.f32 %v901_v30, %v402_v48  ;;  %v681_v51 = vpop.f32.mrb[21].mxu0  ;;  %v468_v52 = vadd.f32 %v901_v30, %v467_v49  ;;  %v720_v53 = vpop.f32.mrb[21].mxu1 }
 0x10f   : > { %v486_v54 = vmax.f32 %v403_v50, 0.0  ;;  %v499_v55 = vmax.f32 %v468_v52, 0.0 }
 0x110   : > { %v407_v56 = vpop.f32.mrb[22].mxu0  ;;  %v472_v57 = vpop.f32.mrb[22].mxu1 }
 0x111   : > { %511 = vst [vmem:[%s910_s27 + $0x50] sm:$0xff] %v486_v54  ;;  %524 = vst [vmem:[%s910_s27 + $0xb8] sm:$0xff] %v499_v55  ;;  %v408_v58 = vadd.f32 %v901_v30, %v407_v56  ;;  %v684_v59 = vpop.f32.mrb[23].mxu0  ;;  %v473_v60 = vadd.f32 %v901_v30, %v472_v57  ;;  %v723_v61 = vpop.f32.mrb[23].mxu1 }
 0x113   : > { %v487_v62 = vmax.f32 %v408_v58, 0.0  ;;  %v500_v63 = vmax.f32 %v473_v60, 0.0 }
 0x114   : > { %v412_v0 = vpop.f32.mrb[24].mxu0 }
 0x115   : > { %512 = vst [vmem:[%s910_s27 + $0x58] sm:$0xff] %v487_v62  ;;  %525 = vst [vmem:[%s910_s27 + $0xc0] sm:$0xff] %v500_v63  ;;  %v413_v1 = vadd.f32 %v901_v30, %v412_v0  ;;  %v687_v2 = vpop.f32.mrb[25].mxu0 }
 0x117   : > { %v488_v3 = vmax.f32 %v413_v1, 0.0 }
 0x119   : > { %513 = vst [vmem:[%s910_s27 + $0x60] sm:$0xff] %v488_v3 }
 0x11a PF: > { %s13_s12 = sadd.s32 1, %s748_s12  }
 0x11b   : > { %p10_p4 = scmp.ge.s32.totalorder %s13_s12, 4  }
 0x11d   :  { %12 = sbr.rel (!%p10_p4) target bundleno = 1 (0x1), region = 62 }

// kernel: _lambda_.6
= control target key start
LH: loop header
LB: loop body
LE: loop exit
PB: predicated region body
PF: predicated region fallthrough
CT: control target
= control target key end

     0   :  { %s508_s12 = smov 0   ;;  %s627_s0 = inlined_call_operand.vmem [shape: f32[112,144], index: 0, kind: input, shape index: {}]   ;;  %s628_s1 = inlined_call_operand.vmem [shape: f32[144,128], index: 1, kind: input, shape index: {}]   ;;  %s629_s2 = inlined_call_operand.vmem [shape: f32[8,128], index: 2, kind: input, shape index: {}]   ;;  %s630_s3 = inlined_call_operand.vmem [shape: f32[112,128], index: 3, kind: output, shape index: {}]  }
   0x1 LB: > { %s406_s13 = sadd.s32 4294967295, %s485_s12   ;;  %p410_p0 = scmp.ge.s32.totalorder %s485_s12, 1  ;;  %s485_s12 = sphi %s508_s12, %s13_s12  }
   0x2   : > { %p139_p1 = scmp.lt.s32.totalorder %s485_s12, 3 }
   0x4   : > { %p140_p2 = pnand %p410_p0, %p139_p1 }
   0x5   : > { %v191_v0 = vld [vmem:[%s628_s1] sm:$0xff] (!%p140_p2)  ;;  %v192_v1 = vld [vmem:[%s628_s1 + $0x8] sm:$0xff] (!%p140_p2)  ;;  %v193_v2 = vld [vmem:[%s628_s1 + $0x10] sm:$0xff] (!%p140_p2)  ;;  %s164_s20 = smul.u32 (!%p140_p2), 7, %s406_s13  ;;  %v487_v3 = vmov (!%p140_p2), 0.0|0.0   ;;  %vm214_vm0 = vcmask (!%p140_p2), 130048  }
   0x6   : > { %143 = sbr.rel (%p140_p2) target bundleno = 272 (0x110), region = 32  ;;  %425 = vmatprep.subr.bf16.mxu0 (!%p140_p2), %v487_v3  ;;  %v426_v4 = vpack.c.bf16 (!%p140_p2), %v192_v1, %v191_v0  ;;  %452 = vmatprep.subr.bf16.mxu1 (!%p140_p2), %v487_v3  ;;  %v194_v5 = vld [vmem:[%s628_s1 + $0x18] sm:$0xff] (!%p140_p2)  ;;  %v195_v7 = vld [vmem:[%s628_s1 + $0x20] sm:$0xff] (!%p140_p2)  ;;  %v196_v8 = vld [vmem:[%s628_s1 + $0x28] sm:$0xff] (!%p140_p2) }
   0x7   : > { %p165_p3 = scmp.lt.s32.totalorder (!%p140_p2), %s164_s20, 13  ;;  %v429_v6 = vpack.c.bf16 (!%p140_p2), %v194_v5, %v193_v2  ;;  %v432_v9 = vpack.c.bf16 (!%p140_p2), %v196_v8, %v195_v7  ;;  %v197_v10 = vld [vmem:[%s628_s1 + $0x30] sm:$0xff] (!%p140_p2)  ;;  %v198_v11 = vld [vmem:[%s628_s1 + $0x38] sm:$0xff] (!%p140_p2)  ;;  %v199_v15 = vld [vmem:[%s628_s1 + $0x40] sm:$0xff] (!%p140_p2) }
   0x8   : > { %427 = vmatpush1.bf16.msra.mxu0 (!%p140_p2), %v426_v4  ;;  %461 = vmatpush1.bf16.msra.mxu1 (!%p140_p2), %v426_v4  ;;  %v435_v14 = vpack.c.bf16 (!%p140_p2), %v198_v11, %v197_v10  ;;  %v200_v16 = vld [vmem:[%s628_s1 + $0x48] sm:$0xff] (!%p140_p2)  ;;  %v201_v18 = vld [vmem:[%s628_s1 + $0x50] sm:$0xff] (!%p140_p2)  ;;  %v202_v19 = vld [vmem:[%s628_s1 + $0x58] sm:$0xff] (!%p140_p2) }
   0x9   : > { %428 = vmatprep.subr.bf16.mxu0 (!%p140_p2), %v487_v3  ;;  %453 = vmatprep.subr.bf16.mxu1 (!%p140_p2), %v487_v3  ;;  %v438_v17 = vpack.c.bf16 (!%p140_p2), %v200_v16, %v199_v15  ;;  %v441_v20 = vpack.c.bf16 (!%p140_p2), %v202_v19, %v201_v18  ;;  %v203_v21 = vld [vmem:[%s628_s1 + $0x60] sm:$0xff] (!%p140_p2)  ;;  %v204_v22 = vld [vmem:[%s628_s1 + $0x68] sm:$0xff] (!%p140_p2)  ;;  %v205_v24 = vld [vmem:[%s628_s1 + $0x70] sm:$0xff] (!%p140_p2) }
   0xa   : > { %v444_v23 = vpack.c.bf16 (!%p140_p2), %v204_v22, %v203_v21  ;;  %v206_v25 = vld [vmem:[%s628_s1 + $0x78] sm:$0xff] (!%p140_p2)  ;;  %v207_v27 = vld [vmem:[%s628_s1 + $0x80] sm:$0xff] (!%p140_p2)  ;;  %v208_v28 = vld [vmem:[%s628_s1 + $0x88] sm:$0xff] (!%p140_p2) }
   0xb   : > { %v447_v26 = vpack.c.bf16 (!%p140_p2), %v206_v25, %v205_v24  ;;  %v450_v29 = vpack.c.bf16 (!%p140_p2), %v208_v28, %v207_v27  ;;  %v414_v42 = vld [vmem:[%s629_s2] ss:$0 sm:$0xff] (!%p140_p2) }
   0xc   : > { %430 = vmatpush1.bf16.msra.mxu0 (!%p140_p2), %v429_v6  ;;  %462 = vmatpush1.bf16.msra.mxu1 (!%p140_p2), %v429_v6 }
   0xd   : > { %s632_s20 = smov (!%p165_p3, %s164_s20), 13  ;;  %431 = vmatprep.subr.bf16.mxu0 %v487_v3  ;;  %454 = vmatprep.subr.bf16.mxu1 %v487_v3 }
   0xe   : > { %s424_s27 = sshll.u32 %s632_s20, 4  ;;  %s413_s6 = sshll.u32 %s632_s20, 3 }
   0xf   : > { %s547_s5 = scalar_lea.vmem %s627_s0, %s424_s27  ;;  %s175_s9 = scalar_lea.vmem %s630_s3, %s413_s6 }
  0x10   : > { %v178_v12 = vld [vmem:[%s547_s5 + $0x8] sm:$0xff]  ;;  %433 = vmatpush1.bf16.msra.mxu0 %v432_v9  ;;  %463 = vmatpush1.bf16.msra.mxu1 %v432_v9  ;;  %v177_v30 = vld [vmem:[%s547_s5] sm:$0xff]  ;;  %v180_v32 = vld [vmem:[%s547_s5 + $0x18] sm:$0xff] }
  0x11   : > { %v186_v13 = vld [vmem:[%s547_s5 + $0x48] sm:$0xff]  ;;  %415 = vmatprep.mubr.msk.f32.mxu0 %vm214_vm0, %v178_v12  ;;  %434 = vmatprep.subr.bf16.mxu0 %v487_v3  ;;  %v185_v31 = vld [vmem:[%s547_s5 + $0x40] sm:$0xff]  ;;  %v188_v33 = vld [vmem:[%s547_s5 + $0x58] sm:$0xff] }
  0x12   : > { %419 = vmatprep.mubr.msk.f32.mxu1 %vm214_vm0, %v186_v13  ;;  %455 = vmatprep.subr.bf16.mxu1 %v487_v3  ;;  %v179_v34 = vld [vmem:[%s547_s5 + $0x10] sm:$0xff]  ;;  %v182_v36 = vld [vmem:[%s547_s5 + $0x28] sm:$0xff]  ;;  %v181_v38 = vld [vmem:[%s547_s5 + $0x20] sm:$0xff] }
  0x13   : > { %v187_v35 = vld [vmem:[%s547_s5 + $0x50] sm:$0xff]  ;;  %v190_v37 = vld [vmem:[%s547_s5 + $0x68] sm:$0xff]  ;;  %v189_v39 = vld [vmem:[%s547_s5 + $0x60] sm:$0xff] }
  0x14   : > { %436 = vmatpush1.bf16.msra.mxu0 %v435_v14  ;;  %464 = vmatpush1.bf16.msra.mxu1 %v435_v14  ;;  %v184_v40 = vld [vmem:[%s547_s5 + $0x38] sm:$0xff]  ;;  %v183_v41 = vld [vmem:[%s547_s5 + $0x30] sm:$0xff] }
  0x15   : > { %437 = vmatprep.subr.bf16.mxu0 %v487_v3  ;;  %456 = vmatprep.subr.bf16.mxu1 %v487_v3 }
  0x18   : > { %439 = vmatpush1.bf16.msra.mxu0 %v438_v17  ;;  %465 = vmatpush1.bf16.msra.mxu1 %v438_v17 }
  0x19   : > { %440 = vmatprep.subr.bf16.mxu0 %v487_v3  ;;  %457 = vmatprep.subr.bf16.mxu1 %v487_v3 }
  0x1c   : > { %442 = vmatpush1.bf16.msra.mxu0 %v441_v20  ;;  %466 = vmatpush1.bf16.msra.mxu1 %v441_v20 }
  0x1d   : > { %443 = vmatprep.subr.bf16.mxu0 %v487_v3  ;;  %458 = vmatprep.subr.bf16.mxu1 %v487_v3 }
  0x20   : > { %445 = vmatpush1.bf16.msra.mxu0 %v444_v23  ;;  %467 = vmatpush1.bf16.msra.mxu1 %v444_v23 }
  0x21   : > { %446 = vmatprep.subr.bf16.mxu0 %v487_v3  ;;  %459 = vmatprep.subr.bf16.mxu1 %v487_v3 }
  0x24   : > { %448 = vmatpush1.bf16.msra.mxu0 %v447_v26  ;;  %468 = vmatpush1.bf16.msra.mxu1 %v447_v26 }
  0x25   : > { %449 = vmatprep.subr.bf16.mxu0 %v487_v3  ;;  %460 = vmatprep.subr.bf16.mxu1 %v487_v3 }
  0x28   : > { %451 = vmatpush1.bf16.msra.mxu0 %v450_v29  ;;  %469 = vmatpush1.bf16.msra.mxu1 %v450_v29 }
  0x2b   : > { %301 = vmatmul.mubr.f32.vlgmr.msra.gmra.mrb[0].mxu0 %v177_v30  ;;  %321 = vmatmul.mubr.f32.vlgmr.msra.gmra.mrb[0].mxu1 %v185_v31 }
  0x2c   : > { %416 = vmatprep.mubr.msk.f32.mxu0 %vm214_vm0, %v180_v32  ;;  %420 = vmatprep.mubr.msk.f32.mxu1 %vm214_vm0, %v188_v33 }
  0x2f   : > { %306 = vmatmul.mubr.f32.gmra.mrb[2].mxu0 %v179_v34  ;;  %326 = vmatmul.mubr.f32.gmra.mrb[2].mxu1 %v187_v35 }
  0x30   : > { %417 = vmatprep.mubr.msk.f32.mxu0 %vm214_vm0, %v182_v36  ;;  %421 = vmatprep.mubr.msk.f32.mxu1 %vm214_vm0, %v190_v37 }
  0x33   : > { %311 = vmatmul.mubr.f32.gmra.mrb[4].mxu0 %v181_v38  ;;  %331 = vmatmul.mubr.f32.gmra.mrb[4].mxu1 %v189_v39 }
  0x34   : > { %418 = vmatprep.mubr.msk.f32.mxu0 %vm214_vm0, %v184_v40 }
  0x37   : > { %316 = vmatmul.mubr.f32.gmra.mrb[6].mxu0 %v183_v41 }
  0xfe   : > { %v302_v43 = vpop.f32.mrb[0].mxu0  ;;  %v322_v44 = vpop.f32.mrb[0].mxu1 }
  0xff   : > { %v303_v45 = vadd.f32 %v414_v42, %v302_v43  ;;  %v304_v46 = vpop.f32.mrb[1].mxu0  ;;  %v323_v47 = vadd.f32 %v414_v42, %v322_v44  ;;  %v324_v48 = vpop.f32.mrb[1].mxu1 }
 0x101   : > { %v336_v49 = vmax.f32 %v303_v45, 0.0  ;;  %v340_v50 = vmax.f32 %v323_v47, 0.0 }
 0x102   : > { %v307_v51 = vpop.f32.mrb[2].mxu0  ;;  %v327_v52 = vpop.f32.mrb[2].mxu1 }
 0x103   : > { %343 = vst [vmem:[%s175_s9] sm:$0xff] %v336_v49  ;;  %347 = vst [vmem:[%s175_s9 + $0x20] sm:$0xff] %v340_v50  ;;  %v308_v53 = vadd.f32 %v414_v42, %v307_v51  ;;  %v309_v54 = vpop.f32.mrb[3].mxu0  ;;  %v328_v55 = vadd.f32 %v414_v42, %v327_v52  ;;  %v329_v56 = vpop.f32.mrb[3].mxu1 }
 0x105   : > { %v337_v57 = vmax.f32 %v308_v53, 0.0  ;;  %v341_v58 = vmax.f32 %v328_v55, 0.0 }
 0x106   : > { %v312_v59 = vpop.f32.mrb[4].mxu0  ;;  %v332_v60 = vpop.f32.mrb[4].mxu1 }
 0x107   : > { %344 = vst [vmem:[%s175_s9 + $0x8] sm:$0xff] %v337_v57  ;;  %348 = vst [vmem:[%s175_s9 + $0x28] sm:$0xff] %v341_v58  ;;  %v313_v61 = vadd.f32 %v414_v42, %v312_v59  ;;  %v314_v62 = vpop.f32.mrb[5].mxu0  ;;  %v333_v63 = vadd.f32 %v414_v42, %v332_v60  ;;  %v334_v0 = vpop.f32.mrb[5].mxu1 }
 0x109   : > { %v338_v1 = vmax.f32 %v313_v61, 0.0  ;;  %v342_v2 = vmax.f32 %v333_v63, 0.0 }
 0x10a   : > { %v317_v3 = vpop.f32.mrb[6].mxu0 }
 0x10b   : > { %345 = vst [vmem:[%s175_s9 + $0x10] sm:$0xff] %v338_v1  ;;  %349 = vst [vmem:[%s175_s9 + $0x30] sm:$0xff] %v342_v2  ;;  %v318_v4 = vadd.f32 %v414_v42, %v317_v3  ;;  %v319_v5 = vpop.f32.mrb[7].mxu0 }
 0x10d   : > { %v339_v6 = vmax.f32 %v318_v4, 0.0 }
 0x10f   : > { %346 = vst [vmem:[%s175_s9 + $0x18] sm:$0xff] %v339_v6 }
 0x110 PF: > { %s13_s12 = sadd.s32 1, %s485_s12  }
 0x111   : > { %p10_p4 = scmp.ge.s32.totalorder %s13_s12, 4  }
 0x113   :  { %12 = sbr.rel (!%p10_p4) target bundleno = 1 (0x1), region = 62 }

// kernel: _lambda_.7
= control target key start
LH: loop header
LB: loop body
LE: loop exit
PB: predicated region body
PF: predicated region fallthrough
CT: control target
= control target key end

     0   :  { %vm2236_vm0 = vmmov 0   ;;  %vm234_vm1 = vcmask 261120   ;;  %s3605_s1 = inlined_call_operand.vmem [shape: f32[1568,128], index: 1, kind: input, shape index: {}]   ;;  %s3606_s0 = inlined_call_operand.vmem [shape: f32[8,1568], index: 0, kind: input, shape index: {}]   ;;  %s3607_s3 = inlined_call_operand.vmem [shape: f32[128,1664], index: 3, kind: input, shape index: {}]   ;;  %s3608_s2 = inlined_call_operand.vmem [shape: f32[8,128], index: 2, kind: input, shape index: {}]   ;;  %s3609_s4 = inlined_call_operand.vmem [shape: f32[8,1664], index: 4, kind: input, shape index: {}]   ;;  %s3610_s5 = inlined_call_operand.vmem [shape: f32[8,1664], index: 5, kind: output, shape index: {}]  }
   0x1   :  { %v49_v0 = vld [vmem:[%s3605_s1 + $0x80] sm:$0xff]  ;;  %v50_v1 = vld [vmem:[%s3605_s1 + $0x88] sm:$0xff]  ;;  %v51_v11 = vld [vmem:[%s3605_s1 + $0x90] sm:$0xff] }
   0x2   :  { %v33_v2 = vld [vmem:[%s3605_s1] sm:$0xff]  ;;  %v1818_v3 = vpack.c.bf16 %v50_v1, %v49_v0  ;;  %v34_v4 = vld [vmem:[%s3605_s1 + $0x8] sm:$0xff]  ;;  %v52_v13 = vld [vmem:[%s3605_s1 + $0x98] sm:$0xff] }
   0x3   :  { %v81_v5 = vld [vmem:[%s3605_s1 + $0x180] sm:$0xff]  ;;  %v82_v6 = vld [vmem:[%s3605_s1 + $0x188] sm:$0xff]  ;;  %v1820_v7 = vpack.c.bf16 %v34_v4, %v33_v2  ;;  %v35_v14 = vld [vmem:[%s3605_s1 + $0x10] sm:$0xff]  ;;  %v1822_v16 = vpack.c.bf16 %v52_v13, %v51_v11 }
   0x4   :  { %v1850_v8 = vpack.c.bf16 %v82_v6, %v81_v5  ;;  %v65_v9 = vld [vmem:[%s3605_s1 + $0x100] sm:$0xff]  ;;  %v66_v10 = vld [vmem:[%s3605_s1 + $0x108] sm:$0xff]  ;;  %1819 = vmatprep.subr.bf16.mxu0 %v1818_v3  ;;  %v36_v15 = vld [vmem:[%s3605_s1 + $0x18] sm:$0xff] }
   0x5   :  { %v1852_v12 = vpack.c.bf16 %v66_v10, %v65_v9  ;;  %1821 = vmatpush3.bf16.msra.mxu0 %v1820_v7  ;;  %v1824_v17 = vpack.c.bf16 %v36_v15, %v35_v14  ;;  %v83_v18 = vld [vmem:[%s3605_s1 + $0x190] sm:$0xff]  ;;  %v84_v19 = vld [vmem:[%s3605_s1 + $0x198] sm:$0xff]  ;;  %v53_v23 = vld [vmem:[%s3605_s1 + $0xa0] sm:$0xff] }
   0x6   :  { %1851 = vmatprep.subr.bf16.mxu1 %v1850_v8  ;;  %v67_v20 = vld [vmem:[%s3605_s1 + $0x110] sm:$0xff]  ;;  %v1854_v21 = vpack.c.bf16 %v84_v19, %v83_v18  ;;  %v68_v22 = vld [vmem:[%s3605_s1 + $0x118] sm:$0xff]  ;;  %v54_v24 = vld [vmem:[%s3605_s1 + $0xa8] sm:$0xff]  ;;  %1823 = vmatprep.subr.bf16.mxu0 %v1822_v16 }
   0x7   :  { %1853 = vmatpush3.bf16.msra.mxu1 %v1852_v12  ;;  %v1856_v25 = vpack.c.bf16 %v68_v22, %v67_v20  ;;  %v1826_v26 = vpack.c.bf16 %v54_v24, %v53_v23  ;;  %v37_v27 = vld [vmem:[%s3605_s1 + $0x20] sm:$0xff]  ;;  %v38_v28 = vld [vmem:[%s3605_s1 + $0x28] sm:$0xff]  ;;  %v55_v35 = vld [vmem:[%s3605_s1 + $0xb0] sm:$0xff] }
   0x8   :  { %v85_v29 = vld [vmem:[%s3605_s1 + $0x1a0] sm:$0xff]  ;;  %1855 = vmatprep.subr.bf16.mxu1 %v1854_v21  ;;  %v86_v30 = vld [vmem:[%s3605_s1 + $0x1a8] sm:$0xff]  ;;  %v1828_v33 = vpack.c.bf16 %v38_v28, %v37_v27  ;;  %v56_v36 = vld [vmem:[%s3605_s1 + $0xb8] sm:$0xff] }
   0x9   :  { %v69_v31 = vld [vmem:[%s3605_s1 + $0x120] sm:$0xff]  ;;  %v70_v32 = vld [vmem:[%s3605_s1 + $0x128] sm:$0xff]  ;;  %1825 = vmatpush3.bf16.msra.mxu0 %v1824_v17  ;;  %v1858_v34 = vpack.c.bf16 %v86_v30, %v85_v29  ;;  %v39_v37 = vld [vmem:[%s3605_s1 + $0x30] sm:$0xff]  ;;  %v1830_v39 = vpack.c.bf16 %v56_v36, %v55_v35 }
   0xa   :  { %1827 = vmatprep.subr.bf16.mxu0 %v1826_v26  ;;  %v1860_v38 = vpack.c.bf16 %v70_v32, %v69_v31  ;;  %v40_v40 = vld [vmem:[%s3605_s1 + $0x38] sm:$0xff]  ;;  %v87_v41 = vld [vmem:[%s3605_s1 + $0x1b0] sm:$0xff]  ;;  %v57_v46 = vld [vmem:[%s3605_s1 + $0xc0] sm:$0xff] }
   0xb   :  { %1857 = vmatpush3.bf16.msra.mxu1 %v1856_v25  ;;  %v88_v42 = vld [vmem:[%s3605_s1 + $0x1b8] sm:$0xff]  ;;  %v71_v44 = vld [vmem:[%s3605_s1 + $0x130] sm:$0xff]  ;;  %v58_v47 = vld [vmem:[%s3605_s1 + $0xc8] sm:$0xff]  ;;  %v1832_v48 = vpack.c.bf16 %v40_v40, %v39_v37 }
   0xc   :  { %1859 = vmatprep.subr.bf16.mxu1 %v1858_v34  ;;  %v1862_v43 = vpack.c.bf16 %v88_v42, %v87_v41  ;;  %v72_v45 = vld [vmem:[%s3605_s1 + $0x138] sm:$0xff]  ;;  %v89_v49 = vld [vmem:[%s3605_s1 + $0x1c0] sm:$0xff]  ;;  %v90_v50 = vld [vmem:[%s3605_s1 + $0x1c8] sm:$0xff]  ;;  %v1834_v52 = vpack.c.bf16 %v58_v47, %v57_v46 }
   0xd   :  { %1829 = vmatpush3.bf16.msra.mxu0 %v1828_v33  ;;  %v1864_v51 = vpack.c.bf16 %v72_v45, %v71_v44  ;;  %v41_v53 = vld [vmem:[%s3605_s1 + $0x40] sm:$0xff]  ;;  %v42_v54 = vld [vmem:[%s3605_s1 + $0x48] sm:$0xff]  ;;  %v1866_v56 = vpack.c.bf16 %v90_v50, %v89_v49  ;;  %v59_v58 = vld [vmem:[%s3605_s1 + $0xd0] sm:$0xff] }
   0xe   :  { %1831 = vmatprep.subr.bf16.mxu0 %v1830_v39  ;;  %v73_v55 = vld [vmem:[%s3605_s1 + $0x140] sm:$0xff]  ;;  %v74_v57 = vld [vmem:[%s3605_s1 + $0x148] sm:$0xff]  ;;  %v60_v59 = vld [vmem:[%s3605_s1 + $0xd8] sm:$0xff]  ;;  %v1836_v62 = vpack.c.bf16 %v42_v54, %v41_v53 }
   0xf   :  { %1861 = vmatpush3.bf16.msra.mxu1 %v1860_v38  ;;  %v91_v60 = vld [vmem:[%s3605_s1 + $0x1d0] sm:$0xff]  ;;  %v92_v61 = vld [vmem:[%s3605_s1 + $0x1d8] sm:$0xff]  ;;  %v1868_v63 = vpack.c.bf16 %v74_v57, %v73_v55  ;;  %v1838_v0 = vpack.c.bf16 %v60_v59, %v59_v58  ;;  %v61_v6 = vld [vmem:[%s3605_s1 + $0xe0] sm:$0xff] }
  0x10   :  { %1863 = vmatprep.subr.bf16.mxu1 %v1862_v43  ;;  %v43_v1 = vld [vmem:[%s3605_s1 + $0x50] sm:$0xff]  ;;  %v44_v2 = vld [vmem:[%s3605_s1 + $0x58] sm:$0xff]  ;;  %v1870_v4 = vpack.c.bf16 %v92_v61, %v91_v60  ;;  %v62_v7 = vld [vmem:[%s3605_s1 + $0xe8] sm:$0xff] }
  0x11   :  { %1833 = vmatpush3.bf16.msra.mxu0 %v1832_v48  ;;  %v75_v3 = vld [vmem:[%s3605_s1 + $0x150] sm:$0xff]  ;;  %v76_v5 = vld [vmem:[%s3605_s1 + $0x158] sm:$0xff]  ;;  %v93_v8 = vld [vmem:[%s3605_s1 + $0x1e0] sm:$0xff]  ;;  %v1840_v10 = vpack.c.bf16 %v44_v2, %v43_v1  ;;  %v1842_v14 = vpack.c.bf16 %v62_v7, %v61_v6 }
  0x12   :  { %1835 = vmatprep.subr.bf16.mxu0 %v1834_v52  ;;  %v94_v9 = vld [vmem:[%s3605_s1 + $0x1e8] sm:$0xff]  ;;  %v45_v11 = vld [vmem:[%s3605_s1 + $0x60] sm:$0xff]  ;;  %v1872_v13 = vpack.c.bf16 %v76_v5, %v75_v3  ;;  %v63_v19 = vld [vmem:[%s3605_s1 + $0xf0] sm:$0xff] }
  0x13   :  { %1865 = vmatpush3.bf16.msra.mxu1 %v1864_v51  ;;  %v21_v12 = vld [vmem:[%s3606_s0 + $0x8] sm:$0xff]  ;;  %v77_v16 = vld [vmem:[%s3605_s1 + $0x160] sm:$0xff]  ;;  %v1874_v18 = vpack.c.bf16 %v94_v9, %v93_v8  ;;  %v64_v20 = vld [vmem:[%s3605_s1 + $0xf8] sm:$0xff] }
  0x14   :  { %1867 = vmatprep.subr.bf16.mxu1 %v1866_v56  ;;  %v46_v15 = vld [vmem:[%s3605_s1 + $0x68] sm:$0xff]  ;;  %302 = vmatprep.mubr.f32.mxu0 %v21_v12  ;;  %v23_v21 = vld [vmem:[%s3606_s0 + $0x18] sm:$0xff]  ;;  %v95_v22 = vld [vmem:[%s3605_s1 + $0x1f0] sm:$0xff]  ;;  %v1846_v26 = vpack.c.bf16 %v64_v20, %v63_v19 }
  0x15   :  { %1837 = vmatpush3.bf16.msra.mxu0 %v1836_v62  ;;  %v78_v17 = vld [vmem:[%s3605_s1 + $0x168] sm:$0xff]  ;;  %v96_v23 = vld [vmem:[%s3605_s1 + $0x1f8] sm:$0xff]  ;;  %372 = vmatprep.mubr.f32.mxu1 %v23_v21  ;;  %v1844_v24 = vpack.c.bf16 %v46_v15, %v45_v11  ;;  %v47_v27 = vld [vmem:[%s3605_s1 + $0x70] sm:$0xff] }
  0x16   :  { %1839 = vmatprep.subr.bf16.mxu0 %v1838_v0  ;;  %v1876_v25 = vpack.c.bf16 %v78_v17, %v77_v16  ;;  %v48_v28 = vld [vmem:[%s3605_s1 + $0x78] sm:$0xff]  ;;  %v79_v29 = vld [vmem:[%s3605_s1 + $0x170] sm:$0xff]  ;;  %v1878_v30 = vpack.c.bf16 %v96_v23, %v95_v22  ;;  %v113_v32 = vld [vmem:[%s3605_s1 + $0x280] sm:$0xff] }
  0x17   :  { %1869 = vmatpush3.bf16.msra.mxu1 %v1868_v63  ;;  %v80_v31 = vld [vmem:[%s3605_s1 + $0x178] sm:$0xff]  ;;  %v114_v33 = vld [vmem:[%s3605_s1 + $0x288] sm:$0xff]  ;;  %v145_v34 = vld [vmem:[%s3605_s1 + $0x380] sm:$0xff]  ;;  %v1848_v36 = vpack.c.bf16 %v48_v28, %v47_v27 }
  0x18   :  { %1871 = vmatprep.subr.bf16.mxu1 %v1870_v4  ;;  %v146_v35 = vld [vmem:[%s3605_s1 + $0x388] sm:$0xff]  ;;  %v1880_v37 = vpack.c.bf16 %v80_v31, %v79_v29  ;;  %v1882_v38 = vpack.c.bf16 %v114_v33, %v113_v32  ;;  %v97_v39 = vld [vmem:[%s3605_s1 + $0x200] sm:$0xff]  ;;  %v115_v44 = vld [vmem:[%s3605_s1 + $0x290] sm:$0xff] }
  0x19   :  { %1841 = vmatpush3.bf16.msra.mxu0 %v1840_v10  ;;  %v98_v40 = vld [vmem:[%s3605_s1 + $0x208] sm:$0xff]  ;;  %v129_v41 = vld [vmem:[%s3605_s1 + $0x300] sm:$0xff]  ;;  %v1914_v42 = vpack.c.bf16 %v146_v35, %v145_v34  ;;  %v116_v45 = vld [vmem:[%s3605_s1 + $0x298] sm:$0xff] }
  0x1a   :  { %1843 = vmatprep.subr.bf16.mxu0 %v1842_v14  ;;  %v130_v43 = vld [vmem:[%s3605_s1 + $0x308] sm:$0xff]  ;;  %v147_v46 = vld [vmem:[%s3605_s1 + $0x390] sm:$0xff]  ;;  %v148_v47 = vld [vmem:[%s3605_s1 + $0x398] sm:$0xff]  ;;  %v1884_v49 = vpack.c.bf16 %v98_v40, %v97_v39  ;;  %v1886_v52 = vpack.c.bf16 %v116_v45, %v115_v44 }
  0x1b   :  { %1873 = vmatpush3.bf16.msra.mxu1 %v1872_v13  ;;  %v20_v48 = vld [vmem:[%s3606_s0] sm:$0xff]  ;;  %v22_v50 = vld [vmem:[%s3606_s0 + $0x10] sm:$0xff]  ;;  %v1916_v51 = vpack.c.bf16 %v130_v43, %v129_v41  ;;  %v100_v54 = vld [vmem:[%s3605_s1 + $0x218] sm:$0xff]  ;;  %v1918_v56 = vpack.c.bf16 %v148_v47, %v147_v46 }
  0x1c   :  { %1875 = vmatprep.subr.bf16.mxu1 %v1874_v18  ;;  %v99_v53 = vld [vmem:[%s3605_s1 + $0x210] sm:$0xff]  ;;  %v132_v57 = vld [vmem:[%s3605_s1 + $0x318] sm:$0xff]  ;;  %v117_v58 = vld [vmem:[%s3605_s1 + $0x2a0] sm:$0xff] }
  0x1d   :  { %1845 = vmatpush3.bf16.msra.mxu0 %v1844_v24  ;;  %v131_v55 = vld [vmem:[%s3605_s1 + $0x310] sm:$0xff]  ;;  %v118_v59 = vld [vmem:[%s3605_s1 + $0x2a8] sm:$0xff]  ;;  %v149_v60 = vld [vmem:[%s3605_s1 + $0x3a0] sm:$0xff]  ;;  %v1888_v62 = vpack.c.bf16 %v100_v54, %v99_v53 }
  0x1e   :  { %1847 = vmatprep.subr.bf16.mxu0 %v1846_v26  ;;  %v150_v61 = vld [vmem:[%s3605_s1 + $0x3a8] sm:$0xff]  ;;  %v1920_v63 = vpack.c.bf16 %v132_v57, %v131_v55  ;;  %v1890_v0 = vpack.c.bf16 %v118_v59, %v117_v58  ;;  %v101_v1 = vld [vmem:[%s3605_s1 + $0x220] sm:$0xff]  ;;  %v119_v6 = vld [vmem:[%s3605_s1 + $0x2b0] sm:$0xff] }
  0x1f   :  { %1877 = vmatpush3.bf16.msra.mxu1 %v1876_v25  ;;  %v102_v2 = vld [vmem:[%s3605_s1 + $0x228] sm:$0xff]  ;;  %v133_v3 = vld [vmem:[%s3605_s1 + $0x320] sm:$0xff]  ;;  %v1922_v4 = vpack.c.bf16 %v150_v61, %v149_v60  ;;  %v120_v7 = vld [vmem:[%s3605_s1 + $0x2b8] sm:$0xff] }
  0x20   :  { %1879 = vmatprep.subr.bf16.mxu1 %v1878_v30  ;;  %v134_v5 = vld [vmem:[%s3605_s1 + $0x328] sm:$0xff]  ;;  %v151_v8 = vld [vmem:[%s3605_s1 + $0x3b0] sm:$0xff]  ;;  %v152_v9 = vld [vmem:[%s3605_s1 + $0x3b8] sm:$0xff]  ;;  %v1892_v10 = vpack.c.bf16 %v102_v2, %v101_v1  ;;  %v1894_v12 = vpack.c.bf16 %v120_v7, %v119_v6 }
  0x21   :  { %1849 = vmatpush3.bf16.msra.mxu0 %v1848_v36  ;;  %v1924_v11 = vpack.c.bf16 %v134_v5, %v133_v3  ;;  %v103_v13 = vld [vmem:[%s3605_s1 + $0x230] sm:$0xff]  ;;  %v104_v14 = vld [vmem:[%s3605_s1 + $0x238] sm:$0xff]  ;;  %v1926_v16 = vpack.c.bf16 %v152_v9, %v151_v8  ;;  %v121_v18 = vld [vmem:[%s3605_s1 + $0x2c0] sm:$0xff] }
  0x22   :  { %1883 = vmatprep.subr.bf16.mxu0 %v1882_v38  ;;  %v135_v15 = vld [vmem:[%s3605_s1 + $0x330] sm:$0xff]  ;;  %v136_v17 = vld [vmem:[%s3605_s1 + $0x338] sm:$0xff]  ;;  %v122_v19 = vld [vmem:[%s3605_s1 + $0x2c8] sm:$0xff]  ;;  %v1896_v23 = vpack.c.bf16 %v104_v14, %v103_v13 }
  0x23   :  { %1881 = vmatpush3.bf16.msra.mxu1 %v1880_v37  ;;  %v153_v20 = vld [vmem:[%s3605_s1 + $0x3c0] sm:$0xff]  ;;  %v154_v21 = vld [vmem:[%s3605_s1 + $0x3c8] sm:$0xff]  ;;  %v1928_v25 = vpack.c.bf16 %v136_v17, %v135_v15  ;;  %v1898_v26 = vpack.c.bf16 %v122_v19, %v121_v18  ;;  %v27_v29 = vld [vmem:[%s3606_s0 + $0x38] sm:$0xff] }
  0x24   :  { %1915 = vmatprep.subr.bf16.mxu1 %v1914_v42  ;;  %303 = vmatmul.mubr.f32.vlgmr.msra.gmra.mrb[0].mxu0 %v20_v48  ;;  %v25_v22 = vld [vmem:[%s3606_s0 + $0x28] sm:$0xff]  ;;  %v105_v24 = vld [vmem:[%s3605_s1 + $0x240] sm:$0xff]  ;;  %v1930_v30 = vpack.c.bf16 %v154_v21, %v153_v20  ;;  %v123_v32 = vld [vmem:[%s3605_s1 + $0x2d0] sm:$0xff] }
  0x25   :  { %1885 = vmatpush3.bf16.msra.mxu0 %v1884_v49  ;;  %442 = vmatprep.mubr.f32.mxu0 %v25_v22  ;;  %v106_v27 = vld [vmem:[%s3605_s1 + $0x248] sm:$0xff]  ;;  %v137_v28 = vld [vmem:[%s3605_s1 + $0x340] sm:$0xff]  ;;  %v124_v33 = vld [vmem:[%s3605_s1 + $0x2d8] sm:$0xff] }
  0x26   :  { %373 = vmatmul.mubr.f32.vlgmr.msra.gmra.mrb[0].mxu1 %v22_v50  ;;  %1887 = vmatprep.subr.bf16.mxu0 %v1886_v52  ;;  %v138_v31 = vld [vmem:[%s3605_s1 + $0x348] sm:$0xff]  ;;  %v155_v34 = vld [vmem:[%s3605_s1 + $0x3d0] sm:$0xff]  ;;  %v156_v35 = vld [vmem:[%s3605_s1 + $0x3d8] sm:$0xff]  ;;  %v1900_v36 = vpack.c.bf16 %v106_v27, %v105_v24  ;;  %v1902_v38 = vpack.c.bf16 %v124_v33, %v123_v32 }
  0x27   :  { %1917 = vmatpush3.bf16.msra.mxu1 %v1916_v51  ;;  %512 = vmatprep.mubr.f32.mxu1 %v27_v29  ;;  %v1932_v37 = vpack.c.bf16 %v138_v31, %v137_v28  ;;  %v107_v39 = vld [vmem:[%s3605_s1 + $0x250] sm:$0xff]  ;;  %v108_v40 = vld [vmem:[%s3605_s1 + $0x258] sm:$0xff]  ;;  %v1934_v42 = vpack.c.bf16 %v156_v35, %v155_v34  ;;  %v125_v44 = vld [vmem:[%s3605_s1 + $0x2e0] sm:$0xff] }
  0x28   :  { %1919 = vmatprep.subr.bf16.mxu1 %v1918_v56  ;;  %v139_v41 = vld [vmem:[%s3605_s1 + $0x350] sm:$0xff]  ;;  %v140_v43 = vld [vmem:[%s3605_s1 + $0x358] sm:$0xff]  ;;  %v126_v45 = vld [vmem:[%s3605_s1 + $0x2e8] sm:$0xff]  ;;  %v1904_v48 = vpack.c.bf16 %v108_v40, %v107_v39 }
  0x29   :  { %1889 = vmatpush3.bf16.msra.mxu0 %v1888_v62  ;;  %v157_v46 = vld [vmem:[%s3605_s1 + $0x3e0] sm:$0xff]  ;;  %v158_v47 = vld [vmem:[%s3605_s1 + $0x3e8] sm:$0xff]  ;;  %v1936_v49 = vpack.c.bf16 %v140_v43, %v139_v41  ;;  %v1906_v50 = vpack.c.bf16 %v126_v45, %v125_v44  ;;  %v127_v56 = vld [vmem:[%s3605_s1 + $0x2f0] sm:$0xff] }
  0x2a   :  { %1891 = vmatprep.subr.bf16.mxu0 %v1890_v0  ;;  %v109_v51 = vld [vmem:[%s3605_s1 + $0x260] sm:$0xff]  ;;  %v110_v52 = vld [vmem:[%s3605_s1 + $0x268] sm:$0xff]  ;;  %v1938_v54 = vpack.c.bf16 %v158_v47, %v157_v46  ;;  %v128_v57 = vld [vmem:[%s3605_s1 + $0x2f8] sm:$0xff] }
  0x2b   :  { %1921 = vmatpush3.bf16.msra.mxu1 %v1920_v63  ;;  %v141_v53 = vld [vmem:[%s3605_s1 + $0x360] sm:$0xff]  ;;  %v142_v55 = vld [vmem:[%s3605_s1 + $0x368] sm:$0xff]  ;;  %v159_v58 = vld [vmem:[%s3605_s1 + $0x3f0] sm:$0xff]  ;;  %v1908_v60 = vpack.c.bf16 %v110_v52, %v109_v51  ;;  %v1910_v62 = vpack.c.bf16 %v128_v57, %v127_v56 }
  0x2c   :  { %1923 = vmatprep.subr.bf16.mxu1 %v1922_v4  ;;  %v160_v59 = vld [vmem:[%s3605_s1 + $0x3f8] sm:$0xff]  ;;  %v1940_v61 = vpack.c.bf16 %v142_v55, %v141_v53  ;;  %v111_v63 = vld [vmem:[%s3605_s1 + $0x270] sm:$0xff]  ;;  %v177_v4 = vld [vmem:[%s3605_s1 + $0x480] sm:$0xff] }
  0x2d   :  { %1893 = vmatpush3.bf16.msra.mxu0 %v1892_v10  ;;  %v112_v0 = vld [vmem:[%s3605_s1 + $0x278] sm:$0xff]  ;;  %v143_v1 = vld [vmem:[%s3605_s1 + $0x370] sm:$0xff]  ;;  %v1942_v2 = vpack.c.bf16 %v160_v59, %v159_v58  ;;  %v178_v5 = vld [vmem:[%s3605_s1 + $0x488] sm:$0xff] }
  0x2e   :  { %1895 = vmatprep.subr.bf16.mxu0 %v1894_v12  ;;  %v144_v3 = vld [vmem:[%s3605_s1 + $0x378] sm:$0xff]  ;;  %v209_v6 = vld [vmem:[%s3605_s1 + $0x580] sm:$0xff]  ;;  %v210_v7 = vld [vmem:[%s3605_s1 + $0x588] sm:$0xff]  ;;  %v1912_v8 = vpack.c.bf16 %v112_v0, %v111_v63  ;;  %v1946_v10 = vpack.c.bf16 %v178_v5, %v177_v4 }
  0x2f   :  { %1925 = vmatpush3.bf16.msra.mxu1 %v1924_v11  ;;  %v1944_v9 = vpack.c.bf16 %v144_v3, %v143_v1  ;;  %v161_v11 = vld [vmem:[%s3605_s1 + $0x400] sm:$0xff]  ;;  %v162_v12 = vld [vmem:[%s3605_s1 + $0x408] sm:$0xff]  ;;  %v1978_v14 = vpack.c.bf16 %v210_v7, %v209_v6  ;;  %v180_v17 = vld [vmem:[%s3605_s1 + $0x498] sm:$0xff] }
  0x30   :  { %1927 = vmatprep.subr.bf16.mxu1 %v1926_v16  ;;  %v193_v13 = vld [vmem:[%s3605_s1 + $0x500] sm:$0xff]  ;;  %v194_v15 = vld [vmem:[%s3605_s1 + $0x508] sm:$0xff]  ;;  %v179_v16 = vld [vmem:[%s3605_s1 + $0x490] sm:$0xff]  ;;  %v1948_v21 = vpack.c.bf16 %v162_v12, %v161_v11 }
  0x31   :  { %1897 = vmatpush3.bf16.msra.mxu0 %v1896_v23  ;;  %v211_v18 = vld [vmem:[%s3605_s1 + $0x590] sm:$0xff]  ;;  %v212_v19 = vld [vmem:[%s3605_s1 + $0x598] sm:$0xff]  ;;  %v24_v20 = vld [vmem:[%s3606_s0 + $0x20] sm:$0xff]  ;;  %v1980_v23 = vpack.c.bf16 %v194_v15, %v193_v13  ;;  %v1950_v24 = vpack.c.bf16 %v180_v17, %v179_v16 }
  0x32   :  { %1899 = vmatprep.subr.bf16.mxu0 %v1898_v26  ;;  %v26_v22 = vld [vmem:[%s3606_s0 + $0x30] sm:$0xff]  ;;  %v164_v26 = vld [vmem:[%s3605_s1 + $0x418] sm:$0xff]  ;;  %v1982_v28 = vpack.c.bf16 %v212_v19, %v211_v18  ;;  %v182_v31 = vld [vmem:[%s3605_s1 + $0x4a8] sm:$0xff] }
  0x33   :  { %1929 = vmatpush3.bf16.msra.mxu1 %v1928_v25  ;;  %v163_v25 = vld [vmem:[%s3605_s1 + $0x410] sm:$0xff]  ;;  %v196_v29 = vld [vmem:[%s3605_s1 + $0x518] sm:$0xff]  ;;  %v213_v32 = vld [vmem:[%s3605_s1 + $0x5a0] sm:$0xff] }
  0x34   :  { %1931 = vmatprep.subr.bf16.mxu1 %v1930_v30  ;;  %v195_v27 = vld [vmem:[%s3605_s1 + $0x510] sm:$0xff]  ;;  %v181_v30 = vld [vmem:[%s3605_s1 + $0x4a0] sm:$0xff]  ;;  %v214_v33 = vld [vmem:[%s3605_s1 + $0x5a8] sm:$0xff]  ;;  %v1952_v35 = vpack.c.bf16 %v164_v26, %v163_v25 }
  0x35   :  { %1901 = vmatpush3.bf16.msra.mxu0 %v1900_v36  ;;  %v29_v34 = vld [vmem:[%s3606_s0 + $0x48] sm:$0xff]  ;;  %v31_v36 = vld [vmem:[%s3606_s0 + $0x58] sm:$0xff]  ;;  %v165_v39 = vld [vmem:[%s3605_s1 + $0x420] sm:$0xff] }
  0x36   :  { %1903 = vmatprep.subr.bf16.mxu0 %v1902_v38  ;;  %v1954_v38 = vpack.c.bf16 %v182_v31, %v181_v30  ;;  %v166_v40 = vld [vmem:[%s3605_s1 + $0x428] sm:$0xff]  ;;  %v197_v41 = vld [vmem:[%s3605_s1 + $0x520] sm:$0xff]  ;;  %v183_v44 = vld [vmem:[%s3605_s1 + $0x4b0] sm:$0xff] }
  0x37   :  { %1933 = vmatpush3.bf16.msra.mxu1 %v1932_v37  ;;  %v1984_v37 = vpack.c.bf16 %v196_v29, %v195_v27  ;;  %v198_v43 = vld [vmem:[%s3605_s1 + $0x528] sm:$0xff]  ;;  %v184_v45 = vld [vmem:[%s3605_s1 + $0x4b8] sm:$0xff]  ;;  %v215_v46 = vld [vmem:[%s3605_s1 + $0x5b0] sm:$0xff] }
  0x38   :  { %1935 = vmatprep.subr.bf16.mxu1 %v1934_v42  ;;  %v1986_v42 = vpack.c.bf16 %v214_v33, %v213_v32  ;;  %v216_v47 = vld [vmem:[%s3605_s1 + $0x5b8] sm:$0xff]  ;;  %v167_v51 = vld [vmem:[%s3605_s1 + $0x430] sm:$0xff]  ;;  %v185_v56 = vld [vmem:[%s3605_s1 + $0x4c0] sm:$0xff] }
  0x39   :  { %1905 = vmatpush3.bf16.msra.mxu0 %v1904_v48  ;;  %v1956_v48 = vpack.c.bf16 %v166_v40, %v165_v39  ;;  %v168_v52 = vld [vmem:[%s3605_s1 + $0x438] sm:$0xff]  ;;  %v199_v53 = vld [vmem:[%s3605_s1 + $0x530] sm:$0xff]  ;;  %v186_v57 = vld [vmem:[%s3605_s1 + $0x4c8] sm:$0xff] }
  0x3a   :  { %1907 = vmatprep.subr.bf16.mxu0 %v1906_v50  ;;  %v1958_v50 = vpack.c.bf16 %v184_v45, %v183_v44  ;;  %v200_v55 = vld [vmem:[%s3605_s1 + $0x538] sm:$0xff]  ;;  %v217_v58 = vld [vmem:[%s3605_s1 + $0x5c0] sm:$0xff]  ;;  %v218_v59 = vld [vmem:[%s3605_s1 + $0x5c8] sm:$0xff] }
  0x3b   :  { %1937 = vmatpush3.bf16.msra.mxu1 %v1936_v49  ;;  %v1988_v49 = vpack.c.bf16 %v198_v43, %v197_v41  ;;  %v169_v63 = vld [vmem:[%s3605_s1 + $0x440] sm:$0xff]  ;;  %v170_v0 = vld [vmem:[%s3605_s1 + $0x448] sm:$0xff]  ;;  %v187_v4 = vld [vmem:[%s3605_s1 + $0x4d0] sm:$0xff] }
  0x3c   :  { %1939 = vmatprep.subr.bf16.mxu1 %v1938_v54  ;;  %v1990_v54 = vpack.c.bf16 %v216_v47, %v215_v46  ;;  %v201_v1 = vld [vmem:[%s3605_s1 + $0x540] sm:$0xff]  ;;  %v202_v3 = vld [vmem:[%s3605_s1 + $0x548] sm:$0xff]  ;;  %v188_v5 = vld [vmem:[%s3605_s1 + $0x4d8] sm:$0xff]  ;;  %v2235_v46 = vmov 0.0|0.0  }
  0x3d   :  { %1909 = vmatpush3.bf16.msra.mxu0 %v1908_v60  ;;  %v1960_v60 = vpack.c.bf16 %v168_v52, %v167_v51  ;;  %v219_v6 = vld [vmem:[%s3605_s1 + $0x5d0] sm:$0xff]  ;;  %v220_v7 = vld [vmem:[%s3605_s1 + $0x5d8] sm:$0xff]  ;;  %v189_v16 = vld [vmem:[%s3605_s1 + $0x4e0] sm:$0xff]  ;;  %v2237_v51 = vmov 0.0  }
  0x3e   :  { %1911 = vmatprep.subr.bf16.mxu0 %v1910_v62  ;;  %v1962_v62 = vpack.c.bf16 %v186_v57, %v185_v56  ;;  %v171_v11 = vld [vmem:[%s3605_s1 + $0x450] sm:$0xff]  ;;  %v172_v12 = vld [vmem:[%s3605_s1 + $0x458] sm:$0xff]  ;;  %v190_v17 = vld [vmem:[%s3605_s1 + $0x4e8] sm:$0xff] }
  0x3f   :  { %1941 = vmatpush3.bf16.msra.mxu1 %v1940_v61  ;;  %v1992_v61 = vpack.c.bf16 %v200_v55, %v199_v53  ;;  %v203_v13 = vld [vmem:[%s3605_s1 + $0x550] sm:$0xff]  ;;  %v204_v15 = vld [vmem:[%s3605_s1 + $0x558] sm:$0xff]  ;;  %v221_v18 = vld [vmem:[%s3605_s1 + $0x5e0] sm:$0xff] }
  0x40   :  { %1943 = vmatprep.subr.bf16.mxu1 %v1942_v2  ;;  %v1994_v2 = vpack.c.bf16 %v218_v59, %v217_v58  ;;  %v222_v19 = vld [vmem:[%s3605_s1 + $0x5e8] sm:$0xff]  ;;  %v205_v25 = vld [vmem:[%s3605_s1 + $0x560] sm:$0xff]  ;;  %v192_v29 = vld [vmem:[%s3605_s1 + $0x4f8] sm:$0xff] }
  0x41   :  { %1913 = vmatpush3.bf16.msra.mxu0 %v1912_v8  ;;  %v1964_v8 = vpack.c.bf16 %v170_v0, %v169_v63  ;;  %v2002_v26 = vpack.c.bf16 %v222_v19, %v221_v18  ;;  %v206_v27 = vld [vmem:[%s3605_s1 + $0x568] sm:$0xff]  ;;  %v223_v30 = vld [vmem:[%s3605_s1 + $0x5f0] sm:$0xff]  ;;  %v224_v31 = vld [vmem:[%s3605_s1 + $0x5f8] sm:$0xff] }
  0x42   :  { %1947 = vmatprep.subr.bf16.mxu0 %v1946_v10  ;;  %v1966_v10 = vpack.c.bf16 %v188_v5, %v187_v4  ;;  %v2004_v33 = vpack.c.bf16 %v206_v27, %v205_v25  ;;  %v208_v39 = vld [vmem:[%s3605_s1 + $0x578] sm:$0xff]  ;;  %v226_v43 = vld [vmem:[%s3605_s1 + $0x608] sm:$0xff]  ;;  %v28_v44 = vld [vmem:[%s3606_s0 + $0x40] sm:$0xff] }
  0x43   :  { %1945 = vmatpush3.bf16.msra.mxu1 %v1944_v9  ;;  %v1996_v9 = vpack.c.bf16 %v202_v3, %v201_v1  ;;  %v30_v47 = vld [vmem:[%s3606_s0 + $0x50] sm:$0xff]  ;;  %v32_v52 = vld [vmem:[%s3606_s0 + $0x60] sm:$0xff]  ;;  %v729_v53 = vld [vmem:[%s3607_s3 + $0x8] sm:$0xff] }
  0x44   :  { %1979 = vmatprep.subr.bf16.mxu1 %v1978_v14  ;;  %443 = vmatmul.mubr.f32.vlgmr.msra.gmra.mrb[2].mxu0 %v24_v20  ;;  %v1998_v14 = vpack.c.bf16 %v220_v7, %v219_v6  ;;  %v1968_v20 = vpack.c.bf16 %v172_v12, %v171_v11  ;;  %v731_v55 = vld [vmem:[%s3607_s3 + $0x18] sm:$0xff]  ;;  %v744_v57 = vld [vmem:[%s3607_s3 + $0x80] sm:$0xff]  ;;  %v741_v59 = vld [vmem:[%s3607_s3 + $0x68] sm:$0xff] }
  0x45   :  { %1949 = vmatpush3.bf16.msra.mxu0 %v1948_v21  ;;  %582 = vmatprep.mubr.f32.mxu0 %v29_v34  ;;  %v2000_v21 = vpack.c.bf16 %v204_v15, %v203_v13  ;;  %v728_v58 = vld [vmem:[%s3607_s3] sm:$0xff]  ;;  %v743_v63 = vld [vmem:[%s3607_s3 + $0x78] sm:$0xff]  ;;  %v757_v3 = vld [vmem:[%s3607_s3 + $0xe8] sm:$0xff] }
  0x46   :  { %513 = vmatmul.mubr.f32.vlgmr.msra.gmra.mrb[2].mxu1 %v26_v22  ;;  %1951 = vmatprep.subr.bf16.mxu0 %v1950_v24  ;;  %v1970_v22 = vpack.c.bf16 %v190_v17, %v189_v16  ;;  %v174_v24 = vld [vmem:[%s3605_s1 + $0x468] sm:$0xff]  ;;  %v755_v0 = vld [vmem:[%s3607_s3 + $0xd8] sm:$0xff]  ;;  %v770_v4 = vld [vmem:[%s3607_s3 + $0x150] sm:$0xff] }
  0x47   :  { %1981 = vmatpush3.bf16.msra.mxu1 %v1980_v23  ;;  %652 = vmatprep.mubr.f32.mxu1 %v31_v36  ;;  %v173_v23 = vld [vmem:[%s3605_s1 + $0x460] sm:$0xff]  ;;  %v176_v36 = vld [vmem:[%s3605_s1 + $0x478] sm:$0xff]  ;;  %v2052_v6 = vpack.c.bf16 %v770_v4, %v757_v3  ;;  %v754_v7 = vld [vmem:[%s3607_s3 + $0xd0] sm:$0xff] }
  0x48   :  { %1983 = vmatprep.subr.bf16.mxu1 %v1982_v28  ;;  %v191_v28 = vld [vmem:[%s3605_s1 + $0x4f0] sm:$0xff]  ;;  %v1972_v32 = vpack.c.bf16 %v174_v24, %v173_v23  ;;  %v769_v11 = vld [vmem:[%s3607_s3 + $0x148] sm:$0xff]  ;;  %v783_v16 = vld [vmem:[%s3607_s3 + $0x1b8] sm:$0xff] }
  0x49   :  { %1953 = vmatpush3.bf16.msra.mxu0 %v1952_v35  ;;  %v1974_v34 = vpack.c.bf16 %v192_v29, %v191_v28  ;;  %v175_v35 = vld [vmem:[%s3605_s1 + $0x470] sm:$0xff]  ;;  %v781_v12 = vld [vmem:[%s3607_s3 + $0x1a8] sm:$0xff]  ;;  %v796_v17 = vld [vmem:[%s3607_s3 + $0x220] sm:$0xff] }
  0x4a   :  { %1955 = vmatprep.subr.bf16.mxu0 %v1954_v38  ;;  %v207_v38 = vld [vmem:[%s3605_s1 + $0x570] sm:$0xff]  ;;  %v1976_v40 = vpack.c.bf16 %v176_v36, %v175_v35  ;;  %v780_v18 = vld [vmem:[%s3607_s3 + $0x1a0] sm:$0xff]  ;;  %v2056_v19 = vpack.c.bf16 %v796_v17, %v783_v16  ;;  %v807_v24 = vld [vmem:[%s3607_s3 + $0x278] sm:$0xff] }
  0x4b   :  { %1985 = vmatpush3.bf16.msra.mxu1 %v1984_v37  ;;  %v2006_v37 = vpack.c.bf16 %v224_v31, %v223_v30  ;;  %v2008_v41 = vpack.c.bf16 %v208_v39, %v207_v38  ;;  %v794_v13 = vld [vmem:[%s3607_s3 + $0x210] sm:$0xff]  ;;  %v820_v25 = vld [vmem:[%s3607_s3 + $0x2e0] sm:$0xff]  ;;  %v819_v31 = vld [vmem:[%s3607_s3 + $0x2d8] sm:$0xff] }
  0x4c   :  { %1987 = vmatprep.subr.bf16.mxu1 %v1986_v42  ;;  %v225_v42 = vld [vmem:[%s3605_s1 + $0x600] sm:$0xff]  ;;  %v2024_v15 = vpack.c.bf16 %v794_v13, %v781_v12  ;;  %v2028_v28 = vpack.c.bf16 %v820_v25, %v807_v24  ;;  %v822_v29 = vld [vmem:[%s3607_s3 + $0x2f0] sm:$0xff]  ;;  %v833_v35 = vld [vmem:[%s3607_s3 + $0x348] sm:$0xff] }
  0x4d   :  { %1957 = vmatpush3.bf16.msra.mxu0 %v1956_v48  ;;  %v2011_v45 = vpack.c.bf16 %v226_v43, %v225_v42  ;;  %v227_v48 = vld [vmem:[%s3605_s1 + $0x610] sm:$0xff]  ;;  %v848_v38 = vld [vmem:[%s3607_s3 + $0x3c0] sm:$0xff]  ;;  %v845_v43 = vld [vmem:[%s3607_s3 + $0x3a8] sm:$0xff] }
  0x4e   :  { %1959 = vmatprep.subr.bf16.mxu0 %v1958_v50  ;;  %v806_v30 = vld [vmem:[%s3607_s3 + $0x270] sm:$0xff]  ;;  %v832_v42 = vld [vmem:[%s3607_s3 + $0x340] sm:$0xff]  ;;  %v913_v13 = vld [vmem:[%s3607_s3 + $0x5c8] sm:$0xff] }
  0x4f   :  { %1989 = vmatpush3.bf16.msra.mxu1 %v1988_v49  ;;  %v228_v49 = vld [vmem:[%s3605_s1 + $0x618] sm:$0xff]  ;;  %v846_v36 = vld [vmem:[%s3607_s3 + $0x3b0] sm:$0xff]  ;;  %v2030_v39 = vpack.c.bf16 %v819_v31, %v806_v30  ;;  %v900_v3 = vld [vmem:[%s3607_s3 + $0x560] sm:$0xff] }
  0x50   :  { %1991 = vmatprep.subr.bf16.mxu1 %v1990_v54  ;;  %v2014_v50 = vpack.c.bf16 %v228_v49, %v227_v48  ;;  %v742_v54 = vld [vmem:[%s3607_s3 + $0x70] sm:$0xff]  ;;  %v859_v48 = vld [vmem:[%s3607_s3 + $0x418] sm:$0xff]  ;;  %v872_v49 = vld [vmem:[%s3607_s3 + $0x480] sm:$0xff] }
  0x51   :  { %1961 = vmatpush3.bf16.msra.mxu0 %v1960_v60  ;;  %v2016_v56 = vpack.c.bf16 %v742_v54, %v729_v53  ;;  %v2048_v60 = vpack.c.bf16 %v744_v57, %v731_v55  ;;  %v2034_v53 = vpack.c.bf16 %v845_v43, %v832_v42  ;;  %v2036_v55 = vpack.c.bf16 %v872_v49, %v859_v48  ;;  %v871_v57 = vld [vmem:[%s3607_s3 + $0x478] sm:$0xff]  ;;  %v884_v4 = vld [vmem:[%s3607_s3 + $0x4e0] sm:$0xff]  ;;  %v910_v16 = vld [vmem:[%s3607_s3 + $0x5b0] sm:$0xff] }
  0x52   :  { %1963 = vmatprep.subr.bf16.mxu0 %v1962_v62  ;;  %v730_v62 = vld [vmem:[%s3607_s3 + $0x10] sm:$0xff]  ;;  %v924_v12 = vld [vmem:[%s3607_s3 + $0x620] sm:$0xff]  ;;  %v923_v17 = vld [vmem:[%s3607_s3 + $0x618] sm:$0xff] }
  0x53   :  { %1993 = vmatpush3.bf16.msra.mxu1 %v1992_v61  ;;  %v2018_v61 = vpack.c.bf16 %v741_v59, %v728_v58  ;;  %v2050_v1 = vpack.c.bf16 %v743_v63, %v730_v62  ;;  %v860_v59 = vld [vmem:[%s3607_s3 + $0x420] sm:$0xff]  ;;  %v885_v63 = vld [vmem:[%s3607_s3 + $0x4e8] sm:$0xff]  ;;  %v746_v24 = vld [vmem:[%s3607_s3 + $0x90] sm:$0xff] }
  0x54   :  { %1995 = vmatprep.subr.bf16.mxu1 %v1994_v2  ;;  %v768_v2 = vld [vmem:[%s3607_s3 + $0x140] sm:$0xff]  ;;  %v735_v25 = vld [vmem:[%s3607_s3 + $0x38] sm:$0xff] }
  0x55   :  { %1965 = vmatpush3.bf16.msra.mxu0 %v1964_v8  ;;  %v2020_v5 = vpack.c.bf16 %v768_v2, %v755_v0  ;;  %v767_v8 = vld [vmem:[%s3607_s3 + $0x138] sm:$0xff]  ;;  %v898_v0 = vld [vmem:[%s3607_s3 + $0x550] sm:$0xff]  ;;  %v1536_v30 = vld [vmem:[%s3608_s2] ss:$0 sm:$0xff] }
  0x56   :  { %1967 = vmatprep.subr.bf16.mxu0 %v1966_v10  ;;  %v2022_v10 = vpack.c.bf16 %v767_v8, %v754_v7  ;;  %v2040_v2 = vpack.c.bf16 %v898_v0, %v885_v63  ;;  %v886_v8 = vld [vmem:[%s3607_s3 + $0x4f0] sm:$0xff] }
  0x57   :  { %1997 = vmatpush3.bf16.msra.mxu1 %v1996_v9  ;;  %v756_v9 = vld [vmem:[%s3607_s3 + $0xe0] sm:$0xff]  ;;  %v774_v63 = vld [vmem:[%s3607_s3 + $0x170] sm:$0xff] }
  0x58   :  { %1999 = vmatprep.subr.bf16.mxu1 %v1998_v14  ;;  %v2054_v14 = vpack.c.bf16 %v769_v11, %v756_v9  ;;  %v899_v9 = vld [vmem:[%s3607_s3 + $0x558] sm:$0xff] }
  0x59   :  { %1969 = vmatpush3.bf16.msra.mxu0 %v1968_v20  ;;  %v793_v20 = vld [vmem:[%s3607_s3 + $0x208] sm:$0xff]  ;;  %v911_v11 = vld [vmem:[%s3607_s3 + $0x5b8] sm:$0xff] }
  0x5a   :  { %1971 = vmatprep.subr.bf16.mxu0 %v1970_v22  ;;  %v795_v22 = vld [vmem:[%s3607_s3 + $0x218] sm:$0xff]  ;;  %v2026_v23 = vpack.c.bf16 %v793_v20, %v780_v18  ;;  %v912_v20 = vld [vmem:[%s3607_s3 + $0x5c0] sm:$0xff] }
  0x5b   :  { %2001 = vmatpush3.bf16.msra.mxu1 %v2000_v21  ;;  %v782_v21 = vld [vmem:[%s3607_s3 + $0x1b0] sm:$0xff] }
  0x5c   :  { %2003 = vmatprep.subr.bf16.mxu1 %v2002_v26  ;;  %v809_v26 = vld [vmem:[%s3607_s3 + $0x288] sm:$0xff]  ;;  %v2058_v27 = vpack.c.bf16 %v795_v22, %v782_v21 }
  0x5d   :  { %1973 = vmatpush3.bf16.msra.mxu0 %v1972_v32  ;;  %v2060_v32 = vpack.c.bf16 %v822_v29, %v809_v26  ;;  %v925_v21 = vld [vmem:[%s3607_s3 + $0x628] sm:$0xff] }
  0x5e   :  { %1975 = vmatprep.subr.bf16.mxu0 %v1974_v34  ;;  %v821_v34 = vld [vmem:[%s3607_s3 + $0x2e8] sm:$0xff]  ;;  %v2078_v22 = vpack.c.bf16 %v925_v21, %v912_v20  ;;  %v786_v21 = vld [vmem:[%s3607_s3 + $0x1d0] sm:$0xff] }
  0x5f   :  { %2005 = vmatpush3.bf16.msra.mxu1 %v2004_v33  ;;  %v808_v33 = vld [vmem:[%s3607_s3 + $0x280] sm:$0xff] }
  0x60   :  { %2007 = vmatprep.subr.bf16.mxu1 %v2006_v37  ;;  %v835_v37 = vld [vmem:[%s3607_s3 + $0x358] sm:$0xff] }
  0x61   :  { %1977 = vmatpush3.bf16.msra.mxu0 %v1976_v40  ;;  %v2062_v40 = vpack.c.bf16 %v821_v34, %v808_v33 }
  0x62   :  { %2010 = vmatprep.subr.bf16.mxu0 %v2235_v46 }
  0x63   :  { %2009 = vmatpush3.bf16.msra.mxu1 %v2008_v41  ;;  %v2032_v41 = vpack.c.bf16 %v846_v36, %v833_v35 }
  0x64   :  { %583 = vmatmul.mubr.f32.vlgmr.msra.gmra.mrb[4].mxu0 %v28_v44  ;;  %2017 = vmatprep.subr.bf16.mxu1 %v2016_v56  ;;  %v834_v44 = vld [vmem:[%s3607_s3 + $0x350] sm:$0xff] }
  0x65   :  { %2012 = vmatpush3.bf16.msra.mxu0 %v2011_v45  ;;  %1780 = vmatprep.mubr.msk.f32.mxu0 %vm2236_vm0, %v2237_v51  ;;  %v2064_v45 = vpack.c.bf16 %v848_v38, %v835_v37  ;;  %v858_v56 = vld [vmem:[%s3607_s3 + $0x410] sm:$0xff] }
  0x66   :  { %653 = vmatmul.mubr.f32.vlgmr.msra.gmra.mrb[4].mxu1 %v30_v47  ;;  %2013 = vmatprep.subr.bf16.mxu0 %v2235_v46  ;;  %v847_v47 = vld [vmem:[%s3607_s3 + $0x3b8] sm:$0xff] }
  0x67   :  { %1074 = vmatprep.mubr.f32.mxu1 %v2237_v51  ;;  %2019 = vmatpush1.bf16.msra.mxu1 %v2018_v61  ;;  %v2066_v54 = vpack.c.bf16 %v847_v47, %v834_v44  ;;  %v2038_v61 = vpack.c.bf16 %v871_v57, %v858_v56  ;;  %v745_v56 = vld [vmem:[%s3607_s3 + $0x88] sm:$0xff]  ;;  %v734_v57 = vld [vmem:[%s3607_s3 + $0x30] sm:$0xff] }
  0x68   :  { %2021 = vmatprep.subr.bf16.mxu1 %v2020_v5  ;;  %v897_v5 = vld [vmem:[%s3607_s3 + $0x548] sm:$0xff] }
  0x69   :  { %2015 = vmatpush3.bf16.msra.mxu0 %v2014_v50  ;;  %v861_v50 = vld [vmem:[%s3607_s3 + $0x428] sm:$0xff]  ;;  %v2042_v7 = vpack.c.bf16 %v897_v5, %v884_v4  ;;  %v771_v4 = vld [vmem:[%s3607_s3 + $0x158] sm:$0xff] }
  0x6a   :  { %2049 = vmatprep.subr.bf16.mxu0 %v2048_v60  ;;  %v873_v60 = vld [vmem:[%s3607_s3 + $0x488] sm:$0xff] }
  0x6b   :  { %2023 = vmatpush1.bf16.msra.mxu1 %v2022_v10  ;;  %v2070_v62 = vpack.c.bf16 %v873_v60, %v860_v59  ;;  %v2074_v10 = vpack.c.bf16 %v899_v9, %v886_v8  ;;  %v759_v59 = vld [vmem:[%s3607_s3 + $0xf8] sm:$0xff]  ;;  %v760_v9 = vld [vmem:[%s3607_s3 + $0x100] sm:$0xff] }
  0x6c   :  { %1781 = vmatmul.mubr.msk.f32.vlgmr.msra.gmra.mrb[6].mxu0 %vm234_vm1, %v32_v52  ;;  %2025 = vmatprep.subr.bf16.mxu1 %v2024_v15  ;;  %v874_v52 = vld [vmem:[%s3607_s3 + $0x490] sm:$0xff] }
  0x6d   :  { %1145 = vmatprep.mubr.f32.mxu0 %v2237_v51  ;;  %2051 = vmatpush1.bf16.msra.mxu0 %v2050_v1  ;;  %v2068_v58 = vpack.c.bf16 %v874_v52, %v861_v50  ;;  %v887_v1 = vld [vmem:[%s3607_s3 + $0x4f8] sm:$0xff]  ;;  %v926_v15 = vld [vmem:[%s3607_s3 + $0x630] sm:$0xff] }
  0x6e   :  { %2053 = vmatprep.subr.bf16.mxu0 %v2052_v6  ;;  %v2072_v6 = vpack.c.bf16 %v900_v3, %v887_v1  ;;  %v2076_v18 = vpack.c.bf16 %v926_v15, %v913_v13  ;;  %v758_v3 = vld [vmem:[%s3607_s3 + $0xf0] sm:$0xff]  ;;  %v787_v13 = vld [vmem:[%s3607_s3 + $0x1d8] sm:$0xff] }
  0x6f   :  { %2027 = vmatpush1.bf16.msra.mxu1 %v2026_v23  ;;  %v733_v23 = vld [vmem:[%s3607_s3 + $0x28] sm:$0xff]  ;;  %v2086_v15 = vpack.c.bf16 %v771_v4, %v758_v3  ;;  %v888_v3 = vld [vmem:[%s3607_s3 + $0x500] sm:$0xff] }
  0x70   :  { %2029 = vmatprep.subr.bf16.mxu1 %v2028_v28  ;;  %v2080_v26 = vpack.c.bf16 %v746_v24, %v733_v23  ;;  %v811_v23 = vld [vmem:[%s3607_s3 + $0x298] sm:$0xff]  ;;  %v824_v24 = vld [vmem:[%s3607_s3 + $0x300] sm:$0xff]  ;;  %v901_v4 = vld [vmem:[%s3607_s3 + $0x568] sm:$0xff] }
  0x71   :  { %2055 = vmatpush1.bf16.msra.mxu0 %v2054_v14  ;;  %v2044_v14 = vpack.c.bf16 %v924_v12, %v911_v11  ;;  %v785_v11 = vld [vmem:[%s3607_s3 + $0x1c8] sm:$0xff]  ;;  %v798_v12 = vld [vmem:[%s3607_s3 + $0x230] sm:$0xff] }
  0x72   :  { %2057 = vmatprep.subr.bf16.mxu0 %v2056_v19  ;;  %v2046_v19 = vpack.c.bf16 %v923_v17, %v910_v16  ;;  %v784_v17 = vld [vmem:[%s3607_s3 + $0x1c0] sm:$0xff] }
  0x73   :  { %2031 = vmatpush1.bf16.msra.mxu1 %v2030_v39 }
  0x74   :  { %2033 = vmatprep.subr.bf16.mxu1 %v2032_v41 }
  0x75   :  { %2059 = vmatpush1.bf16.msra.mxu0 %v2058_v27  ;;  %v748_v27 = vld [vmem:[%s3607_s3 + $0xa0] sm:$0xff] }
  0x76   :  { %2061 = vmatprep.subr.bf16.mxu0 %v2060_v32  ;;  %v2112_v28 = vpack.c.bf16 %v748_v27, %v735_v25  ;;  %v813_v25 = vld [vmem:[%s3607_s3 + $0x2a8] sm:$0xff] }
  0x77   :  { %2035 = vmatpush1.bf16.msra.mxu1 %v2034_v53 }
  0x78   :  { %2037 = vmatprep.subr.bf16.mxu1 %v2036_v55  ;;  %v732_v55 = vld [vmem:[%s3607_s3 + $0x20] sm:$0xff] }
  0x79   :  { %2063 = vmatpush1.bf16.msra.mxu0 %v2062_v40  ;;  %v2082_v1 = vpack.c.bf16 %v745_v56, %v732_v55  ;;  %v862_v55 = vld [vmem:[%s3607_s3 + $0x430] sm:$0xff]  ;;  %v875_v56 = vld [vmem:[%s3607_s3 + $0x498] sm:$0xff] }
  0x7a   :  { %2065 = vmatprep.subr.bf16.mxu0 %v2064_v45 }
  0x7b   :  { %2039 = vmatpush1.bf16.msra.mxu1 %v2038_v61  ;;  %v772_v61 = vld [vmem:[%s3607_s3 + $0x160] sm:$0xff] }
  0x7c   :  { %2041 = vmatprep.subr.bf16.mxu1 %v2040_v2 }
  0x7d   :  { %2067 = vmatpush1.bf16.msra.mxu0 %v2066_v54 }
  0x7e   :  { %2069 = vmatprep.subr.bf16.mxu0 %v2068_v58  ;;  %v747_v58 = vld [vmem:[%s3607_s3 + $0x98] sm:$0xff] }
  0x7f   :  { %2043 = vmatpush1.bf16.msra.mxu1 %v2042_v7  ;;  %v2114_v2 = vpack.c.bf16 %v747_v58, %v734_v57  ;;  %v2084_v7 = vpack.c.bf16 %v772_v61, %v759_v59  ;;  %v864_v59 = vld [vmem:[%s3607_s3 + $0x440] sm:$0xff]  ;;  %v889_v61 = vld [vmem:[%s3607_s3 + $0x508] sm:$0xff] }
  0x80   :  { %2045 = vmatprep.subr.bf16.mxu1 %v2044_v14  ;;  %v800_v14 = vld [vmem:[%s3607_s3 + $0x240] sm:$0xff] }
  0x81   :  { %2071 = vmatpush1.bf16.msra.mxu0 %v2070_v62  ;;  %v761_v62 = vld [vmem:[%s3607_s3 + $0x108] sm:$0xff]  ;;  %v2120_v20 = vpack.c.bf16 %v800_v14, %v787_v13  ;;  %v930_v13 = vld [vmem:[%s3607_s3 + $0x650] sm:$0xff]  ;;  %v2106_v14 = vpack.c.bf16 %v901_v4, %v888_v3  ;;  %v827_v3 = vld [vmem:[%s3607_s3 + $0x318] sm:$0xff] }
  0x82   :  { %2073 = vmatprep.subr.bf16.mxu0 %v2072_v6  ;;  %v2116_v8 = vpack.c.bf16 %v774_v63, %v761_v62  ;;  %v902_v62 = vld [vmem:[%s3607_s3 + $0x570] sm:$0xff]  ;;  %v891_v63 = vld [vmem:[%s3607_s3 + $0x518] sm:$0xff] }
  0x83   :  { %2047 = vmatpush1.bf16.msra.mxu1 %v2046_v19  ;;  %v2088_v19 = vpack.c.bf16 %v798_v12, %v785_v11  ;;  %v928_v11 = vld [vmem:[%s3607_s3 + $0x640] sm:$0xff]  ;;  %v917_v12 = vld [vmem:[%s3607_s3 + $0x5e8] sm:$0xff] }
  0x84   :  { %2081 = vmatprep.subr.bf16.mxu1 %v2080_v26  ;;  %v826_v26 = vld [vmem:[%s3607_s3 + $0x310] sm:$0xff] }
  0x85   :  { %2075 = vmatpush1.bf16.msra.mxu0 %v2074_v10  ;;  %v773_v10 = vld [vmem:[%s3607_s3 + $0x168] sm:$0xff] }
  0x86   :  { %2077 = vmatprep.subr.bf16.mxu0 %v2076_v18  ;;  %v2118_v16 = vpack.c.bf16 %v773_v10, %v760_v9  ;;  %v797_v18 = vld [vmem:[%s3607_s3 + $0x228] sm:$0xff]  ;;  %v903_v9 = vld [vmem:[%s3607_s3 + $0x578] sm:$0xff] }
  0x87   :  { %v2090_v27 = vpack.c.bf16 %v797_v18, %v784_v17  ;;  %v915_v10 = vld [vmem:[%s3607_s3 + $0x5d8] sm:$0xff] }
  0x88   :  { %v927_v17 = vld [vmem:[%s3607_s3 + $0x638] sm:$0xff]  ;;  %v2108_v18 = vpack.c.bf16 %v928_v11, %v915_v10  ;;  %v854_v10 = vld [vmem:[%s3607_s3 + $0x3f0] sm:$0xff] }
  0x89   :  { %2079 = vmatpush1.bf16.msra.mxu0 %v2078_v22  ;;  %v799_v22 = vld [vmem:[%s3607_s3 + $0x238] sm:$0xff] }
  0x8a   :  { %2113 = vmatprep.subr.bf16.mxu0 %v2112_v28  ;;  %v2122_v28 = vpack.c.bf16 %v799_v22, %v786_v21  ;;  %v929_v21 = vld [vmem:[%s3607_s3 + $0x648] sm:$0xff]  ;;  %v843_v11 = vld [vmem:[%s3607_s3 + $0x398] sm:$0xff] }
  0x8b   :  { %v737_v22 = vld [vmem:[%s3607_s3 + $0x48] sm:$0xff] }
  0xf7   :  { %v1572_v29 = vpop.f32.mrb[0].mxu0 }
  0xf8   :  { %v1573_v31 = vpop.f32.mrb[1].mxu0 }
  0xf9   :  { %v1607_v32 = vpop.f32.mrb[0].mxu1  ;;  %v1574_v33 = vadd.f32 %v1573_v31, %v1572_v29  ;;  %v810_v29 = vld [vmem:[%s3607_s3 + $0x290] sm:$0xff]  ;;  %v2092_v31 = vpack.c.bf16 %v824_v24, %v811_v23  ;;  %v739_v24 = vld [vmem:[%s3607_s3 + $0x58] sm:$0xff] }
  0xfa   :  { %v1608_v34 = vpop.f32.mrb[1].mxu1  ;;  %v750_v23 = vld [vmem:[%s3607_s3 + $0xb0] sm:$0xff] }
  0xfb   :  { %v1609_v35 = vadd.f32 %v1608_v34, %v1607_v32  ;;  %v305_v36 = vadd.f32 %v1574_v33, %v1536_v30  ;;  %v823_v30 = vld [vmem:[%s3607_s3 + $0x2f8] sm:$0xff]  ;;  %v2124_v32 = vpack.c.bf16 %v826_v26, %v813_v25  ;;  %v812_v33 = vld [vmem:[%s3607_s3 + $0x2a0] sm:$0xff]  ;;  %v825_v34 = vld [vmem:[%s3607_s3 + $0x308] sm:$0xff] }
  0xfc   :  { %v752_v25 = vld [vmem:[%s3607_s3 + $0xc0] sm:$0xff] }
  0xfd   :  { %v375_v37 = vadd.f32 %v1609_v35, %v305_v36  ;;  %v837_v35 = vld [vmem:[%s3607_s3 + $0x368] sm:$0xff]  ;;  %v850_v36 = vld [vmem:[%s3607_s3 + $0x3d0] sm:$0xff] }
 0x117   :  { %v1642_v38 = vpop.f32.mrb[2].mxu0 }
 0x118   :  { %v1643_v39 = vpop.f32.mrb[3].mxu0 }
 0x119   :  { %v1677_v40 = vpop.f32.mrb[2].mxu1  ;;  %v1644_v41 = vadd.f32 %v1643_v39, %v1642_v38  ;;  %v852_v38 = vld [vmem:[%s3607_s3 + $0x3e0] sm:$0xff]  ;;  %v2094_v39 = vpack.c.bf16 %v823_v30, %v810_v29  ;;  %v749_v29 = vld [vmem:[%s3607_s3 + $0xa8] sm:$0xff]  ;;  %v2144_v30 = vpack.c.bf16 %v750_v23, %v737_v22 }
 0x11a   :  { %v1678_v42 = vpop.f32.mrb[3].mxu1  ;;  %v880_v22 = vld [vmem:[%s3607_s3 + $0x4c0] sm:$0xff]  ;;  %v869_v23 = vld [vmem:[%s3607_s3 + $0x468] sm:$0xff] }
 0x11b   :  { %v1679_v43 = vadd.f32 %v1678_v42, %v1677_v40  ;;  %v445_v44 = vadd.f32 %v1644_v41, %v375_v37  ;;  %v839_v37 = vld [vmem:[%s3607_s3 + $0x378] sm:$0xff]  ;;  %v2126_v40 = vpack.c.bf16 %v825_v34, %v812_v33  ;;  %v836_v41 = vld [vmem:[%s3607_s3 + $0x360] sm:$0xff]  ;;  %v849_v42 = vld [vmem:[%s3607_s3 + $0x3c8] sm:$0xff] }
 0x11c   :  { %v751_v33 = vld [vmem:[%s3607_s3 + $0xb8] sm:$0xff] }
 0x11d   :  { %v515_v45 = vadd.f32 %v1679_v43, %v445_v44  ;;  %v2096_v43 = vpack.c.bf16 %v850_v36, %v837_v35  ;;  %v2128_v44 = vpack.c.bf16 %v852_v38, %v839_v37  ;;  %v763_v34 = vld [vmem:[%s3607_s3 + $0x118] sm:$0xff]  ;;  %v776_v35 = vld [vmem:[%s3607_s3 + $0x180] sm:$0xff]  ;;  %v765_v36 = vld [vmem:[%s3607_s3 + $0x128] sm:$0xff] }
 0x11e   :  { %v778_v37 = vld [vmem:[%s3607_s3 + $0x190] sm:$0xff] }
 0x137   :  { %v1712_v47 = vpop.f32.mrb[4].mxu0 }
 0x138   :  { %v1713_v48 = vpop.f32.mrb[5].mxu0 }
 0x139   :  { %v1747_v49 = vpop.f32.mrb[4].mxu1  ;;  %v1714_v50 = vadd.f32 %v1713_v48, %v1712_v47  ;;  %v851_v47 = vld [vmem:[%s3607_s3 + $0x3d8] sm:$0xff] }
 0x13a   :  { %v1748_v52 = vpop.f32.mrb[5].mxu1  ;;  %v863_v48 = vld [vmem:[%s3607_s3 + $0x438] sm:$0xff] }
 0x13b   :  { %v1749_v53 = vadd.f32 %v1748_v52, %v1747_v49  ;;  %v585_v54 = vadd.f32 %v1714_v50, %v515_v45  ;;  %v838_v45 = vld [vmem:[%s3607_s3 + $0x370] sm:$0xff]  ;;  %v876_v49 = vld [vmem:[%s3607_s3 + $0x4a0] sm:$0xff]  ;;  %v865_v50 = vld [vmem:[%s3607_s3 + $0x448] sm:$0xff] }
 0x13c   :  { %v878_v52 = vld [vmem:[%s3607_s3 + $0x4b0] sm:$0xff]  ;;  %v2100_v57 = vpack.c.bf16 %v876_v49, %v863_v48  ;;  %v791_v49 = vld [vmem:[%s3607_s3 + $0x1f8] sm:$0xff] }
 0x13d   :  { %v655_v60 = vadd.f32 %v1749_v53, %v585_v54  ;;  %v2098_v53 = vpack.c.bf16 %v849_v42, %v836_v41  ;;  %v2130_v54 = vpack.c.bf16 %v851_v47, %v838_v45  ;;  %v2132_v58 = vpack.c.bf16 %v878_v52, %v865_v50  ;;  %v775_v41 = vld [vmem:[%s3607_s3 + $0x178] sm:$0xff]  ;;  %v777_v45 = vld [vmem:[%s3607_s3 + $0x188] sm:$0xff]  ;;  %v802_v48 = vld [vmem:[%s3607_s3 + $0x250] sm:$0xff] }
 0x13e   :  { %v2148_v42 = vpack.c.bf16 %v776_v35, %v763_v34  ;;  %v789_v47 = vld [vmem:[%s3607_s3 + $0x1e8] sm:$0xff]  ;;  %v804_v50 = vld [vmem:[%s3607_s3 + $0x260] sm:$0xff]  ;;  %v906_v34 = vld [vmem:[%s3607_s3 + $0x590] sm:$0xff] }
 0x13f   :  { %v724_v0 = vpop.f32.mrb[6].mxu0  ;;  %v895_v35 = vld [vmem:[%s3607_s3 + $0x538] sm:$0xff] }
 0x140   :  { %v3138_v5 = vadd.f32 %v724_v0, %v655_v60  ;;  %v1782_v6 = vpop.f32.mrb[7].mxu0  ;;  %v877_v60 = vld [vmem:[%s3607_s3 + $0x4a8] sm:$0xff]  ;;  %v904_v0 = vld [vmem:[%s3607_s3 + $0x580] sm:$0xff] }
 0x141   :  { %v2104_v6 = vpack.c.bf16 %v902_v62, %v889_v61  ;;  %v828_v61 = vld [vmem:[%s3607_s3 + $0x320] sm:$0xff]  ;;  %v817_v62 = vld [vmem:[%s3607_s3 + $0x2c8] sm:$0xff] }
 0x142   :  { %1075 = vmatmul.mubr.f32.vlgmr.msra.gmra.mrb[6].mxu1 %v3138_v5  ;;  %1146 = vmatmul.mubr.f32.vlgmr.msra.gmra.mrb[8].mxu0 %v3138_v5 }
 0x143   :  { %2083 = vmatpush1.bf16.msra.mxu1 %v2082_v1  ;;  %2115 = vmatpush1.bf16.msra.mxu0 %v2114_v2  ;;  %v2102_v1 = vpack.c.bf16 %v875_v56, %v862_v55  ;;  %v2134_v2 = vpack.c.bf16 %v877_v60, %v864_v59  ;;  %v801_v55 = vld [vmem:[%s3607_s3 + $0x248] sm:$0xff]  ;;  %v2152_v56 = vpack.c.bf16 %v802_v48, %v789_v47  ;;  %v803_v59 = vld [vmem:[%s3607_s3 + $0x258] sm:$0xff]  ;;  %v932_v47 = vld [vmem:[%s3607_s3 + $0x660] sm:$0xff] }
 0x144   :  { %2085 = vmatprep.subr.bf16.mxu1 %v2084_v7  ;;  %2117 = vmatprep.subr.bf16.mxu0 %v2116_v8  ;;  %v2136_v7 = vpack.c.bf16 %v904_v0, %v891_v63  ;;  %v890_v8 = vld [vmem:[%s3607_s3 + $0x510] sm:$0xff]  ;;  %v815_v60 = vld [vmem:[%s3607_s3 + $0x2b8] sm:$0xff]  ;;  %v921_v48 = vld [vmem:[%s3607_s3 + $0x608] sm:$0xff] }
 0x145   :  { %1216 = vmatprep.mubr.f32.mxu1 %v2237_v51  ;;  %1287 = vmatprep.mubr.f32.mxu0 %v2237_v51  ;;  %v830_v63 = vld [vmem:[%s3607_s3 + $0x330] sm:$0xff]  ;;  %v2156_v4 = vpack.c.bf16 %v828_v61, %v815_v60  ;;  %v740_v61 = vld [vmem:[%s3607_s3 + $0x60] sm:$0xff] }
 0x147   :  { %2087 = vmatpush1.bf16.msra.mxu1 %v2086_v15  ;;  %2119 = vmatpush1.bf16.msra.mxu0 %v2118_v16  ;;  %v2138_v15 = vpack.c.bf16 %v903_v9, %v890_v8  ;;  %v914_v16 = vld [vmem:[%s3607_s3 + $0x5d0] sm:$0xff]  ;;  %v829_v8 = vld [vmem:[%s3607_s3 + $0x328] sm:$0xff] }
 0x148   :  { %2089 = vmatprep.subr.bf16.mxu1 %v2088_v19  ;;  %2121 = vmatprep.subr.bf16.mxu0 %v2120_v20  ;;  %v2140_v19 = vpack.c.bf16 %v930_v13, %v917_v12  ;;  %v916_v20 = vld [vmem:[%s3607_s3 + $0x5e0] sm:$0xff]  ;;  %v2110_v26 = vpack.c.bf16 %v927_v17, %v914_v16  ;;  %v841_v9 = vld [vmem:[%s3607_s3 + $0x388] sm:$0xff] }
 0x149   :  { %v856_v12 = vld [vmem:[%s3607_s3 + $0x400] sm:$0xff]  ;;  %v853_v16 = vld [vmem:[%s3607_s3 + $0x3e8] sm:$0xff]  ;;  %v2160_v17 = vpack.c.bf16 %v854_v10, %v841_v9 }
 0x14a   :  { %v844_v9 = vld [vmem:[%s3607_s3 + $0x3a0] sm:$0xff]  ;;  %v857_v10 = vld [vmem:[%s3607_s3 + $0x408] sm:$0xff] }
 0x14b   :  { %2091 = vmatpush1.bf16.msra.mxu1 %v2090_v27  ;;  %2123 = vmatpush1.bf16.msra.mxu0 %v2122_v28  ;;  %v2142_v27 = vpack.c.bf16 %v929_v21, %v916_v20  ;;  %v736_v28 = vld [vmem:[%s3607_s3 + $0x40] sm:$0xff]  ;;  %v855_v20 = vld [vmem:[%s3607_s3 + $0x3f8] sm:$0xff] }
 0x14c   :  { %2093 = vmatprep.subr.bf16.mxu1 %v2092_v31  ;;  %2125 = vmatprep.subr.bf16.mxu0 %v2124_v32  ;;  %v2176_v31 = vpack.c.bf16 %v752_v25, %v739_v24  ;;  %v738_v32 = vld [vmem:[%s3607_s3 + $0x50] sm:$0xff]  ;;  %v2146_v38 = vpack.c.bf16 %v749_v29, %v736_v28  ;;  %v867_v21 = vld [vmem:[%s3607_s3 + $0x458] sm:$0xff] }
 0x14d   :  { %v882_v24 = vld [vmem:[%s3607_s3 + $0x4d0] sm:$0xff]  ;;  %v879_v28 = vld [vmem:[%s3607_s3 + $0x4b8] sm:$0xff]  ;;  %v2164_v29 = vpack.c.bf16 %v880_v22, %v867_v21  ;;  %v945_v21 = vlaneseq }
 0x14f   :  { %2095 = vmatpush1.bf16.msra.mxu1 %v2094_v39  ;;  %2127 = vmatpush1.bf16.msra.mxu0 %v2126_v40  ;;  %v2178_v39 = vpack.c.bf16 %v751_v33, %v738_v32  ;;  %v762_v40 = vld [vmem:[%s3607_s3 + $0x110] sm:$0xff]  ;;  %v881_v32 = vld [vmem:[%s3607_s3 + $0x4c8] sm:$0xff]  ;;  %v946_v22 = vshrl.u32 %v945_v21, 7 }
 0x150   :  { %2097 = vmatprep.subr.bf16.mxu1 %v2096_v43  ;;  %2129 = vmatprep.subr.bf16.mxu0 %v2128_v44  ;;  %v2180_v43 = vpack.c.bf16 %v778_v37, %v765_v36  ;;  %v764_v44 = vld [vmem:[%s3607_s3 + $0x120] sm:$0xff]  ;;  %v2150_v52 = vpack.c.bf16 %v775_v41, %v762_v40  ;;  %v893_v33 = vld [vmem:[%s3607_s3 + $0x528] sm:$0xff] }
 0x151   :  { %v908_v36 = vld [vmem:[%s3607_s3 + $0x5a0] sm:$0xff]  ;;  %v905_v40 = vld [vmem:[%s3607_s3 + $0x588] sm:$0xff]  ;;  %v2168_v41 = vpack.c.bf16 %v906_v34, %v893_v33 }
 0x152   :  { %v936_v34 = vld [vmem:[%s3609_s4] ss:$8 sm:$0xf] }
 0x153   :  { %2099 = vmatpush1.bf16.msra.mxu1 %v2098_v53  ;;  %2131 = vmatpush1.bf16.msra.mxu0 %v2130_v54  ;;  %v2182_v53 = vpack.c.bf16 %v777_v45, %v764_v44  ;;  %v788_v54 = vld [vmem:[%s3607_s3 + $0x1e0] sm:$0xff]  ;;  %v907_v44 = vld [vmem:[%s3607_s3 + $0x598] sm:$0xff] }
 0x154   :  { %2101 = vmatprep.subr.bf16.mxu1 %v2100_v57  ;;  %2133 = vmatprep.subr.bf16.mxu0 %v2132_v58  ;;  %v2184_v57 = vpack.c.bf16 %v804_v50, %v791_v49  ;;  %v790_v58 = vld [vmem:[%s3607_s3 + $0x1f0] sm:$0xff]  ;;  %v2154_v0 = vpack.c.bf16 %v801_v55, %v788_v54  ;;  %v919_v45 = vld [vmem:[%s3607_s3 + $0x5f8] sm:$0xff] }
 0x155   :  { %v934_v49 = vld [vmem:[%s3607_s3 + $0x670] sm:$0xff]  ;;  %v2172_v54 = vpack.c.bf16 %v932_v47, %v919_v45 }
 0x156   :  { %v2204_v55 = vpack.c.bf16 %v934_v49, %v921_v48 }
 0x157   :  { %2103 = vmatpush1.bf16.msra.mxu1 %v2102_v1  ;;  %2135 = vmatpush1.bf16.msra.mxu0 %v2134_v2  ;;  %v2186_v1 = vpack.c.bf16 %v803_v59, %v790_v58  ;;  %v814_v2 = vld [vmem:[%s3607_s3 + $0x2b0] sm:$0xff]  ;;  %v933_v58 = vld [vmem:[%s3607_s3 + $0x668] sm:$0xff] }
 0x158   :  { %2105 = vmatprep.subr.bf16.mxu1 %v2104_v6  ;;  %2137 = vmatprep.subr.bf16.mxu0 %v2136_v7  ;;  %v2188_v6 = vpack.c.bf16 %v830_v63, %v817_v62  ;;  %v816_v7 = vld [vmem:[%s3607_s3 + $0x2c0] sm:$0xff]  ;;  %v2158_v13 = vpack.c.bf16 %v827_v3, %v814_v2  ;;  %v753_v62 = vld [vmem:[%s3607_s3 + $0xc8] sm:$0xff] }
 0x159   :  { %v2209_v63 = vpack.c.bf16 %v753_v62, %v740_v61  ;;  %v792_v3 = vld [vmem:[%s3607_s3 + $0x200] sm:$0xff] }
 0x15b   :  { %2107 = vmatpush1.bf16.msra.mxu1 %v2106_v14  ;;  %2139 = vmatpush1.bf16.msra.mxu0 %v2138_v15  ;;  %v2190_v14 = vpack.c.bf16 %v829_v8, %v816_v7  ;;  %v840_v15 = vld [vmem:[%s3607_s3 + $0x380] sm:$0xff]  ;;  %v818_v7 = vld [vmem:[%s3607_s3 + $0x2d0] sm:$0xff] }
 0x15c   :  { %2109 = vmatprep.subr.bf16.mxu1 %v2108_v18  ;;  %2141 = vmatprep.subr.bf16.mxu0 %v2140_v19  ;;  %v2192_v18 = vpack.c.bf16 %v856_v12, %v843_v11  ;;  %v842_v19 = vld [vmem:[%s3607_s3 + $0x390] sm:$0xff]  ;;  %v2162_v25 = vpack.c.bf16 %v853_v16, %v840_v15  ;;  %v2221_v11 = vpack.c.bf16 %v857_v10, %v844_v9  ;;  %v896_v15 = vld [vmem:[%s3607_s3 + $0x540] sm:$0xff]  ;;  %v909_v16 = vld [vmem:[%s3607_s3 + $0x5a8] sm:$0xff] }
 0x15d   :  { %v870_v12 = vld [vmem:[%s3607_s3 + $0x470] sm:$0xff] }
 0x15f   :  { %2111 = vmatpush1.bf16.msra.mxu1 %v2110_v26  ;;  %2143 = vmatpush1.bf16.msra.mxu0 %v2142_v27  ;;  %v2194_v26 = vpack.c.bf16 %v855_v20, %v842_v19  ;;  %v866_v27 = vld [vmem:[%s3607_s3 + $0x450] sm:$0xff]  ;;  %v935_v19 = vld [vmem:[%s3607_s3 + $0x678] sm:$0xff] }
 0x160   :  { %2145 = vmatprep.subr.bf16.mxu1 %v2144_v30  ;;  %2177 = vmatprep.subr.bf16.mxu0 %v2176_v31  ;;  %v2196_v30 = vpack.c.bf16 %v882_v24, %v869_v23  ;;  %v868_v31 = vld [vmem:[%s3607_s3 + $0x460] sm:$0xff]  ;;  %v2166_v37 = vpack.c.bf16 %v879_v28, %v866_v27  ;;  %v955_v28 = vsub.s32 2, %v946_v22 }
 0x161   :  { %v1538_v23 = vld [vmem:[%s3609_s4 + $0x40] ss:$8 sm:$0xf] }
 0x162   :  { %1217 = vmatmul.mubr.f32.vlgmr.msra.gmra.mrb[8].mxu1 %v3138_v5  ;;  %1288 = vmatmul.mubr.f32.vlgmr.msra.gmra.mrb[10].mxu0 %v3138_v5  ;;  %v1539_v24 = vld [vmem:[%s3609_s4 + $0x40] ss:$8 sm:$0x10] }
 0x163   :  { %2147 = vmatpush1.bf16.msra.mxu1 %v2146_v38  ;;  %2179 = vmatpush1.bf16.msra.mxu0 %v2178_v39  ;;  %v2198_v38 = vpack.c.bf16 %v881_v32, %v868_v31  ;;  %v892_v39 = vld [vmem:[%s3607_s3 + $0x520] sm:$0xff] }
 0x164   :  { %2149 = vmatprep.subr.bf16.mxu1 %v2148_v42  ;;  %2181 = vmatprep.subr.bf16.mxu0 %v2180_v43  ;;  %v2200_v42 = vpack.c.bf16 %v908_v36, %v895_v35  ;;  %v894_v43 = vld [vmem:[%s3607_s3 + $0x530] sm:$0xff]  ;;  %v2170_v50 = vpack.c.bf16 %v905_v40, %v892_v39 }
 0x165   :  { %1358 = vmatprep.mubr.f32.mxu1 %v2237_v51  ;;  %1429 = vmatprep.mubr.f32.mxu0 %v2237_v51  ;;  %v937_v35 = vld [vmem:[%s3609_s4] ss:$8 sm:$0xf0] }
 0x166   :  { %v938_v36 = vor.u32 %v937_v35, %v936_v34 }
 0x167   :  { %2151 = vmatpush1.bf16.msra.mxu1 %v2150_v52  ;;  %2183 = vmatpush1.bf16.msra.mxu0 %v2182_v53  ;;  %v2202_v52 = vpack.c.bf16 %v907_v44, %v894_v43  ;;  %v918_v53 = vld [vmem:[%s3607_s3 + $0x5f0] sm:$0xff] }
 0x168   :  { %2153 = vmatprep.subr.bf16.mxu1 %v2152_v56  ;;  %2185 = vmatprep.subr.bf16.mxu0 %v2184_v57  ;;  %v931_v56 = vld [vmem:[%s3607_s3 + $0x658] sm:$0xff]  ;;  %v920_v57 = vld [vmem:[%s3607_s3 + $0x600] sm:$0xff] }
 0x169   :  { %v2174_v59 = vpack.c.bf16 %v931_v56, %v918_v53  ;;  %v2206_v60 = vpack.c.bf16 %v933_v58, %v920_v57  ;;  %v967_v56 = vsub.s32 5, %v946_v22  ;;  %v975_v57 = vsub.s32 7, %v946_v22 }
 0x16b   :  { %2155 = vmatpush1.bf16.msra.mxu1 %v2154_v0  ;;  %2187 = vmatpush1.bf16.msra.mxu0 %v2186_v1  ;;  %v766_v0 = vld [vmem:[%s3607_s3 + $0x130] sm:$0xff]  ;;  %v779_v1 = vld [vmem:[%s3607_s3 + $0x198] sm:$0xff]  ;;  %v976_v61 = vrot.slane %v938_v36, %v975_v57 }
 0x16c   :  { %2157 = vmatprep.subr.bf16.mxu1 %v2156_v4  ;;  %2189 = vmatprep.subr.bf16.mxu0 %v2188_v6  ;;  %v2212_v2 = vpack.c.bf16 %v779_v1, %v766_v0  ;;  %v805_v4 = vld [vmem:[%s3607_s3 + $0x268] sm:$0xff] }
 0x16d   :  { %v2215_v6 = vpack.c.bf16 %v805_v4, %v792_v3 }
 0x16f   :  { %2159 = vmatpush1.bf16.msra.mxu1 %v2158_v13  ;;  %2191 = vmatpush1.bf16.msra.mxu0 %v2190_v14  ;;  %v883_v13 = vld [vmem:[%s3607_s3 + $0x4d8] sm:$0xff] }
 0x170   :  { %2161 = vmatprep.subr.bf16.mxu1 %v2160_v17  ;;  %2193 = vmatprep.subr.bf16.mxu0 %v2192_v18  ;;  %v2224_v14 = vpack.c.bf16 %v883_v13, %v870_v12  ;;  %v2227_v17 = vpack.c.bf16 %v909_v16, %v896_v15  ;;  %v922_v18 = vld [vmem:[%s3607_s3 + $0x610] sm:$0xff] }
 0x171   :  { %v2230_v20 = vpack.c.bf16 %v935_v19, %v922_v18 }
 0x173   :  { %2163 = vmatpush1.bf16.msra.mxu1 %v2162_v25  ;;  %2195 = vmatpush1.bf16.msra.mxu0 %v2194_v26  ;;  %v947_v25 = vsub.s32 0, %v946_v22  ;;  %v942_v26 = vor.u32 %v1539_v24, %v1538_v23 }
 0x174   :  { %2165 = vmatprep.subr.bf16.mxu1 %v2164_v29  ;;  %2197 = vmatprep.subr.bf16.mxu0 %v2196_v30  ;;  %v951_v29 = vsub.s32 1, %v946_v22  ;;  %v959_v30 = vsub.s32 3, %v946_v22 }
 0x175   :  { %v980_v27 = vrot.slane %v942_v26, %v947_v25 }
 0x176   :  { %v984_v31 = vrot.slane %v942_v26, %v951_v29  ;;  %v992_v32 = vrot.slane %v942_v26, %v959_v30  ;;  %v952_v39 = vrot.slane %v938_v36, %v951_v29  ;;  %v960_v40 = vrot.slane %v938_v36, %v959_v30 }
 0x177   :  { %2167 = vmatpush1.bf16.msra.mxu1 %v2166_v37  ;;  %2199 = vmatpush1.bf16.msra.mxu0 %v2198_v38  ;;  %v948_v37 = vrot.slane %v938_v36, %v947_v25  ;;  %v956_v38 = vrot.slane %v938_v36, %v955_v28 }
 0x178   :  { %2169 = vmatprep.subr.bf16.mxu1 %v2168_v41  ;;  %2201 = vmatprep.subr.bf16.mxu0 %v2200_v42 }
 0x17b   :  { %2171 = vmatpush1.bf16.msra.mxu1 %v2170_v50  ;;  %2203 = vmatpush1.bf16.msra.mxu0 %v2202_v52 }
 0x17c   :  { %2173 = vmatprep.subr.bf16.mxu1 %v2172_v54  ;;  %2205 = vmatprep.subr.bf16.mxu0 %v2204_v55  ;;  %v971_v55 = vsub.s32 6, %v946_v22 }
 0x17f   :  { %2175 = vmatpush1.bf16.msra.mxu1 %v2174_v59  ;;  %2207 = vmatpush1.bf16.msra.mxu0 %v2206_v60  ;;  %v972_v59 = vrot.slane %v938_v36, %v971_v55  ;;  %v968_v60 = vrot.slane %v938_v36, %v967_v56 }
 0x180   :  { %2208 = vmatprep.subr.bf16.mxu1 %v2235_v46 }
 0x182   :  { %1359 = vmatmul.mubr.f32.vlgmr.msra.gmra.mrb[10].mxu1 %v3138_v5  ;;  %1430 = vmatmul.mubr.f32.vlgmr.msra.gmra.mrb[12].mxu0 %v3138_v5 }
 0x183   :  { %2210 = vmatpush3.bf16.msra.mxu1 %v2209_v63  ;;  %1815 = vmatprep.mubr.msk.f32.mxu1 %vm2236_vm0, %v2237_v51  ;;  %v831_v51 = vld [vmem:[%s3607_s3 + $0x338] sm:$0xff] }
 0x184   :  { %2211 = vmatprep.subr.bf16.mxu1 %v2235_v46  ;;  %v2218_v8 = vpack.c.bf16 %v831_v51, %v818_v7 }
 0x187   :  { %2213 = vmatpush3.bf16.msra.mxu1 %v2212_v2 }
 0x188   :  { %2214 = vmatprep.subr.bf16.mxu1 %v2235_v46 }
 0x18b   :  { %2216 = vmatpush3.bf16.msra.mxu1 %v2215_v6 }
 0x18c   :  { %2217 = vmatprep.subr.bf16.mxu1 %v2235_v46 }
 0x18f   :  { %2219 = vmatpush3.bf16.msra.mxu1 %v2218_v8 }
 0x190   :  { %2220 = vmatprep.subr.bf16.mxu1 %v2235_v46 }
 0x193   :  { %2222 = vmatpush3.bf16.msra.mxu1 %v2221_v11 }
 0x194   :  { %2223 = vmatprep.subr.bf16.mxu1 %v2235_v46 }
 0x197   :  { %2225 = vmatpush3.bf16.msra.mxu1 %v2224_v14 }
 0x198   :  { %2226 = vmatprep.subr.bf16.mxu1 %v2235_v46 }
 0x19b   :  { %2228 = vmatpush3.bf16.msra.mxu1 %v2227_v17 }
 0x19c   :  { %2229 = vmatprep.subr.bf16.mxu1 %v2235_v46  ;;  %v988_v46 = vrot.slane %v942_v26, %v955_v28 }
 0x19f   :  { %2231 = vmatpush3.bf16.msra.mxu1 %v2230_v20 }
 0x1a2   :  { %1816 = vmatmul.mubr.f32.vlgmr.msra.gmra.mrb[12].mxu1 %v3138_v5  ;;  %v963_v5 = vsub.s32 4, %v946_v22 }
 0x1a4   :  { %v3557_v33 = vrot.slane %v942_v26, %v963_v5  ;;  %v964_v58 = vrot.slane %v938_v36, %v963_v5 }
 0x215   :  { %v1076_v41 = vpop.f32.mrb[6].mxu1  ;;  %v1147_v42 = vpop.f32.mrb[8].mxu0 }
 0x216   :  { %v1077_v43 = vadd.f32 %v1076_v41, %v948_v37  ;;  %v1148_v44 = vadd.f32 %v1147_v42, %v956_v38  ;;  %v1078_v45 = vpop.f32.mrb[7].mxu1  ;;  %v1149_v47 = vpop.f32.mrb[9].mxu0 }
 0x217   :  { %v1079_v48 = vadd.f32 %v1078_v45, %v952_v39  ;;  %v1150_v49 = vadd.f32 %v1149_v47, %v960_v40 }
 0x218   :  { %v1506_v50 = vmax.f32 %v1077_v43, 0.0  ;;  %v1508_v52 = vmax.f32 %v1148_v44, 0.0 }
 0x219   :  { %v1507_v53 = vmax.f32 %v1079_v48, 0.0  ;;  %v1509_v54 = vmax.f32 %v1150_v49, 0.0 }
 0x21a   :  { %1519 = vst [vmem:[%s3610_s5] sm:$0xff] %v1506_v50  ;;  %1521 = vst [vmem:[%s3610_s5 + $0x10] sm:$0xff] %v1508_v52 }
 0x21b   :  { %1520 = vst [vmem:[%s3610_s5 + $0x8] sm:$0xff] %v1507_v53  ;;  %1522 = vst [vmem:[%s3610_s5 + $0x18] sm:$0xff] %v1509_v54 }
 0x235   :  { %v1218_v62 = vpop.f32.mrb[8].mxu1  ;;  %v1289_v63 = vpop.f32.mrb[10].mxu0 }
 0x236   :  { %v1219_v0 = vadd.f32 %v1218_v62, %v964_v58  ;;  %v1290_v1 = vadd.f32 %v1289_v63, %v972_v59  ;;  %v1220_v2 = vpop.f32.mrb[9].mxu1  ;;  %v1291_v3 = vpop.f32.mrb[11].mxu0 }
 0x237   :  { %v1221_v4 = vadd.f32 %v1220_v2, %v968_v60  ;;  %v1292_v6 = vadd.f32 %v1291_v3, %v976_v61 }
 0x238   :  { %v1510_v7 = vmax.f32 %v1219_v0, 0.0  ;;  %v1512_v51 = vmax.f32 %v1290_v1, 0.0 }
 0x239   :  { %v1511_v8 = vmax.f32 %v1221_v4, 0.0  ;;  %v1513_v9 = vmax.f32 %v1292_v6, 0.0 }
 0x23a   :  { %1523 = vst [vmem:[%s3610_s5 + $0x20] sm:$0xff] %v1510_v7  ;;  %1525 = vst [vmem:[%s3610_s5 + $0x30] sm:$0xff] %v1512_v51 }
 0x23b   :  { %1524 = vst [vmem:[%s3610_s5 + $0x28] sm:$0xff] %v1511_v8  ;;  %1526 = vst [vmem:[%s3610_s5 + $0x38] sm:$0xff] %v1513_v9 }
 0x255   :  { %v1360_v10 = vpop.f32.mrb[10].mxu1  ;;  %v1431_v11 = vpop.f32.mrb[12].mxu0 }
 0x256   :  { %v1361_v12 = vadd.f32 %v1360_v10, %v980_v27  ;;  %v1432_v13 = vadd.f32 %v1431_v11, %v988_v46  ;;  %v1362_v14 = vpop.f32.mrb[11].mxu1  ;;  %v1433_v15 = vpop.f32.mrb[13].mxu0 }
 0x257   :  { %v1363_v16 = vadd.f32 %v1362_v14, %v984_v31  ;;  %v1434_v17 = vadd.f32 %v1433_v15, %v992_v32 }
 0x258   :  { %v1514_v18 = vmax.f32 %v1361_v12, 0.0  ;;  %v1516_v19 = vmax.f32 %v1432_v13, 0.0 }
 0x259   :  { %v1515_v20 = vmax.f32 %v1363_v16, 0.0  ;;  %v1517_v21 = vmax.f32 %v1434_v17, 0.0 }
 0x25a   :  { %1527 = vst [vmem:[%s3610_s5 + $0x40] sm:$0xff] %v1514_v18  ;;  %1529 = vst [vmem:[%s3610_s5 + $0x50] sm:$0xff] %v1516_v19 }
 0x25b   :  { %1528 = vst [vmem:[%s3610_s5 + $0x48] sm:$0xff] %v1515_v20  ;;  %1530 = vst [vmem:[%s3610_s5 + $0x58] sm:$0xff] %v1517_v21 }
 0x275   :  { %v1502_v22 = vpop.f32.mrb[12].mxu1 }
 0x276   :  { %v1503_v23 = vadd.f32 %v1502_v22, %v3557_v33  ;;  %v1817_v24 = vpop.f32.mrb[13].mxu1 }
 0x278   :  { %v1518_v25 = vmax.f32 %v1503_v23, 0.0 }
 0x27a   :  { %1531 = vst [vmem:[%s3610_s5 + $0x60] sm:$0xff] %v1518_v25 }

// kernel: _lambda_.8
= control target key start
LH: loop header
LB: loop body
LE: loop exit
PB: predicated region body
PF: predicated region fallthrough
CT: control target
= control target key end

     0   :  { %s1149_s12 = smov 0   ;;  %s1562_s0 = inlined_call_operand.vmem [shape: f32[400,288], index: 0, kind: input, shape index: {}]   ;;  %s1563_s1 = inlined_call_operand.vmem [shape: f32[288,128], index: 1, kind: input, shape index: {}]   ;;  %s1564_s2 = inlined_call_operand.vmem [shape: f32[8,128], index: 2, kind: input, shape index: {}]   ;;  %s1565_s3 = inlined_call_operand.vmem [shape: f32[400,128], index: 3, kind: output, shape index: {}]  }
   0x1 LB: > { %s855_s13 = sadd.s32 4294967295, %s1124_s12   ;;  %p859_p0 = scmp.ge.s32.totalorder %s1124_s12, 1  ;;  %s1124_s12 = sphi %s1149_s12, %s13_s12  }
   0x2   : > { %p139_p1 = scmp.lt.s32.totalorder %s1124_s12, 3 }
   0x4   : > { %p140_p2 = pnand %p859_p0, %p139_p1 }
   0x5   : > { %v252_v0 = vld [vmem:[%s1563_s1] sm:$0xff] (!%p140_p2)  ;;  %v253_v1 = vld [vmem:[%s1563_s1 + $0x8] sm:$0xff] (!%p140_p2)  ;;  %v254_v2 = vld [vmem:[%s1563_s1 + $0x10] sm:$0xff] (!%p140_p2)  ;;  %s164_s20 = smul.u32 (!%p140_p2), 25, %s855_s13  ;;  %v1126_v3 = vmov (!%p140_p2), 0.0|0.0   ;;  %vm1127_vm0 = vmmov (!%p140_p2), 0  }
   0x6   : > { %143 = sbr.rel (%p140_p2) target bundleno = 386 (0x182), region = 32  ;;  %1002 = vmatprep.subr.bf16.mxu1 (!%p140_p2), %v1126_v3  ;;  %v1003_v4 = vpack.c.bf16 (!%p140_p2), %v253_v1, %v252_v0  ;;  %v255_v5 = vld [vmem:[%s1563_s1 + $0x18] sm:$0xff] (!%p140_p2)  ;;  %1050 = vmatprep.subr.bf16.mxu0 (!%p140_p2), %v1126_v3  ;;  %v1128_v6 = vmov (!%p140_p2), 0.0   ;;  %v256_v8 = vld [vmem:[%s1563_s1 + $0x20] sm:$0xff] (!%p140_p2)  ;;  %v257_v9 = vld [vmem:[%s1563_s1 + $0x28] sm:$0xff] (!%p140_p2)  ;;  %vm293_vm1 = vcmask (!%p140_p2), 261120  }
   0x7   : > { %p165_p3 = scmp.lt.s32.totalorder (!%p140_p2), %s164_s20, 49  ;;  %927 = vmatprep.mubr.msk.f32.mxu0 (!%p140_p2), %vm1127_vm0, %v1128_v6  ;;  %v1006_v7 = vpack.c.bf16 (!%p140_p2), %v255_v5, %v254_v2  ;;  %v1009_v10 = vpack.c.bf16 (!%p140_p2), %v257_v9, %v256_v8  ;;  %v258_v11 = vld [vmem:[%s1563_s1 + $0x30] sm:$0xff] (!%p140_p2)  ;;  %v259_v12 = vld [vmem:[%s1563_s1 + $0x38] sm:$0xff] (!%p140_p2)  ;;  %v284_v13 = vld [vmem:[%s1563_s1 + $0x100] sm:$0xff] (!%p140_p2) }
   0x8   : > { %1004 = vmatpush1.bf16.msra.mxu1 (!%p140_p2), %v1003_v4  ;;  %v285_v14 = vld [vmem:[%s1563_s1 + $0x108] sm:$0xff] (!%p140_p2)  ;;  %v1012_v15 = vpack.c.bf16 (!%p140_p2), %v259_v12, %v258_v11  ;;  %v286_v17 = vld [vmem:[%s1563_s1 + $0x110] sm:$0xff] (!%p140_p2)  ;;  %v287_v18 = vld [vmem:[%s1563_s1 + $0x118] sm:$0xff] (!%p140_p2) }
   0x9   : > { %1005 = vmatprep.subr.bf16.mxu1 (!%p140_p2), %v1126_v3  ;;  %v1051_v16 = vpack.c.bf16 (!%p140_p2), %v285_v14, %v284_v13  ;;  %v260_v19 = vld [vmem:[%s1563_s1 + $0x40] sm:$0xff] (!%p140_p2)  ;;  %v261_v20 = vld [vmem:[%s1563_s1 + $0x48] sm:$0xff] (!%p140_p2)  ;;  %v1054_v22 = vpack.c.bf16 (!%p140_p2), %v287_v18, %v286_v17  ;;  %v262_v24 = vld [vmem:[%s1563_s1 + $0x50] sm:$0xff] (!%p140_p2) }
   0xa   : > { %v1015_v23 = vpack.c.bf16 (!%p140_p2), %v261_v20, %v260_v19  ;;  %v263_v25 = vld [vmem:[%s1563_s1 + $0x58] sm:$0xff] (!%p140_p2)  ;;  %v264_v28 = vld [vmem:[%s1563_s1 + $0x60] sm:$0xff] (!%p140_p2)  ;;  %v265_v29 = vld [vmem:[%s1563_s1 + $0x68] sm:$0xff] (!%p140_p2) }
   0xb   : > { %1052 = vmatpush3.bf16.msra.mxu0 (!%p140_p2), %v1051_v16  ;;  %v1018_v27 = vpack.c.bf16 (!%p140_p2), %v263_v25, %v262_v24  ;;  %v1021_v31 = vpack.c.bf16 (!%p140_p2), %v265_v29, %v264_v28  ;;  %v266_v32 = vld [vmem:[%s1563_s1 + $0x70] sm:$0xff] (!%p140_p2)  ;;  %v267_v33 = vld [vmem:[%s1563_s1 + $0x78] sm:$0xff] (!%p140_p2)  ;;  %v268_v36 = vld [vmem:[%s1563_s1 + $0x80] sm:$0xff] (!%p140_p2) }
   0xc   : > { %1007 = vmatpush1.bf16.msra.mxu1 (!%p140_p2), %v1006_v7  ;;  %1053 = vmatprep.subr.bf16.mxu0 (!%p140_p2), %v1126_v3  ;;  %v1024_v35 = vpack.c.bf16 (!%p140_p2), %v267_v33, %v266_v32  ;;  %v269_v37 = vld [vmem:[%s1563_s1 + $0x88] sm:$0xff] (!%p140_p2)  ;;  %v270_v40 = vld [vmem:[%s1563_s1 + $0x90] sm:$0xff] (!%p140_p2)  ;;  %v271_v41 = vld [vmem:[%s1563_s1 + $0x98] sm:$0xff] (!%p140_p2) }
   0xd   : > { %s1567_s20 = smov (!%p165_p3, %s164_s20), 49  ;;  %1008 = vmatprep.subr.bf16.mxu1 %v1126_v3  ;;  %v1027_v39 = vpack.c.bf16 %v269_v37, %v268_v36  ;;  %v1030_v43 = vpack.c.bf16 %v271_v41, %v270_v40  ;;  %v272_v44 = vld [vmem:[%s1563_s1 + $0xa0] sm:$0xff]  ;;  %v273_v45 = vld [vmem:[%s1563_s1 + $0xa8] sm:$0xff]  ;;  %v274_v48 = vld [vmem:[%s1563_s1 + $0xb0] sm:$0xff] }
   0xe   : > { %s1106_s27 = smul.u32 24, %s1567_s20  ;;  %v1033_v47 = vpack.c.bf16 %v273_v45, %v272_v44  ;;  %v275_v49 = vld [vmem:[%s1563_s1 + $0xb8] sm:$0xff]  ;;  %v276_v52 = vld [vmem:[%s1563_s1 + $0xc0] sm:$0xff]  ;;  %v277_v53 = vld [vmem:[%s1563_s1 + $0xc8] sm:$0xff]  ;;  %s861_s18 = sshll.u32 %s1567_s20, 3 }
   0xf   : > { %1055 = vmatpush3.bf16.msra.mxu0 %v1054_v22  ;;  %v1036_v51 = vpack.c.bf16 %v275_v49, %v274_v48  ;;  %v1039_v55 = vpack.c.bf16 %v277_v53, %v276_v52  ;;  %v278_v56 = vld [vmem:[%s1563_s1 + $0xd0] sm:$0xff]  ;;  %v279_v57 = vld [vmem:[%s1563_s1 + $0xd8] sm:$0xff]  ;;  %v280_v60 = vld [vmem:[%s1563_s1 + $0xe0] sm:$0xff]  ;;  %s1465_s22 = scalar_lea.vmem %s1565_s3, %s861_s18 }
  0x10   : > { %s1193_s7 = scalar_lea.vmem %s1562_s0, %s1106_s27  ;;  %1010 = vmatpush1.bf16.msra.mxu1 %v1009_v10  ;;  %v1042_v59 = vpack.c.bf16 %v279_v57, %v278_v56  ;;  %v281_v61 = vld [vmem:[%s1563_s1 + $0xe8] sm:$0xff]  ;;  %v282_v0 = vld [vmem:[%s1563_s1 + $0xf0] sm:$0xff]  ;;  %v283_v1 = vld [vmem:[%s1563_s1 + $0xf8] sm:$0xff] }
  0x11   : > { %1011 = vmatprep.subr.bf16.mxu1 %v1126_v3  ;;  %v178_v21 = vld [vmem:[%s1193_s7 + $0x8] sm:$0xff]  ;;  %v179_v26 = vld [vmem:[%s1193_s7 + $0x10] sm:$0xff]  ;;  %v185_v34 = vld [vmem:[%s1193_s7 + $0x40] sm:$0xff]  ;;  %v1045_v63 = vpack.c.bf16 %v281_v61, %v280_v60  ;;  %v1048_v4 = vpack.c.bf16 %v283_v1, %v282_v0 }
  0x12   : > { %433 = vmatprep.mubr.f32.mxu1 %v178_v21  ;;  %928 = vmatmul.mubr.msk.f32.vlgmr.msra.gmra.mrb[0].mxu0 %vm293_vm1, %v179_v26  ;;  %v182_v30 = vld [vmem:[%s1193_s7 + $0x28] sm:$0xff]  ;;  %v188_v38 = vld [vmem:[%s1193_s7 + $0x58] sm:$0xff]  ;;  %v191_v42 = vld [vmem:[%s1193_s7 + $0x70] sm:$0xff] }
  0x13   : > { %930 = vmatprep.mubr.msk.f32.mxu0 %vm1127_vm0, %v1128_v6  ;;  %v194_v46 = vld [vmem:[%s1193_s7 + $0x88] sm:$0xff]  ;;  %v197_v50 = vld [vmem:[%s1193_s7 + $0xa0] sm:$0xff]  ;;  %v200_v54 = vld [vmem:[%s1193_s7 + $0xb8] sm:$0xff] }
  0x14   : > { %1013 = vmatpush1.bf16.msra.mxu1 %v1012_v15  ;;  %v203_v58 = vld [vmem:[%s1193_s7 + $0xd0] sm:$0xff]  ;;  %v206_v62 = vld [vmem:[%s1193_s7 + $0xe8] sm:$0xff]  ;;  %v209_v2 = vld [vmem:[%s1193_s7 + $0x100] sm:$0xff] }
  0x15   : > { %1014 = vmatprep.subr.bf16.mxu1 %v1126_v3  ;;  %v212_v5 = vld [vmem:[%s1193_s7 + $0x118] sm:$0xff]  ;;  %v177_v7 = vld [vmem:[%s1193_s7] sm:$0xff]  ;;  %v215_v9 = vld [vmem:[%s1193_s7 + $0x130] sm:$0xff] }
  0x16   : > { %931 = vmatmul.mubr.msk.f32.gmra.mrb[2].mxu0 %vm293_vm1, %v182_v30  ;;  %v181_v8 = vld [vmem:[%s1193_s7 + $0x20] sm:$0xff]  ;;  %v184_v10 = vld [vmem:[%s1193_s7 + $0x38] sm:$0xff]  ;;  %v218_v11 = vld [vmem:[%s1193_s7 + $0x148] sm:$0xff] }
  0x17   : > { %933 = vmatprep.mubr.msk.f32.mxu0 %vm1127_vm0, %v1128_v6  ;;  %v183_v12 = vld [vmem:[%s1193_s7 + $0x30] sm:$0xff]  ;;  %v221_v14 = vld [vmem:[%s1193_s7 + $0x160] sm:$0xff]  ;;  %v186_v15 = vld [vmem:[%s1193_s7 + $0x48] sm:$0xff] }
  0x18   : > { %1016 = vmatpush1.bf16.msra.mxu1 %v1015_v23  ;;  %v187_v13 = vld [vmem:[%s1193_s7 + $0x50] sm:$0xff]  ;;  %v190_v16 = vld [vmem:[%s1193_s7 + $0x68] sm:$0xff]  ;;  %v224_v17 = vld [vmem:[%s1193_s7 + $0x178] sm:$0xff] }
  0x19   : > { %1017 = vmatprep.subr.bf16.mxu1 %v1126_v3  ;;  %v189_v18 = vld [vmem:[%s1193_s7 + $0x60] sm:$0xff]  ;;  %v227_v20 = vld [vmem:[%s1193_s7 + $0x190] sm:$0xff]  ;;  %v192_v21 = vld [vmem:[%s1193_s7 + $0x78] sm:$0xff] }
  0x1a   : > { %934 = vmatmul.mubr.msk.f32.gmra.mrb[4].mxu0 %vm293_vm1, %v185_v34  ;;  %v193_v19 = vld [vmem:[%s1193_s7 + $0x80] sm:$0xff]  ;;  %v196_v22 = vld [vmem:[%s1193_s7 + $0x98] sm:$0xff]  ;;  %v230_v23 = vld [vmem:[%s1193_s7 + $0x1a8] sm:$0xff] }
  0x1b   : > { %936 = vmatprep.mubr.msk.f32.mxu0 %vm1127_vm0, %v1128_v6  ;;  %v195_v24 = vld [vmem:[%s1193_s7 + $0x90] sm:$0xff]  ;;  %v233_v26 = vld [vmem:[%s1193_s7 + $0x1c0] sm:$0xff]  ;;  %v202_v28 = vld [vmem:[%s1193_s7 + $0xc8] sm:$0xff] }
  0x1c   : > { %1019 = vmatpush1.bf16.msra.mxu1 %v1018_v27  ;;  %v199_v25 = vld [vmem:[%s1193_s7 + $0xb0] sm:$0xff]  ;;  %v198_v27 = vld [vmem:[%s1193_s7 + $0xa8] sm:$0xff]  ;;  %v236_v29 = vld [vmem:[%s1193_s7 + $0x1d8] sm:$0xff] }
  0x1d   : > { %1020 = vmatprep.subr.bf16.mxu1 %v1126_v3  ;;  %v201_v30 = vld [vmem:[%s1193_s7 + $0xc0] sm:$0xff]  ;;  %v239_v32 = vld [vmem:[%s1193_s7 + $0x1f0] sm:$0xff]  ;;  %v204_v33 = vld [vmem:[%s1193_s7 + $0xd8] sm:$0xff] }
  0x1e   : > { %937 = vmatmul.mubr.msk.f32.gmra.mrb[6].mxu0 %vm293_vm1, %v188_v38  ;;  %v208_v34 = vld [vmem:[%s1193_s7 + $0xf8] sm:$0xff]  ;;  %v207_v36 = vld [vmem:[%s1193_s7 + $0xf0] sm:$0xff]  ;;  %v245_v38 = vld [vmem:[%s1193_s7 + $0x220] sm:$0xff] }
  0x1f   : > { %939 = vmatprep.mubr.msk.f32.mxu0 %vm1127_vm0, %v1128_v6  ;;  %v211_v37 = vld [vmem:[%s1193_s7 + $0x110] sm:$0xff]  ;;  %v214_v40 = vld [vmem:[%s1193_s7 + $0x128] sm:$0xff]  ;;  %v248_v41 = vld [vmem:[%s1193_s7 + $0x238] sm:$0xff] }
  0x20   : > { %1022 = vmatpush1.bf16.msra.mxu1 %v1021_v31  ;;  %v205_v31 = vld [vmem:[%s1193_s7 + $0xe0] sm:$0xff]  ;;  %v251_v44 = vld [vmem:[%s1193_s7 + $0x250] sm:$0xff]  ;;  %v216_v45 = vld [vmem:[%s1193_s7 + $0x138] sm:$0xff] }
  0x21   : > { %1023 = vmatprep.subr.bf16.mxu1 %v1126_v3  ;;  %v223_v48 = vld [vmem:[%s1193_s7 + $0x170] sm:$0xff]  ;;  %v226_v49 = vld [vmem:[%s1193_s7 + $0x188] sm:$0xff]  ;;  %v228_v52 = vld [vmem:[%s1193_s7 + $0x198] sm:$0xff] }
  0x22   : > { %940 = vmatmul.mubr.msk.f32.gmra.mrb[8].mxu0 %vm293_vm1, %v191_v42  ;;  %v213_v42 = vld [vmem:[%s1193_s7 + $0x120] sm:$0xff]  ;;  %v232_v53 = vld [vmem:[%s1193_s7 + $0x1b8] sm:$0xff]  ;;  %v234_v56 = vld [vmem:[%s1193_s7 + $0x1c8] sm:$0xff] }
  0x23   : > { %942 = vmatprep.mubr.msk.f32.mxu0 %vm1127_vm0, %v1128_v6  ;;  %v238_v57 = vld [vmem:[%s1193_s7 + $0x1e8] sm:$0xff]  ;;  %v240_v60 = vld [vmem:[%s1193_s7 + $0x1f8] sm:$0xff] }
  0x24   : > { %1025 = vmatpush1.bf16.msra.mxu1 %v1024_v35  ;;  %v242_v35 = vld [vmem:[%s1193_s7 + $0x208] sm:$0xff]  ;;  %v244_v61 = vld [vmem:[%s1193_s7 + $0x218] sm:$0xff] }
  0x25   : > { %1026 = vmatprep.subr.bf16.mxu1 %v1126_v3  ;;  %v246_v0 = vld [vmem:[%s1193_s7 + $0x228] sm:$0xff] }
  0x26   : > { %943 = vmatmul.mubr.msk.f32.gmra.mrb[10].mxu0 %vm293_vm1, %v194_v46  ;;  %v220_v46 = vld [vmem:[%s1193_s7 + $0x158] sm:$0xff]  ;;  %v250_v1 = vld [vmem:[%s1193_s7 + $0x248] sm:$0xff] }
  0x27   : > { %945 = vmatprep.mubr.msk.f32.mxu0 %vm1127_vm0, %v1128_v6 }
  0x28   : > { %1028 = vmatpush1.bf16.msra.mxu1 %v1027_v39  ;;  %v210_v39 = vld [vmem:[%s1193_s7 + $0x108] sm:$0xff] }
  0x29   : > { %1029 = vmatprep.subr.bf16.mxu1 %v1126_v3 }
  0x2a   : > { %946 = vmatmul.mubr.msk.f32.gmra.mrb[12].mxu0 %vm293_vm1, %v197_v50  ;;  %v225_v50 = vld [vmem:[%s1193_s7 + $0x180] sm:$0xff] }
  0x2b   : > { %948 = vmatprep.mubr.msk.f32.mxu0 %vm1127_vm0, %v1128_v6 }
  0x2c   : > { %1031 = vmatpush1.bf16.msra.mxu1 %v1030_v43  ;;  %v217_v43 = vld [vmem:[%s1193_s7 + $0x140] sm:$0xff] }
  0x2d   : > { %1032 = vmatprep.subr.bf16.mxu1 %v1126_v3 }
  0x2e   : > { %949 = vmatmul.mubr.msk.f32.gmra.mrb[14].mxu0 %vm293_vm1, %v200_v54  ;;  %v231_v54 = vld [vmem:[%s1193_s7 + $0x1b0] sm:$0xff] }
  0x2f   : > { %951 = vmatprep.mubr.msk.f32.mxu0 %vm1127_vm0, %v1128_v6 }
  0x30   : > { %1034 = vmatpush1.bf16.msra.mxu1 %v1033_v47  ;;  %v219_v47 = vld [vmem:[%s1193_s7 + $0x150] sm:$0xff] }
  0x31   : > { %1035 = vmatprep.subr.bf16.mxu1 %v1126_v3 }
  0x32   : > { %952 = vmatmul.mubr.msk.f32.gmra.mrb[16].mxu0 %vm293_vm1, %v203_v58  ;;  %v237_v58 = vld [vmem:[%s1193_s7 + $0x1e0] sm:$0xff] }
  0x33   : > { %954 = vmatprep.mubr.msk.f32.mxu0 %vm1127_vm0, %v1128_v6 }
  0x34   : > { %1037 = vmatpush1.bf16.msra.mxu1 %v1036_v51  ;;  %v229_v51 = vld [vmem:[%s1193_s7 + $0x1a0] sm:$0xff] }
  0x35   : > { %1038 = vmatprep.subr.bf16.mxu1 %v1126_v3 }
  0x36   : > { %955 = vmatmul.mubr.msk.f32.gmra.mrb[18].mxu0 %vm293_vm1, %v206_v62  ;;  %v243_v62 = vld [vmem:[%s1193_s7 + $0x210] sm:$0xff] }
  0x37   : > { %957 = vmatprep.mubr.msk.f32.mxu0 %vm1127_vm0, %v1128_v6 }
  0x38   : > { %1040 = vmatpush1.bf16.msra.mxu1 %v1039_v55  ;;  %v235_v55 = vld [vmem:[%s1193_s7 + $0x1d0] sm:$0xff] }
  0x39   : > { %1041 = vmatprep.subr.bf16.mxu1 %v1126_v3 }
  0x3a   : > { %958 = vmatmul.mubr.msk.f32.gmra.mrb[20].mxu0 %vm293_vm1, %v209_v2  ;;  %v249_v2 = vld [vmem:[%s1193_s7 + $0x240] sm:$0xff] }
  0x3b   : > { %960 = vmatprep.mubr.msk.f32.mxu0 %vm1127_vm0, %v1128_v6 }
  0x3c   : > { %1043 = vmatpush1.bf16.msra.mxu1 %v1042_v59  ;;  %v241_v59 = vld [vmem:[%s1193_s7 + $0x200] sm:$0xff] }
  0x3d   : > { %1044 = vmatprep.subr.bf16.mxu1 %v1126_v3 }
  0x3e   : > { %961 = vmatmul.mubr.msk.f32.gmra.mrb[22].mxu0 %vm293_vm1, %v212_v5 }
  0x3f   : > { %963 = vmatprep.mubr.msk.f32.mxu0 %vm1127_vm0, %v1128_v6 }
  0x40   : > { %1046 = vmatpush1.bf16.msra.mxu1 %v1045_v63  ;;  %v247_v63 = vld [vmem:[%s1193_s7 + $0x230] sm:$0xff] }
  0x41   : > { %1047 = vmatprep.subr.bf16.mxu1 %v1126_v3  ;;  %v180_v3 = vld [vmem:[%s1193_s7 + $0x18] sm:$0xff] }
  0x42   : > { %964 = vmatmul.mubr.msk.f32.gmra.mrb[24].mxu0 %vm293_vm1, %v215_v9 }
  0x43   : > { %966 = vmatprep.mubr.msk.f32.mxu0 %vm1127_vm0, %v1128_v6 }
  0x44   : > { %1049 = vmatpush1.bf16.msra.mxu1 %v1048_v4 }
  0x46   : > { %967 = vmatmul.mubr.msk.f32.gmra.mrb[26].mxu0 %vm293_vm1, %v218_v11 }
  0x47   : > { %434 = vmatmul.mubr.f32.vlgmr.msra.gmra.mrb[0].mxu1 %v177_v7  ;;  %969 = vmatprep.mubr.msk.f32.mxu0 %vm1127_vm0, %v1128_v6 }
  0x48   : > { %438 = vmatprep.mubr.f32.mxu1 %v181_v8 }
  0x4a   : > { %970 = vmatmul.mubr.msk.f32.gmra.mrb[28].mxu0 %vm293_vm1, %v221_v14 }
  0x4b   : > { %439 = vmatmul.mubr.f32.gmra.mrb[2].mxu1 %v180_v3  ;;  %972 = vmatprep.mubr.msk.f32.mxu0 %vm1127_vm0, %v1128_v6 }
  0x4c   : > { %443 = vmatprep.mubr.f32.mxu1 %v184_v10 }
  0x4e   : > { %973 = vmatmul.mubr.msk.f32.gmra.mrb[30].mxu0 %vm293_vm1, %v224_v17 }
  0x4f   : > { %444 = vmatmul.mubr.f32.gmra.mrb[4].mxu1 %v183_v12  ;;  %975 = vmatprep.mubr.msk.f32.mxu0 %vm1127_vm0, %v1128_v6 }
  0x50   : > { %448 = vmatprep.mubr.f32.mxu1 %v187_v13 }
  0x52   : > { %976 = vmatmul.mubr.msk.f32.gmra.mrb[32].mxu0 %vm293_vm1, %v227_v20 }
  0x53   : > { %449 = vmatmul.mubr.f32.gmra.mrb[6].mxu1 %v186_v15  ;;  %978 = vmatprep.mubr.msk.f32.mxu0 %vm1127_vm0, %v1128_v6 }
  0x54   : > { %453 = vmatprep.mubr.f32.mxu1 %v190_v16 }
  0x56   : > { %979 = vmatmul.mubr.msk.f32.gmra.mrb[34].mxu0 %vm293_vm1, %v230_v23 }
  0x57   : > { %454 = vmatmul.mubr.f32.gmra.mrb[8].mxu1 %v189_v18  ;;  %981 = vmatprep.mubr.msk.f32.mxu0 %vm1127_vm0, %v1128_v6 }
  0x58   : > { %458 = vmatprep.mubr.f32.mxu1 %v193_v19 }
  0x5a   : > { %982 = vmatmul.mubr.msk.f32.gmra.mrb[36].mxu0 %vm293_vm1, %v233_v26  ;;  %v1454_v26 = vld [vmem:[%s1564_s2] ss:$0 sm:$0xff] }
  0x5b   : > { %459 = vmatmul.mubr.f32.gmra.mrb[10].mxu1 %v192_v21  ;;  %984 = vmatprep.mubr.msk.f32.mxu0 %vm1127_vm0, %v1128_v6 }
  0x5c   : > { %463 = vmatprep.mubr.f32.mxu1 %v196_v22 }
  0x5e   : > { %985 = vmatmul.mubr.msk.f32.gmra.mrb[38].mxu0 %vm293_vm1, %v236_v29 }
  0x5f   : > { %464 = vmatmul.mubr.f32.gmra.mrb[12].mxu1 %v195_v24  ;;  %987 = vmatprep.mubr.msk.f32.mxu0 %vm1127_vm0, %v1128_v6 }
  0x60   : > { %468 = vmatprep.mubr.f32.mxu1 %v199_v25 }
  0x62   : > { %988 = vmatmul.mubr.msk.f32.gmra.mrb[40].mxu0 %vm293_vm1, %v239_v32 }
  0x63   : > { %469 = vmatmul.mubr.f32.gmra.mrb[14].mxu1 %v198_v27  ;;  %990 = vmatprep.mubr.msk.f32.mxu0 %vm1127_vm0, %v1128_v6 }
  0x64   : > { %473 = vmatprep.mubr.f32.mxu1 %v202_v28 }
  0x66   : > { %991 = vmatmul.mubr.msk.f32.gmra.mrb[42].mxu0 %vm293_vm1, %v242_v35 }
  0x67   : > { %474 = vmatmul.mubr.f32.gmra.mrb[16].mxu1 %v201_v30  ;;  %993 = vmatprep.mubr.msk.f32.mxu0 %vm1127_vm0, %v1128_v6 }
  0x68   : > { %478 = vmatprep.mubr.f32.mxu1 %v205_v31 }
  0x6a   : > { %994 = vmatmul.mubr.msk.f32.gmra.mrb[44].mxu0 %vm293_vm1, %v245_v38 }
  0x6b   : > { %479 = vmatmul.mubr.f32.gmra.mrb[18].mxu1 %v204_v33  ;;  %996 = vmatprep.mubr.msk.f32.mxu0 %vm1127_vm0, %v1128_v6 }
  0x6c   : > { %483 = vmatprep.mubr.f32.mxu1 %v208_v34 }
  0x6e   : > { %997 = vmatmul.mubr.msk.f32.gmra.mrb[46].mxu0 %vm293_vm1, %v248_v41 }
  0x6f   : > { %484 = vmatmul.mubr.f32.gmra.mrb[20].mxu1 %v207_v36  ;;  %999 = vmatprep.mubr.msk.f32.mxu0 %vm1127_vm0, %v1128_v6  ;;  %v222_v6 = vld [vmem:[%s1193_s7 + $0x168] sm:$0xff] }
  0x70   : > { %488 = vmatprep.mubr.f32.mxu1 %v211_v37 }
  0x72   : > { %1000 = vmatmul.mubr.msk.f32.gmra.mrb[48].mxu0 %vm293_vm1, %v251_v44 }
  0x73   : > { %489 = vmatmul.mubr.f32.gmra.mrb[22].mxu1 %v210_v39 }
  0x74   : > { %493 = vmatprep.mubr.f32.mxu1 %v214_v40 }
  0x77   : > { %494 = vmatmul.mubr.f32.gmra.mrb[24].mxu1 %v213_v42 }
  0x78   : > { %498 = vmatprep.mubr.f32.mxu1 %v217_v43 }
  0x7b   : > { %499 = vmatmul.mubr.f32.gmra.mrb[26].mxu1 %v216_v45 }
  0x7c   : > { %503 = vmatprep.mubr.f32.mxu1 %v220_v46 }
  0x7f   : > { %504 = vmatmul.mubr.f32.gmra.mrb[28].mxu1 %v219_v47 }
  0x80   : > { %508 = vmatprep.mubr.f32.mxu1 %v223_v48 }
  0x83   : > { %509 = vmatmul.mubr.f32.gmra.mrb[30].mxu1 %v222_v6 }
  0x84   : > { %513 = vmatprep.mubr.f32.mxu1 %v226_v49 }
  0x87   : > { %514 = vmatmul.mubr.f32.gmra.mrb[32].mxu1 %v225_v50 }
  0x88   : > { %518 = vmatprep.mubr.f32.mxu1 %v229_v51 }
  0x8b   : > { %519 = vmatmul.mubr.f32.gmra.mrb[34].mxu1 %v228_v52 }
  0x8c   : > { %523 = vmatprep.mubr.f32.mxu1 %v232_v53 }
  0x8f   : > { %524 = vmatmul.mubr.f32.gmra.mrb[36].mxu1 %v231_v54 }
  0x90   : > { %528 = vmatprep.mubr.f32.mxu1 %v235_v55 }
  0x93   : > { %529 = vmatmul.mubr.f32.gmra.mrb[38].mxu1 %v234_v56 }
  0x94   : > { %533 = vmatprep.mubr.f32.mxu1 %v238_v57 }
  0x97   : > { %534 = vmatmul.mubr.f32.gmra.mrb[40].mxu1 %v237_v58 }
  0x98   : > { %538 = vmatprep.mubr.f32.mxu1 %v241_v59 }
  0x9b   : > { %539 = vmatmul.mubr.f32.gmra.mrb[42].mxu1 %v240_v60 }
  0x9c   : > { %543 = vmatprep.mubr.f32.mxu1 %v244_v61 }
  0x9f   : > { %544 = vmatmul.mubr.f32.gmra.mrb[44].mxu1 %v243_v62 }
  0xa0   : > { %548 = vmatprep.mubr.f32.mxu1 %v247_v63 }
  0xa3   : > { %549 = vmatmul.mubr.f32.gmra.mrb[46].mxu1 %v246_v0 }
  0xa4   : > { %553 = vmatprep.mubr.f32.mxu1 %v250_v1 }
  0xa7   : > { %554 = vmatmul.mubr.f32.gmra.mrb[48].mxu1 %v249_v2 }
  0xe5   : > { %v625_v4 = vpop.f32.mrb[0].mxu0 }
  0xe6   : > { %v929_v5 = vpop.f32.mrb[1].mxu0 }
  0xe9   : > { %v630_v7 = vpop.f32.mrb[2].mxu0 }
  0xea   : > { %v932_v8 = vpop.f32.mrb[3].mxu0 }
  0xed   : > { %v635_v9 = vpop.f32.mrb[4].mxu0 }
  0xee   : > { %v935_v3 = vpop.f32.mrb[5].mxu0 }
  0xf1   : > { %v640_v10 = vpop.f32.mrb[6].mxu0 }
  0xf2   : > { %v938_v11 = vpop.f32.mrb[7].mxu0 }
  0xf5   : > { %v645_v12 = vpop.f32.mrb[8].mxu0 }
  0xf6   : > { %v941_v13 = vpop.f32.mrb[9].mxu0 }
  0xf9   : > { %v650_v14 = vpop.f32.mrb[10].mxu0 }
  0xfa   : > { %v944_v15 = vpop.f32.mrb[11].mxu0 }
  0xfd   : > { %v1441_v16 = vpop.f32.mrb[12].mxu0 }
  0xfe   : > { %v947_v17 = vpop.f32.mrb[13].mxu0 }
 0x101   : > { %v1443_v18 = vpop.f32.mrb[14].mxu0 }
 0x102   : > { %v950_v19 = vpop.f32.mrb[15].mxu0 }
 0x105   : > { %v1445_v20 = vpop.f32.mrb[16].mxu0 }
 0x106   : > { %v953_v21 = vpop.f32.mrb[17].mxu0 }
 0x109   : > { %v1447_v22 = vpop.f32.mrb[18].mxu0 }
 0x10a   : > { %v956_v23 = vpop.f32.mrb[19].mxu0 }
 0x10d   : > { %v1449_v24 = vpop.f32.mrb[20].mxu0 }
 0x10e   : > { %v959_v25 = vpop.f32.mrb[21].mxu0 }
 0x111   : > { %v1456_v27 = vpop.f32.mrb[22].mxu0 }
 0x112   : > { %v962_v28 = vpop.f32.mrb[23].mxu0 }
 0x115   : > { %v1460_v32 = vpop.f32.mrb[24].mxu0 }
 0x116   : > { %v965_v34 = vpop.f32.mrb[25].mxu0 }
 0x119   : > { %v1468_v39 = vpop.f32.mrb[26].mxu0 }
 0x11a   : > { %v435_v29 = vpop.f32.mrb[0].mxu1  ;;  %v968_v41 = vpop.f32.mrb[27].mxu0 }
 0x11b   : > { %v436_v30 = vadd.f32 %v1454_v26, %v435_v29  ;;  %v437_v31 = vpop.f32.mrb[1].mxu1 }
 0x11d   : > { %v626_v33 = vadd.f32 %v625_v4, %v436_v30  ;;  %v1472_v46 = vpop.f32.mrb[28].mxu0 }
 0x11e   : > { %v440_v35 = vpop.f32.mrb[2].mxu1  ;;  %v971_v48 = vpop.f32.mrb[29].mxu0 }
 0x11f   : > { %v749_v36 = vmax.f32 %v626_v33, 0.0  ;;  %v441_v37 = vadd.f32 %v1454_v26, %v440_v35  ;;  %v442_v38 = vpop.f32.mrb[3].mxu1 }
 0x121   : > { %774 = vst [vmem:[%s1465_s22] sm:$0xff] %v749_v36  ;;  %v631_v40 = vadd.f32 %v630_v7, %v441_v37  ;;  %v1476_v52 = vpop.f32.mrb[30].mxu0 }
 0x122   : > { %v445_v42 = vpop.f32.mrb[4].mxu1  ;;  %v974_v54 = vpop.f32.mrb[31].mxu0 }
 0x123   : > { %v750_v43 = vmax.f32 %v631_v40, 0.0  ;;  %v446_v44 = vadd.f32 %v1454_v26, %v445_v42  ;;  %v447_v45 = vpop.f32.mrb[5].mxu1 }
 0x125   : > { %775 = vst [vmem:[%s1465_s22 + $0x8] sm:$0xff] %v750_v43  ;;  %v636_v47 = vadd.f32 %v635_v9, %v446_v44  ;;  %v1480_v59 = vpop.f32.mrb[32].mxu0 }
 0x126   : > { %v450_v6 = vpop.f32.mrb[6].mxu1  ;;  %v977_v61 = vpop.f32.mrb[33].mxu0 }
 0x127   : > { %v751_v49 = vmax.f32 %v636_v47, 0.0  ;;  %v451_v50 = vadd.f32 %v1454_v26, %v450_v6  ;;  %v452_v51 = vpop.f32.mrb[7].mxu1 }
 0x129   : > { %776 = vst [vmem:[%s1465_s22 + $0x10] sm:$0xff] %v751_v49  ;;  %v641_v53 = vadd.f32 %v640_v10, %v451_v50  ;;  %v1484_v2 = vpop.f32.mrb[34].mxu0 }
 0x12a   : > { %v455_v55 = vpop.f32.mrb[8].mxu1  ;;  %v980_v5 = vpop.f32.mrb[35].mxu0 }
 0x12b   : > { %v752_v56 = vmax.f32 %v641_v53, 0.0  ;;  %v456_v57 = vadd.f32 %v1454_v26, %v455_v55  ;;  %v457_v58 = vpop.f32.mrb[9].mxu1 }
 0x12d   : > { %777 = vst [vmem:[%s1465_s22 + $0x18] sm:$0xff] %v752_v56  ;;  %v646_v60 = vadd.f32 %v645_v12, %v456_v57  ;;  %v1488_v10 = vpop.f32.mrb[36].mxu0 }
 0x12e   : > { %v460_v62 = vpop.f32.mrb[10].mxu1  ;;  %v983_v12 = vpop.f32.mrb[37].mxu0 }
 0x12f   : > { %v753_v63 = vmax.f32 %v646_v60, 0.0  ;;  %v461_v0 = vadd.f32 %v1454_v26, %v460_v62  ;;  %v462_v1 = vpop.f32.mrb[11].mxu1 }
 0x131   : > { %778 = vst [vmem:[%s1465_s22 + $0x20] sm:$0xff] %v753_v63  ;;  %v651_v4 = vadd.f32 %v650_v14, %v461_v0  ;;  %v1493_v21 = vpop.f32.mrb[38].mxu0 }
 0x132   : > { %v465_v7 = vpop.f32.mrb[12].mxu1  ;;  %v986_v23 = vpop.f32.mrb[39].mxu0 }
 0x133   : > { %v754_v8 = vmax.f32 %v651_v4, 0.0  ;;  %v466_v9 = vadd.f32 %v1454_v26, %v465_v7  ;;  %v467_v3 = vpop.f32.mrb[13].mxu1 }
 0x135   : > { %779 = vst [vmem:[%s1465_s22 + $0x28] sm:$0xff] %v754_v8  ;;  %v656_v11 = vadd.f32 %v1441_v16, %v466_v9  ;;  %v1498_v31 = vpop.f32.mrb[40].mxu0 }
 0x136   : > { %v470_v13 = vpop.f32.mrb[14].mxu1  ;;  %v989_v33 = vpop.f32.mrb[41].mxu0 }
 0x137   : > { %v755_v15 = vmax.f32 %v656_v11, 0.0  ;;  %v471_v17 = vadd.f32 %v1454_v26, %v470_v13  ;;  %v472_v19 = vpop.f32.mrb[15].mxu1 }
 0x139   : > { %780 = vst [vmem:[%s1465_s22 + $0x30] sm:$0xff] %v755_v15  ;;  %v661_v14 = vadd.f32 %v1443_v18, %v471_v17  ;;  %v1503_v38 = vpop.f32.mrb[42].mxu0 }
 0x13a   : > { %v475_v25 = vpop.f32.mrb[16].mxu1  ;;  %v992_v40 = vpop.f32.mrb[43].mxu0 }
 0x13b   : > { %v756_v28 = vmax.f32 %v661_v14, 0.0  ;;  %v476_v29 = vadd.f32 %v1454_v26, %v475_v25  ;;  %v477_v30 = vpop.f32.mrb[17].mxu1 }
 0x13d   : > { %781 = vst [vmem:[%s1465_s22 + $0x38] sm:$0xff] %v756_v28  ;;  %v666_v16 = vadd.f32 %v1445_v20, %v476_v29  ;;  %v1508_v45 = vpop.f32.mrb[44].mxu0 }
 0x13e   : > { %v480_v34 = vpop.f32.mrb[18].mxu1  ;;  %v995_v47 = vpop.f32.mrb[45].mxu0 }
 0x13f   : > { %v757_v35 = vmax.f32 %v666_v16, 0.0  ;;  %v481_v36 = vadd.f32 %v1454_v26, %v480_v34  ;;  %v482_v37 = vpop.f32.mrb[19].mxu1 }
 0x141   : > { %782 = vst [vmem:[%s1465_s22 + $0x40] sm:$0xff] %v757_v35  ;;  %v671_v18 = vadd.f32 %v1447_v22, %v481_v36  ;;  %v1513_v51 = vpop.f32.mrb[46].mxu0 }
 0x142   : > { %v485_v41 = vpop.f32.mrb[20].mxu1  ;;  %v998_v53 = vpop.f32.mrb[47].mxu0 }
 0x143   : > { %v758_v42 = vmax.f32 %v671_v18, 0.0  ;;  %v486_v43 = vadd.f32 %v1454_v26, %v485_v41  ;;  %v487_v44 = vpop.f32.mrb[21].mxu1 }
 0x145   : > { %783 = vst [vmem:[%s1465_s22 + $0x48] sm:$0xff] %v758_v42  ;;  %v676_v20 = vadd.f32 %v1449_v24, %v486_v43  ;;  %v1518_v24 = vpop.f32.mrb[48].mxu0 }
 0x146   : > { %v490_v48 = vpop.f32.mrb[22].mxu1  ;;  %v1001_v60 = vpop.f32.mrb[49].mxu0 }
 0x147   : > { %v759_v6 = vmax.f32 %v676_v20, 0.0  ;;  %v491_v49 = vadd.f32 %v1454_v26, %v490_v48  ;;  %v492_v50 = vpop.f32.mrb[23].mxu1 }
 0x149   : > { %784 = vst [vmem:[%s1465_s22 + $0x50] sm:$0xff] %v759_v6  ;;  %v681_v22 = vadd.f32 %v1456_v27, %v491_v49 }
 0x14a   : > { %v495_v54 = vpop.f32.mrb[24].mxu1 }
 0x14b   : > { %v760_v55 = vmax.f32 %v681_v22, 0.0  ;;  %v496_v56 = vadd.f32 %v1454_v26, %v495_v54  ;;  %v497_v57 = vpop.f32.mrb[25].mxu1 }
 0x14d   : > { %785 = vst [vmem:[%s1465_s22 + $0x58] sm:$0xff] %v760_v55  ;;  %v686_v58 = vadd.f32 %v1460_v32, %v496_v56 }
 0x14e   : > { %v500_v61 = vpop.f32.mrb[26].mxu1 }
 0x14f   : > { %v761_v62 = vmax.f32 %v686_v58, 0.0  ;;  %v501_v63 = vadd.f32 %v1454_v26, %v500_v61  ;;  %v502_v0 = vpop.f32.mrb[27].mxu1 }
 0x151   : > { %786 = vst [vmem:[%s1465_s22 + $0x60] sm:$0xff] %v761_v62  ;;  %v691_v27 = vadd.f32 %v1468_v39, %v501_v63 }
 0x152   : > { %v505_v1 = vpop.f32.mrb[28].mxu1 }
 0x153   : > { %v762_v4 = vmax.f32 %v691_v27, 0.0  ;;  %v506_v5 = vadd.f32 %v1454_v26, %v505_v1  ;;  %v507_v7 = vpop.f32.mrb[29].mxu1 }
 0x155   : > { %787 = vst [vmem:[%s1465_s22 + $0x68] sm:$0xff] %v762_v4  ;;  %v696_v8 = vadd.f32 %v1472_v46, %v506_v5 }
 0x156   : > { %v510_v32 = vpop.f32.mrb[30].mxu1 }
 0x157   : > { %v763_v9 = vmax.f32 %v696_v8, 0.0  ;;  %v511_v3 = vadd.f32 %v1454_v26, %v510_v32  ;;  %v512_v11 = vpop.f32.mrb[31].mxu1 }
 0x159   : > { %788 = vst [vmem:[%s1465_s22 + $0x70] sm:$0xff] %v763_v9  ;;  %v701_v12 = vadd.f32 %v1476_v52, %v511_v3 }
 0x15a   : > { %v515_v13 = vpop.f32.mrb[32].mxu1 }
 0x15b   : > { %v764_v39 = vmax.f32 %v701_v12, 0.0  ;;  %v516_v15 = vadd.f32 %v1454_v26, %v515_v13  ;;  %v517_v17 = vpop.f32.mrb[33].mxu1 }
 0x15d   : > { %789 = vst [vmem:[%s1465_s22 + $0x78] sm:$0xff] %v764_v39  ;;  %v706_v19 = vadd.f32 %v1480_v59, %v516_v15 }
 0x15e   : > { %v520_v14 = vpop.f32.mrb[34].mxu1 }
 0x15f   : > { %v765_v46 = vmax.f32 %v706_v19, 0.0  ;;  %v521_v23 = vadd.f32 %v1454_v26, %v520_v14  ;;  %v522_v25 = vpop.f32.mrb[35].mxu1 }
 0x161   : > { %790 = vst [vmem:[%s1465_s22 + $0x80] sm:$0xff] %v765_v46  ;;  %v711_v28 = vadd.f32 %v1484_v2, %v521_v23 }
 0x162   : > { %v525_v29 = vpop.f32.mrb[36].mxu1 }
 0x163   : > { %v766_v52 = vmax.f32 %v711_v28, 0.0  ;;  %v526_v30 = vadd.f32 %v1454_v26, %v525_v29  ;;  %v527_v16 = vpop.f32.mrb[37].mxu1 }
 0x165   : > { %791 = vst [vmem:[%s1465_s22 + $0x88] sm:$0xff] %v766_v52  ;;  %v716_v33 = vadd.f32 %v1488_v10, %v526_v30 }
 0x166   : > { %v530_v34 = vpop.f32.mrb[38].mxu1 }
 0x167   : > { %v767_v59 = vmax.f32 %v716_v33, 0.0  ;;  %v531_v35 = vadd.f32 %v1454_v26, %v530_v34  ;;  %v532_v36 = vpop.f32.mrb[39].mxu1 }
 0x169   : > { %792 = vst [vmem:[%s1465_s22 + $0x90] sm:$0xff] %v767_v59  ;;  %v721_v37 = vadd.f32 %v1493_v21, %v531_v35 }
 0x16a   : > { %v535_v18 = vpop.f32.mrb[40].mxu1 }
 0x16b   : > { %v768_v2 = vmax.f32 %v721_v37, 0.0  ;;  %v536_v40 = vadd.f32 %v1454_v26, %v535_v18  ;;  %v537_v41 = vpop.f32.mrb[41].mxu1 }
 0x16d   : > { %793 = vst [vmem:[%s1465_s22 + $0x98] sm:$0xff] %v768_v2  ;;  %v726_v42 = vadd.f32 %v1498_v31, %v536_v40 }
 0x16e   : > { %v540_v43 = vpop.f32.mrb[42].mxu1 }
 0x16f   : > { %v769_v10 = vmax.f32 %v726_v42, 0.0  ;;  %v541_v44 = vadd.f32 %v1454_v26, %v540_v43  ;;  %v542_v20 = vpop.f32.mrb[43].mxu1 }
 0x171   : > { %794 = vst [vmem:[%s1465_s22 + $0xa0] sm:$0xff] %v769_v10  ;;  %v731_v47 = vadd.f32 %v1503_v38, %v541_v44 }
 0x172   : > { %v545_v48 = vpop.f32.mrb[44].mxu1 }
 0x173   : > { %v770_v21 = vmax.f32 %v731_v47, 0.0  ;;  %v546_v6 = vadd.f32 %v1454_v26, %v545_v48  ;;  %v547_v49 = vpop.f32.mrb[45].mxu1 }
 0x175   : > { %795 = vst [vmem:[%s1465_s22 + $0xa8] sm:$0xff] %v770_v21  ;;  %v736_v50 = vadd.f32 %v1508_v45, %v546_v6 }
 0x176   : > { %v550_v31 = vpop.f32.mrb[46].mxu1 }
 0x177   : > { %v771_v22 = vmax.f32 %v736_v50, 0.0  ;;  %v551_v53 = vadd.f32 %v1454_v26, %v550_v31  ;;  %v552_v54 = vpop.f32.mrb[47].mxu1 }
 0x179   : > { %796 = vst [vmem:[%s1465_s22 + $0xb0] sm:$0xff] %v771_v22  ;;  %v741_v55 = vadd.f32 %v1513_v51, %v551_v53 }
 0x17a   : > { %v555_v56 = vpop.f32.mrb[48].mxu1 }
 0x17b   : > { %v772_v38 = vmax.f32 %v741_v55, 0.0  ;;  %v556_v57 = vadd.f32 %v1454_v26, %v555_v56  ;;  %v557_v58 = vpop.f32.mrb[49].mxu1 }
 0x17d   : > { %797 = vst [vmem:[%s1465_s22 + $0xb8] sm:$0xff] %v772_v38  ;;  %v746_v60 = vadd.f32 %v1518_v24, %v556_v57 }
 0x17f   : > { %v773_v61 = vmax.f32 %v746_v60, 0.0 }
 0x181   : > { %798 = vst [vmem:[%s1465_s22 + $0xc0] sm:$0xff] %v773_v61 }
 0x182 PF: > { %s13_s12 = sadd.s32 1, %s1124_s12  }
 0x183   : > { %p10_p4 = scmp.ge.s32.totalorder %s13_s12, 4  }
 0x185   :  { %12 = sbr.rel (!%p10_p4) target bundleno = 1 (0x1), region = 62 }

// kernel: _lambda_.9
= control target key start
LH: loop header
LB: loop body
LE: loop exit
PB: predicated region body
PF: predicated region fallthrough
CT: control target
= control target key end

     0   :  { %s2672_s12 = smov 0   ;;  %s3269_s0 = inlined_call_operand.vmem [shape: f32[1568,144], index: 0, kind: input, shape index: {}]   ;;  %s3270_s1 = inlined_call_operand.vmem [shape: f32[144,128], index: 1, kind: input, shape index: {}]   ;;  %s3271_s2 = inlined_call_operand.vmem [shape: f32[8,128], index: 2, kind: input, shape index: {}]   ;;  %s3272_s3 = inlined_call_operand.vmem [shape: f32[1568,128], index: 3, kind: output, shape index: {}]  }
   0x1 LB: > { %s1988_s13 = sadd.s32 4294967295, %s2649_s12   ;;  %p1992_p0 = scmp.ge.s32.totalorder %s2649_s12, 1  ;;  %s2649_s12 = sphi %s2672_s12, %s13_s12  }
   0x2   : > { %p139_p1 = scmp.lt.s32.totalorder %s2649_s12, 3 }
   0x4   : > { %p140_p2 = pnand %p1992_p0, %p139_p1 }
   0x5   : > { %v373_v0 = vld [vmem:[%s3270_s1] sm:$0xff] (!%p140_p2)  ;;  %v374_v1 = vld [vmem:[%s3270_s1 + $0x8] sm:$0xff] (!%p140_p2)  ;;  %v375_v2 = vld [vmem:[%s3270_s1 + $0x10] sm:$0xff] (!%p140_p2)  ;;  %s164_s20 = smul.u32 (!%p140_p2), 98, %s1988_s13  ;;  %v2651_v3 = vmov (!%p140_p2), 0.0|0.0   ;;  %vm396_vm0 = vcmask (!%p140_p2), 130048  }
   0x6   : > { %143 = sbr.rel (%p140_p2) target bundleno = 481 (0x1e1), region = 32  ;;  %2196 = vmatprep.subr.bf16.mxu0 (!%p140_p2), %v2651_v3  ;;  %2223 = vmatprep.subr.bf16.mxu1 (!%p140_p2), %v2651_v3  ;;  %v2197_v4 = vpack.c.bf16 (!%p140_p2), %v374_v1, %v373_v0  ;;  %v376_v5 = vld [vmem:[%s3270_s1 + $0x18] sm:$0xff] (!%p140_p2)  ;;  %v377_v7 = vld [vmem:[%s3270_s1 + $0x20] sm:$0xff] (!%p140_p2)  ;;  %v378_v8 = vld [vmem:[%s3270_s1 + $0x28] sm:$0xff] (!%p140_p2) }
   0x7   : > { %p165_p3 = scmp.lt.s32.totalorder (!%p140_p2), %s164_s20, 195  ;;  %v2200_v6 = vpack.c.bf16 (!%p140_p2), %v376_v5, %v375_v2  ;;  %v2203_v9 = vpack.c.bf16 (!%p140_p2), %v378_v8, %v377_v7  ;;  %v379_v10 = vld [vmem:[%s3270_s1 + $0x30] sm:$0xff] (!%p140_p2)  ;;  %v380_v11 = vld [vmem:[%s3270_s1 + $0x38] sm:$0xff] (!%p140_p2)  ;;  %v381_v15 = vld [vmem:[%s3270_s1 + $0x40] sm:$0xff] (!%p140_p2) }
   0x8   : > { %2198 = vmatpush1.bf16.msra.mxu0 (!%p140_p2), %v2197_v4  ;;  %2232 = vmatpush1.bf16.msra.mxu1 (!%p140_p2), %v2197_v4  ;;  %v2206_v14 = vpack.c.bf16 (!%p140_p2), %v380_v11, %v379_v10  ;;  %v382_v16 = vld [vmem:[%s3270_s1 + $0x48] sm:$0xff] (!%p140_p2)  ;;  %v383_v18 = vld [vmem:[%s3270_s1 + $0x50] sm:$0xff] (!%p140_p2)  ;;  %v384_v19 = vld [vmem:[%s3270_s1 + $0x58] sm:$0xff] (!%p140_p2) }
   0x9   : > { %2199 = vmatprep.subr.bf16.mxu0 (!%p140_p2), %v2651_v3  ;;  %2224 = vmatprep.subr.bf16.mxu1 (!%p140_p2), %v2651_v3  ;;  %v2209_v17 = vpack.c.bf16 (!%p140_p2), %v382_v16, %v381_v15  ;;  %v2212_v20 = vpack.c.bf16 (!%p140_p2), %v384_v19, %v383_v18  ;;  %v385_v21 = vld [vmem:[%s3270_s1 + $0x60] sm:$0xff] (!%p140_p2)  ;;  %v386_v22 = vld [vmem:[%s3270_s1 + $0x68] sm:$0xff] (!%p140_p2)  ;;  %v387_v24 = vld [vmem:[%s3270_s1 + $0x70] sm:$0xff] (!%p140_p2) }
   0xa   : > { %v2215_v23 = vpack.c.bf16 (!%p140_p2), %v386_v22, %v385_v21  ;;  %v388_v25 = vld [vmem:[%s3270_s1 + $0x78] sm:$0xff] (!%p140_p2)  ;;  %v389_v27 = vld [vmem:[%s3270_s1 + $0x80] sm:$0xff] (!%p140_p2)  ;;  %v390_v28 = vld [vmem:[%s3270_s1 + $0x88] sm:$0xff] (!%p140_p2) }
   0xb   : > { %v2218_v26 = vpack.c.bf16 (!%p140_p2), %v388_v25, %v387_v24  ;;  %v2221_v29 = vpack.c.bf16 (!%p140_p2), %v390_v28, %v389_v27 }
   0xc   : > { %2201 = vmatpush1.bf16.msra.mxu0 (!%p140_p2), %v2200_v6  ;;  %2233 = vmatpush1.bf16.msra.mxu1 (!%p140_p2), %v2200_v6 }
   0xd   : > { %s3274_s20 = smov (!%p165_p3, %s164_s20), 195  ;;  %2202 = vmatprep.subr.bf16.mxu0 %v2651_v3  ;;  %2225 = vmatprep.subr.bf16.mxu1 %v2651_v3 }
   0xe   : > { %s2195_s27 = sshll.u32 %s3274_s20, 4 }
   0xf   : > { %s2711_s5 = scalar_lea.vmem %s3269_s0, %s2195_s27 }
  0x10   : > { %v178_v12 = vld [vmem:[%s2711_s5 + $0x8] sm:$0xff]  ;;  %v276_v13 = vld [vmem:[%s2711_s5 + $0x318] sm:$0xff]  ;;  %2204 = vmatpush1.bf16.msra.mxu0 %v2203_v9  ;;  %2234 = vmatpush1.bf16.msra.mxu1 %v2203_v9  ;;  %v177_v30 = vld [vmem:[%s2711_s5] sm:$0xff] }
  0x11   : > { %1997 = vmatprep.mubr.msk.f32.mxu0 %vm396_vm0, %v178_v12  ;;  %2046 = vmatprep.mubr.msk.f32.mxu1 %vm396_vm0, %v276_v13  ;;  %v275_v31 = vld [vmem:[%s2711_s5 + $0x310] sm:$0xff]  ;;  %v180_v32 = vld [vmem:[%s2711_s5 + $0x18] sm:$0xff]  ;;  %v278_v33 = vld [vmem:[%s2711_s5 + $0x328] sm:$0xff] }
  0x12   : > { %2205 = vmatprep.subr.bf16.mxu0 %v2651_v3  ;;  %2226 = vmatprep.subr.bf16.mxu1 %v2651_v3  ;;  %v179_v34 = vld [vmem:[%s2711_s5 + $0x10] sm:$0xff]  ;;  %v277_v35 = vld [vmem:[%s2711_s5 + $0x320] sm:$0xff]  ;;  %v182_v36 = vld [vmem:[%s2711_s5 + $0x28] sm:$0xff] }
  0x13   : > { %v280_v37 = vld [vmem:[%s2711_s5 + $0x338] sm:$0xff]  ;;  %v181_v38 = vld [vmem:[%s2711_s5 + $0x20] sm:$0xff]  ;;  %v279_v39 = vld [vmem:[%s2711_s5 + $0x330] sm:$0xff] }
  0x14   : > { %2207 = vmatpush1.bf16.msra.mxu0 %v2206_v14  ;;  %2235 = vmatpush1.bf16.msra.mxu1 %v2206_v14  ;;  %v184_v40 = vld [vmem:[%s2711_s5 + $0x38] sm:$0xff]  ;;  %v282_v41 = vld [vmem:[%s2711_s5 + $0x348] sm:$0xff]  ;;  %v183_v42 = vld [vmem:[%s2711_s5 + $0x30] sm:$0xff] }
  0x15   : > { %2208 = vmatprep.subr.bf16.mxu0 %v2651_v3  ;;  %2227 = vmatprep.subr.bf16.mxu1 %v2651_v3  ;;  %v281_v43 = vld [vmem:[%s2711_s5 + $0x340] sm:$0xff]  ;;  %v186_v44 = vld [vmem:[%s2711_s5 + $0x48] sm:$0xff]  ;;  %v284_v45 = vld [vmem:[%s2711_s5 + $0x358] sm:$0xff] }
  0x16   : > { %v185_v46 = vld [vmem:[%s2711_s5 + $0x40] sm:$0xff]  ;;  %v283_v47 = vld [vmem:[%s2711_s5 + $0x350] sm:$0xff]  ;;  %v188_v48 = vld [vmem:[%s2711_s5 + $0x58] sm:$0xff] }
  0x17   : > { %v286_v49 = vld [vmem:[%s2711_s5 + $0x368] sm:$0xff]  ;;  %v187_v50 = vld [vmem:[%s2711_s5 + $0x50] sm:$0xff]  ;;  %v285_v51 = vld [vmem:[%s2711_s5 + $0x360] sm:$0xff] }
  0x18   : > { %2210 = vmatpush1.bf16.msra.mxu0 %v2209_v17  ;;  %2236 = vmatpush1.bf16.msra.mxu1 %v2209_v17  ;;  %v190_v52 = vld [vmem:[%s2711_s5 + $0x68] sm:$0xff]  ;;  %v288_v53 = vld [vmem:[%s2711_s5 + $0x378] sm:$0xff]  ;;  %v189_v54 = vld [vmem:[%s2711_s5 + $0x60] sm:$0xff] }
  0x19   : > { %2211 = vmatprep.subr.bf16.mxu0 %v2651_v3  ;;  %2228 = vmatprep.subr.bf16.mxu1 %v2651_v3  ;;  %v287_v55 = vld [vmem:[%s2711_s5 + $0x370] sm:$0xff]  ;;  %v192_v56 = vld [vmem:[%s2711_s5 + $0x78] sm:$0xff]  ;;  %v290_v57 = vld [vmem:[%s2711_s5 + $0x388] sm:$0xff] }
  0x1a   : > { %v191_v58 = vld [vmem:[%s2711_s5 + $0x70] sm:$0xff]  ;;  %v289_v59 = vld [vmem:[%s2711_s5 + $0x380] sm:$0xff]  ;;  %v194_v60 = vld [vmem:[%s2711_s5 + $0x88] sm:$0xff] }
  0x1b   : > { %v292_v61 = vld [vmem:[%s2711_s5 + $0x398] sm:$0xff]  ;;  %v193_v62 = vld [vmem:[%s2711_s5 + $0x80] sm:$0xff]  ;;  %v291_v63 = vld [vmem:[%s2711_s5 + $0x390] sm:$0xff] }
  0x1c   : > { %2213 = vmatpush1.bf16.msra.mxu0 %v2212_v20  ;;  %2237 = vmatpush1.bf16.msra.mxu1 %v2212_v20  ;;  %v196_v0 = vld [vmem:[%s2711_s5 + $0x98] sm:$0xff]  ;;  %v294_v1 = vld [vmem:[%s2711_s5 + $0x3a8] sm:$0xff]  ;;  %v195_v2 = vld [vmem:[%s2711_s5 + $0x90] sm:$0xff] }
  0x1d   : > { %2214 = vmatprep.subr.bf16.mxu0 %v2651_v3  ;;  %2229 = vmatprep.subr.bf16.mxu1 %v2651_v3  ;;  %v198_v4 = vld [vmem:[%s2711_s5 + $0xa8] sm:$0xff]  ;;  %v296_v5 = vld [vmem:[%s2711_s5 + $0x3b8] sm:$0xff]  ;;  %v197_v6 = vld [vmem:[%s2711_s5 + $0xa0] sm:$0xff] }
  0x1e   : > { %v295_v7 = vld [vmem:[%s2711_s5 + $0x3b0] sm:$0xff]  ;;  %v200_v8 = vld [vmem:[%s2711_s5 + $0xb8] sm:$0xff]  ;;  %v298_v9 = vld [vmem:[%s2711_s5 + $0x3c8] sm:$0xff] }
  0x1f   : > { %v199_v10 = vld [vmem:[%s2711_s5 + $0xb0] sm:$0xff]  ;;  %v297_v11 = vld [vmem:[%s2711_s5 + $0x3c0] sm:$0xff]  ;;  %v202_v12 = vld [vmem:[%s2711_s5 + $0xc8] sm:$0xff] }
  0x20   : > { %2216 = vmatpush1.bf16.msra.mxu0 %v2215_v23  ;;  %2238 = vmatpush1.bf16.msra.mxu1 %v2215_v23  ;;  %v300_v13 = vld [vmem:[%s2711_s5 + $0x3d8] sm:$0xff]  ;;  %v201_v14 = vld [vmem:[%s2711_s5 + $0xc0] sm:$0xff]  ;;  %v299_v15 = vld [vmem:[%s2711_s5 + $0x3d0] sm:$0xff] }
  0x21   : > { %2217 = vmatprep.subr.bf16.mxu0 %v2651_v3  ;;  %2230 = vmatprep.subr.bf16.mxu1 %v2651_v3  ;;  %v204_v16 = vld [vmem:[%s2711_s5 + $0xd8] sm:$0xff]  ;;  %v302_v17 = vld [vmem:[%s2711_s5 + $0x3e8] sm:$0xff]  ;;  %v203_v18 = vld [vmem:[%s2711_s5 + $0xd0] sm:$0xff] }
  0x22   : > { %v301_v19 = vld [vmem:[%s2711_s5 + $0x3e0] sm:$0xff]  ;;  %v206_v20 = vld [vmem:[%s2711_s5 + $0xe8] sm:$0xff]  ;;  %v304_v21 = vld [vmem:[%s2711_s5 + $0x3f8] sm:$0xff] }
  0x23   : > { %v205_v22 = vld [vmem:[%s2711_s5 + $0xe0] sm:$0xff]  ;;  %v303_v23 = vld [vmem:[%s2711_s5 + $0x3f0] sm:$0xff]  ;;  %v208_v24 = vld [vmem:[%s2711_s5 + $0xf8] sm:$0xff] }
  0x24   : > { %2219 = vmatpush1.bf16.msra.mxu0 %v2218_v26  ;;  %2239 = vmatpush1.bf16.msra.mxu1 %v2218_v26  ;;  %v306_v25 = vld [vmem:[%s2711_s5 + $0x408] sm:$0xff]  ;;  %v207_v26 = vld [vmem:[%s2711_s5 + $0xf0] sm:$0xff]  ;;  %v305_v27 = vld [vmem:[%s2711_s5 + $0x400] sm:$0xff] }
  0x25   : > { %2220 = vmatprep.subr.bf16.mxu0 %v2651_v3  ;;  %2231 = vmatprep.subr.bf16.mxu1 %v2651_v3  ;;  %v293_v3 = vld [vmem:[%s2711_s5 + $0x3a0] sm:$0xff]  ;;  %v210_v28 = vld [vmem:[%s2711_s5 + $0x108] sm:$0xff] }
  0x28   : > { %2222 = vmatpush1.bf16.msra.mxu0 %v2221_v29  ;;  %2240 = vmatpush1.bf16.msra.mxu1 %v2221_v29  ;;  %v308_v29 = vld [vmem:[%s2711_s5 + $0x418] sm:$0xff] }
  0x2b   : > { %756 = vmatmul.mubr.f32.vlgmr.msra.gmra.mrb[0].mxu0 %v177_v30  ;;  %1001 = vmatmul.mubr.f32.vlgmr.msra.gmra.mrb[0].mxu1 %v275_v31  ;;  %v209_v30 = vld [vmem:[%s2711_s5 + $0x100] sm:$0xff]  ;;  %v307_v31 = vld [vmem:[%s2711_s5 + $0x410] sm:$0xff] }
  0x2c   : > { %1998 = vmatprep.mubr.msk.f32.mxu0 %vm396_vm0, %v180_v32  ;;  %2047 = vmatprep.mubr.msk.f32.mxu1 %vm396_vm0, %v278_v33  ;;  %v212_v32 = vld [vmem:[%s2711_s5 + $0x118] sm:$0xff]  ;;  %v310_v33 = vld [vmem:[%s2711_s5 + $0x428] sm:$0xff] }
  0x2f   : > { %761 = vmatmul.mubr.f32.gmra.mrb[2].mxu0 %v179_v34  ;;  %1006 = vmatmul.mubr.f32.gmra.mrb[2].mxu1 %v277_v35  ;;  %v211_v34 = vld [vmem:[%s2711_s5 + $0x110] sm:$0xff]  ;;  %v309_v35 = vld [vmem:[%s2711_s5 + $0x420] sm:$0xff] }
  0x30   : > { %1999 = vmatprep.mubr.msk.f32.mxu0 %vm396_vm0, %v182_v36  ;;  %2048 = vmatprep.mubr.msk.f32.mxu1 %vm396_vm0, %v280_v37  ;;  %v214_v36 = vld [vmem:[%s2711_s5 + $0x128] sm:$0xff]  ;;  %v312_v37 = vld [vmem:[%s2711_s5 + $0x438] sm:$0xff] }
  0x33   : > { %766 = vmatmul.mubr.f32.gmra.mrb[4].mxu0 %v181_v38  ;;  %1011 = vmatmul.mubr.f32.gmra.mrb[4].mxu1 %v279_v39  ;;  %v213_v38 = vld [vmem:[%s2711_s5 + $0x120] sm:$0xff]  ;;  %v311_v39 = vld [vmem:[%s2711_s5 + $0x430] sm:$0xff] }
  0x34   : > { %2000 = vmatprep.mubr.msk.f32.mxu0 %vm396_vm0, %v184_v40  ;;  %2049 = vmatprep.mubr.msk.f32.mxu1 %vm396_vm0, %v282_v41  ;;  %v216_v40 = vld [vmem:[%s2711_s5 + $0x138] sm:$0xff]  ;;  %v314_v41 = vld [vmem:[%s2711_s5 + $0x448] sm:$0xff] }
  0x37   : > { %771 = vmatmul.mubr.f32.gmra.mrb[6].mxu0 %v183_v42  ;;  %1016 = vmatmul.mubr.f32.gmra.mrb[6].mxu1 %v281_v43  ;;  %v215_v42 = vld [vmem:[%s2711_s5 + $0x130] sm:$0xff]  ;;  %v313_v43 = vld [vmem:[%s2711_s5 + $0x440] sm:$0xff] }
  0x38   : > { %2001 = vmatprep.mubr.msk.f32.mxu0 %vm396_vm0, %v186_v44  ;;  %2050 = vmatprep.mubr.msk.f32.mxu1 %vm396_vm0, %v284_v45  ;;  %v218_v44 = vld [vmem:[%s2711_s5 + $0x148] sm:$0xff]  ;;  %v316_v45 = vld [vmem:[%s2711_s5 + $0x458] sm:$0xff] }
  0x3b   : > { %776 = vmatmul.mubr.f32.gmra.mrb[8].mxu0 %v185_v46  ;;  %1021 = vmatmul.mubr.f32.gmra.mrb[8].mxu1 %v283_v47  ;;  %v217_v46 = vld [vmem:[%s2711_s5 + $0x140] sm:$0xff]  ;;  %v315_v47 = vld [vmem:[%s2711_s5 + $0x450] sm:$0xff] }
  0x3c   : > { %2002 = vmatprep.mubr.msk.f32.mxu0 %vm396_vm0, %v188_v48  ;;  %2051 = vmatprep.mubr.msk.f32.mxu1 %vm396_vm0, %v286_v49  ;;  %v220_v48 = vld [vmem:[%s2711_s5 + $0x158] sm:$0xff]  ;;  %v318_v49 = vld [vmem:[%s2711_s5 + $0x468] sm:$0xff] }
  0x3f   : > { %781 = vmatmul.mubr.f32.gmra.mrb[10].mxu0 %v187_v50  ;;  %1026 = vmatmul.mubr.f32.gmra.mrb[10].mxu1 %v285_v51  ;;  %v219_v50 = vld [vmem:[%s2711_s5 + $0x150] sm:$0xff]  ;;  %v317_v51 = vld [vmem:[%s2711_s5 + $0x460] sm:$0xff] }
  0x40   : > { %2003 = vmatprep.mubr.msk.f32.mxu0 %vm396_vm0, %v190_v52  ;;  %2052 = vmatprep.mubr.msk.f32.mxu1 %vm396_vm0, %v288_v53  ;;  %v222_v52 = vld [vmem:[%s2711_s5 + $0x168] sm:$0xff]  ;;  %v320_v53 = vld [vmem:[%s2711_s5 + $0x478] sm:$0xff] }
  0x43   : > { %786 = vmatmul.mubr.f32.gmra.mrb[12].mxu0 %v189_v54  ;;  %1031 = vmatmul.mubr.f32.gmra.mrb[12].mxu1 %v287_v55  ;;  %v221_v54 = vld [vmem:[%s2711_s5 + $0x160] sm:$0xff]  ;;  %v319_v55 = vld [vmem:[%s2711_s5 + $0x470] sm:$0xff] }
  0x44   : > { %2004 = vmatprep.mubr.msk.f32.mxu0 %vm396_vm0, %v192_v56  ;;  %2053 = vmatprep.mubr.msk.f32.mxu1 %vm396_vm0, %v290_v57  ;;  %v224_v56 = vld [vmem:[%s2711_s5 + $0x178] sm:$0xff]  ;;  %v322_v57 = vld [vmem:[%s2711_s5 + $0x488] sm:$0xff] }
  0x47   : > { %791 = vmatmul.mubr.f32.gmra.mrb[14].mxu0 %v191_v58  ;;  %1036 = vmatmul.mubr.f32.gmra.mrb[14].mxu1 %v289_v59  ;;  %v223_v58 = vld [vmem:[%s2711_s5 + $0x170] sm:$0xff]  ;;  %v321_v59 = vld [vmem:[%s2711_s5 + $0x480] sm:$0xff] }
  0x48   : > { %2005 = vmatprep.mubr.msk.f32.mxu0 %vm396_vm0, %v194_v60  ;;  %2054 = vmatprep.mubr.msk.f32.mxu1 %vm396_vm0, %v292_v61  ;;  %v226_v60 = vld [vmem:[%s2711_s5 + $0x188] sm:$0xff]  ;;  %v324_v61 = vld [vmem:[%s2711_s5 + $0x498] sm:$0xff] }
  0x4b   : > { %796 = vmatmul.mubr.f32.gmra.mrb[16].mxu0 %v193_v62  ;;  %1041 = vmatmul.mubr.f32.gmra.mrb[16].mxu1 %v291_v63  ;;  %v225_v62 = vld [vmem:[%s2711_s5 + $0x180] sm:$0xff]  ;;  %v323_v63 = vld [vmem:[%s2711_s5 + $0x490] sm:$0xff] }
  0x4c   : > { %2006 = vmatprep.mubr.msk.f32.mxu0 %vm396_vm0, %v196_v0  ;;  %2055 = vmatprep.mubr.msk.f32.mxu1 %vm396_vm0, %v294_v1  ;;  %v228_v0 = vld [vmem:[%s2711_s5 + $0x198] sm:$0xff]  ;;  %v326_v1 = vld [vmem:[%s2711_s5 + $0x4a8] sm:$0xff] }
  0x4f   : > { %801 = vmatmul.mubr.f32.gmra.mrb[18].mxu0 %v195_v2  ;;  %1046 = vmatmul.mubr.f32.gmra.mrb[18].mxu1 %v293_v3  ;;  %v227_v2 = vld [vmem:[%s2711_s5 + $0x190] sm:$0xff]  ;;  %v325_v3 = vld [vmem:[%s2711_s5 + $0x4a0] sm:$0xff] }
  0x50   : > { %2007 = vmatprep.mubr.msk.f32.mxu0 %vm396_vm0, %v198_v4  ;;  %2056 = vmatprep.mubr.msk.f32.mxu1 %vm396_vm0, %v296_v5  ;;  %v230_v4 = vld [vmem:[%s2711_s5 + $0x1a8] sm:$0xff]  ;;  %v328_v5 = vld [vmem:[%s2711_s5 + $0x4b8] sm:$0xff] }
  0x53   : > { %806 = vmatmul.mubr.f32.gmra.mrb[20].mxu0 %v197_v6  ;;  %1051 = vmatmul.mubr.f32.gmra.mrb[20].mxu1 %v295_v7  ;;  %v229_v6 = vld [vmem:[%s2711_s5 + $0x1a0] sm:$0xff]  ;;  %v327_v7 = vld [vmem:[%s2711_s5 + $0x4b0] sm:$0xff] }
  0x54   : > { %2008 = vmatprep.mubr.msk.f32.mxu0 %vm396_vm0, %v200_v8  ;;  %2057 = vmatprep.mubr.msk.f32.mxu1 %vm396_vm0, %v298_v9  ;;  %v232_v8 = vld [vmem:[%s2711_s5 + $0x1b8] sm:$0xff]  ;;  %v330_v9 = vld [vmem:[%s2711_s5 + $0x4c8] sm:$0xff] }
  0x57   : > { %811 = vmatmul.mubr.f32.gmra.mrb[22].mxu0 %v199_v10  ;;  %1056 = vmatmul.mubr.f32.gmra.mrb[22].mxu1 %v297_v11  ;;  %v231_v10 = vld [vmem:[%s2711_s5 + $0x1b0] sm:$0xff]  ;;  %v329_v11 = vld [vmem:[%s2711_s5 + $0x4c0] sm:$0xff] }
  0x58   : > { %2009 = vmatprep.mubr.msk.f32.mxu0 %vm396_vm0, %v202_v12  ;;  %2058 = vmatprep.mubr.msk.f32.mxu1 %vm396_vm0, %v300_v13  ;;  %v234_v12 = vld [vmem:[%s2711_s5 + $0x1c8] sm:$0xff]  ;;  %v332_v13 = vld [vmem:[%s2711_s5 + $0x4d8] sm:$0xff] }
  0x5b   : > { %816 = vmatmul.mubr.f32.gmra.mrb[24].mxu0 %v201_v14  ;;  %1061 = vmatmul.mubr.f32.gmra.mrb[24].mxu1 %v299_v15  ;;  %v233_v14 = vld [vmem:[%s2711_s5 + $0x1c0] sm:$0xff]  ;;  %v331_v15 = vld [vmem:[%s2711_s5 + $0x4d0] sm:$0xff] }
  0x5c   : > { %2010 = vmatprep.mubr.msk.f32.mxu0 %vm396_vm0, %v204_v16  ;;  %2059 = vmatprep.mubr.msk.f32.mxu1 %vm396_vm0, %v302_v17  ;;  %v236_v16 = vld [vmem:[%s2711_s5 + $0x1d8] sm:$0xff]  ;;  %v334_v17 = vld [vmem:[%s2711_s5 + $0x4e8] sm:$0xff] }
  0x5f   : > { %821 = vmatmul.mubr.f32.gmra.mrb[26].mxu0 %v203_v18  ;;  %1066 = vmatmul.mubr.f32.gmra.mrb[26].mxu1 %v301_v19  ;;  %v235_v18 = vld [vmem:[%s2711_s5 + $0x1d0] sm:$0xff]  ;;  %v333_v19 = vld [vmem:[%s2711_s5 + $0x4e0] sm:$0xff] }
  0x60   : > { %2011 = vmatprep.mubr.msk.f32.mxu0 %vm396_vm0, %v206_v20  ;;  %2060 = vmatprep.mubr.msk.f32.mxu1 %vm396_vm0, %v304_v21  ;;  %v238_v20 = vld [vmem:[%s2711_s5 + $0x1e8] sm:$0xff]  ;;  %v336_v21 = vld [vmem:[%s2711_s5 + $0x4f8] sm:$0xff] }
  0x63   : > { %826 = vmatmul.mubr.f32.gmra.mrb[28].mxu0 %v205_v22  ;;  %1071 = vmatmul.mubr.f32.gmra.mrb[28].mxu1 %v303_v23  ;;  %v237_v22 = vld [vmem:[%s2711_s5 + $0x1e0] sm:$0xff]  ;;  %v335_v23 = vld [vmem:[%s2711_s5 + $0x4f0] sm:$0xff] }
  0x64   : > { %2012 = vmatprep.mubr.msk.f32.mxu0 %vm396_vm0, %v208_v24  ;;  %2061 = vmatprep.mubr.msk.f32.mxu1 %vm396_vm0, %v306_v25  ;;  %v240_v24 = vld [vmem:[%s2711_s5 + $0x1f8] sm:$0xff]  ;;  %v338_v25 = vld [vmem:[%s2711_s5 + $0x508] sm:$0xff] }
  0x67   : > { %831 = vmatmul.mubr.f32.gmra.mrb[30].mxu0 %v207_v26  ;;  %1076 = vmatmul.mubr.f32.gmra.mrb[30].mxu1 %v305_v27  ;;  %v239_v26 = vld [vmem:[%s2711_s5 + $0x1f0] sm:$0xff]  ;;  %v337_v27 = vld [vmem:[%s2711_s5 + $0x500] sm:$0xff] }
  0x68   : > { %2013 = vmatprep.mubr.msk.f32.mxu0 %vm396_vm0, %v210_v28  ;;  %2062 = vmatprep.mubr.msk.f32.mxu1 %vm396_vm0, %v308_v29  ;;  %v242_v28 = vld [vmem:[%s2711_s5 + $0x208] sm:$0xff]  ;;  %v340_v29 = vld [vmem:[%s2711_s5 + $0x518] sm:$0xff] }
  0x6b   : > { %836 = vmatmul.mubr.f32.gmra.mrb[32].mxu0 %v209_v30  ;;  %1081 = vmatmul.mubr.f32.gmra.mrb[32].mxu1 %v307_v31  ;;  %v241_v30 = vld [vmem:[%s2711_s5 + $0x200] sm:$0xff]  ;;  %v339_v31 = vld [vmem:[%s2711_s5 + $0x510] sm:$0xff] }
  0x6c   : > { %2014 = vmatprep.mubr.msk.f32.mxu0 %vm396_vm0, %v212_v32  ;;  %2063 = vmatprep.mubr.msk.f32.mxu1 %vm396_vm0, %v310_v33  ;;  %v244_v32 = vld [vmem:[%s2711_s5 + $0x218] sm:$0xff]  ;;  %v342_v33 = vld [vmem:[%s2711_s5 + $0x528] sm:$0xff] }
  0x6f   : > { %841 = vmatmul.mubr.f32.gmra.mrb[34].mxu0 %v211_v34  ;;  %1086 = vmatmul.mubr.f32.gmra.mrb[34].mxu1 %v309_v35  ;;  %v243_v34 = vld [vmem:[%s2711_s5 + $0x210] sm:$0xff]  ;;  %v341_v35 = vld [vmem:[%s2711_s5 + $0x520] sm:$0xff] }
  0x70   : > { %2015 = vmatprep.mubr.msk.f32.mxu0 %vm396_vm0, %v214_v36  ;;  %2064 = vmatprep.mubr.msk.f32.mxu1 %vm396_vm0, %v312_v37  ;;  %v246_v36 = vld [vmem:[%s2711_s5 + $0x228] sm:$0xff]  ;;  %v344_v37 = vld [vmem:[%s2711_s5 + $0x538] sm:$0xff] }
  0x73   : > { %846 = vmatmul.mubr.f32.gmra.mrb[36].mxu0 %v213_v38  ;;  %1091 = vmatmul.mubr.f32.gmra.mrb[36].mxu1 %v311_v39  ;;  %v245_v38 = vld [vmem:[%s2711_s5 + $0x220] sm:$0xff]  ;;  %v343_v39 = vld [vmem:[%s2711_s5 + $0x530] sm:$0xff] }
  0x74   : > { %2016 = vmatprep.mubr.msk.f32.mxu0 %vm396_vm0, %v216_v40  ;;  %2065 = vmatprep.mubr.msk.f32.mxu1 %vm396_vm0, %v314_v41  ;;  %v248_v40 = vld [vmem:[%s2711_s5 + $0x238] sm:$0xff]  ;;  %v346_v41 = vld [vmem:[%s2711_s5 + $0x548] sm:$0xff] }
  0x77   : > { %851 = vmatmul.mubr.f32.gmra.mrb[38].mxu0 %v215_v42  ;;  %1096 = vmatmul.mubr.f32.gmra.mrb[38].mxu1 %v313_v43  ;;  %v247_v42 = vld [vmem:[%s2711_s5 + $0x230] sm:$0xff]  ;;  %v345_v43 = vld [vmem:[%s2711_s5 + $0x540] sm:$0xff] }
  0x78   : > { %2017 = vmatprep.mubr.msk.f32.mxu0 %vm396_vm0, %v218_v44  ;;  %2066 = vmatprep.mubr.msk.f32.mxu1 %vm396_vm0, %v316_v45  ;;  %v250_v44 = vld [vmem:[%s2711_s5 + $0x248] sm:$0xff]  ;;  %v348_v45 = vld [vmem:[%s2711_s5 + $0x558] sm:$0xff] }
  0x7b   : > { %856 = vmatmul.mubr.f32.gmra.mrb[40].mxu0 %v217_v46  ;;  %1101 = vmatmul.mubr.f32.gmra.mrb[40].mxu1 %v315_v47  ;;  %v249_v46 = vld [vmem:[%s2711_s5 + $0x240] sm:$0xff]  ;;  %v347_v47 = vld [vmem:[%s2711_s5 + $0x550] sm:$0xff] }
  0x7c   : > { %2018 = vmatprep.mubr.msk.f32.mxu0 %vm396_vm0, %v220_v48  ;;  %2067 = vmatprep.mubr.msk.f32.mxu1 %vm396_vm0, %v318_v49  ;;  %v252_v48 = vld [vmem:[%s2711_s5 + $0x258] sm:$0xff]  ;;  %v350_v49 = vld [vmem:[%s2711_s5 + $0x568] sm:$0xff] }
  0x7f   : > { %861 = vmatmul.mubr.f32.gmra.mrb[42].mxu0 %v219_v50  ;;  %1106 = vmatmul.mubr.f32.gmra.mrb[42].mxu1 %v317_v51  ;;  %v251_v50 = vld [vmem:[%s2711_s5 + $0x250] sm:$0xff]  ;;  %v349_v51 = vld [vmem:[%s2711_s5 + $0x560] sm:$0xff] }
  0x80   : > { %2019 = vmatprep.mubr.msk.f32.mxu0 %vm396_vm0, %v222_v52  ;;  %2068 = vmatprep.mubr.msk.f32.mxu1 %vm396_vm0, %v320_v53  ;;  %v254_v52 = vld [vmem:[%s2711_s5 + $0x268] sm:$0xff]  ;;  %v352_v53 = vld [vmem:[%s2711_s5 + $0x578] sm:$0xff] }
  0x83   : > { %866 = vmatmul.mubr.f32.gmra.mrb[44].mxu0 %v221_v54  ;;  %1111 = vmatmul.mubr.f32.gmra.mrb[44].mxu1 %v319_v55  ;;  %v253_v54 = vld [vmem:[%s2711_s5 + $0x260] sm:$0xff]  ;;  %v351_v55 = vld [vmem:[%s2711_s5 + $0x570] sm:$0xff] }
  0x84   : > { %2020 = vmatprep.mubr.msk.f32.mxu0 %vm396_vm0, %v224_v56  ;;  %2069 = vmatprep.mubr.msk.f32.mxu1 %vm396_vm0, %v322_v57  ;;  %v256_v56 = vld [vmem:[%s2711_s5 + $0x278] sm:$0xff]  ;;  %v354_v57 = vld [vmem:[%s2711_s5 + $0x588] sm:$0xff] }
  0x87   : > { %871 = vmatmul.mubr.f32.gmra.mrb[46].mxu0 %v223_v58  ;;  %1116 = vmatmul.mubr.f32.gmra.mrb[46].mxu1 %v321_v59  ;;  %v255_v58 = vld [vmem:[%s2711_s5 + $0x270] sm:$0xff]  ;;  %v353_v59 = vld [vmem:[%s2711_s5 + $0x580] sm:$0xff] }
  0x88   : > { %2021 = vmatprep.mubr.msk.f32.mxu0 %vm396_vm0, %v226_v60  ;;  %2070 = vmatprep.mubr.msk.f32.mxu1 %vm396_vm0, %v324_v61  ;;  %v258_v60 = vld [vmem:[%s2711_s5 + $0x288] sm:$0xff]  ;;  %v356_v61 = vld [vmem:[%s2711_s5 + $0x598] sm:$0xff] }
  0x8b   : > { %876 = vmatmul.mubr.f32.gmra.mrb[48].mxu0 %v225_v62  ;;  %1121 = vmatmul.mubr.f32.gmra.mrb[48].mxu1 %v323_v63  ;;  %v257_v62 = vld [vmem:[%s2711_s5 + $0x280] sm:$0xff]  ;;  %v355_v63 = vld [vmem:[%s2711_s5 + $0x590] sm:$0xff] }
  0x8c   : > { %2022 = vmatprep.mubr.msk.f32.mxu0 %vm396_vm0, %v228_v0  ;;  %2071 = vmatprep.mubr.msk.f32.mxu1 %vm396_vm0, %v326_v1  ;;  %v260_v0 = vld [vmem:[%s2711_s5 + $0x298] sm:$0xff]  ;;  %v358_v1 = vld [vmem:[%s2711_s5 + $0x5a8] sm:$0xff] }
  0x8f   : > { %881 = vmatmul.mubr.f32.gmra.mrb[50].mxu0 %v227_v2  ;;  %1126 = vmatmul.mubr.f32.gmra.mrb[50].mxu1 %v325_v3  ;;  %v259_v2 = vld [vmem:[%s2711_s5 + $0x290] sm:$0xff]  ;;  %v357_v3 = vld [vmem:[%s2711_s5 + $0x5a0] sm:$0xff] }
  0x90   : > { %2023 = vmatprep.mubr.msk.f32.mxu0 %vm396_vm0, %v230_v4  ;;  %2072 = vmatprep.mubr.msk.f32.mxu1 %vm396_vm0, %v328_v5  ;;  %v262_v4 = vld [vmem:[%s2711_s5 + $0x2a8] sm:$0xff]  ;;  %v360_v5 = vld [vmem:[%s2711_s5 + $0x5b8] sm:$0xff] }
  0x93   : > { %886 = vmatmul.mubr.f32.gmra.mrb[52].mxu0 %v229_v6  ;;  %1131 = vmatmul.mubr.f32.gmra.mrb[52].mxu1 %v327_v7  ;;  %v261_v6 = vld [vmem:[%s2711_s5 + $0x2a0] sm:$0xff]  ;;  %v359_v7 = vld [vmem:[%s2711_s5 + $0x5b0] sm:$0xff] }
  0x94   : > { %2024 = vmatprep.mubr.msk.f32.mxu0 %vm396_vm0, %v232_v8  ;;  %2073 = vmatprep.mubr.msk.f32.mxu1 %vm396_vm0, %v330_v9  ;;  %v264_v8 = vld [vmem:[%s2711_s5 + $0x2b8] sm:$0xff]  ;;  %v362_v9 = vld [vmem:[%s2711_s5 + $0x5c8] sm:$0xff] }
  0x97   : > { %891 = vmatmul.mubr.f32.gmra.mrb[54].mxu0 %v231_v10  ;;  %1136 = vmatmul.mubr.f32.gmra.mrb[54].mxu1 %v329_v11  ;;  %v263_v10 = vld [vmem:[%s2711_s5 + $0x2b0] sm:$0xff]  ;;  %v361_v11 = vld [vmem:[%s2711_s5 + $0x5c0] sm:$0xff] }
  0x98   : > { %2025 = vmatprep.mubr.msk.f32.mxu0 %vm396_vm0, %v234_v12  ;;  %2074 = vmatprep.mubr.msk.f32.mxu1 %vm396_vm0, %v332_v13  ;;  %v266_v12 = vld [vmem:[%s2711_s5 + $0x2c8] sm:$0xff]  ;;  %v364_v13 = vld [vmem:[%s2711_s5 + $0x5d8] sm:$0xff] }
  0x9b   : > { %896 = vmatmul.mubr.f32.gmra.mrb[56].mxu0 %v233_v14  ;;  %1141 = vmatmul.mubr.f32.gmra.mrb[56].mxu1 %v331_v15  ;;  %v265_v14 = vld [vmem:[%s2711_s5 + $0x2c0] sm:$0xff]  ;;  %v363_v15 = vld [vmem:[%s2711_s5 + $0x5d0] sm:$0xff] }
  0x9c   : > { %2026 = vmatprep.mubr.msk.f32.mxu0 %vm396_vm0, %v236_v16  ;;  %2075 = vmatprep.mubr.msk.f32.mxu1 %vm396_vm0, %v334_v17  ;;  %v268_v16 = vld [vmem:[%s2711_s5 + $0x2d8] sm:$0xff]  ;;  %v366_v17 = vld [vmem:[%s2711_s5 + $0x5e8] sm:$0xff] }
  0x9f   : > { %901 = vmatmul.mubr.f32.gmra.mrb[58].mxu0 %v235_v18  ;;  %1146 = vmatmul.mubr.f32.gmra.mrb[58].mxu1 %v333_v19  ;;  %v267_v18 = vld [vmem:[%s2711_s5 + $0x2d0] sm:$0xff]  ;;  %v365_v19 = vld [vmem:[%s2711_s5 + $0x5e0] sm:$0xff] }
  0xa0   : > { %2027 = vmatprep.mubr.msk.f32.mxu0 %vm396_vm0, %v238_v20  ;;  %2076 = vmatprep.mubr.msk.f32.mxu1 %vm396_vm0, %v336_v21  ;;  %v270_v20 = vld [vmem:[%s2711_s5 + $0x2e8] sm:$0xff]  ;;  %v368_v21 = vld [vmem:[%s2711_s5 + $0x5f8] sm:$0xff] }
  0xa3   : > { %906 = vmatmul.mubr.f32.gmra.mrb[60].mxu0 %v237_v22  ;;  %1151 = vmatmul.mubr.f32.gmra.mrb[60].mxu1 %v335_v23  ;;  %v269_v22 = vld [vmem:[%s2711_s5 + $0x2e0] sm:$0xff]  ;;  %v367_v23 = vld [vmem:[%s2711_s5 + $0x5f0] sm:$0xff] }
  0xa4   : > { %2028 = vmatprep.mubr.msk.f32.mxu0 %vm396_vm0, %v240_v24  ;;  %2077 = vmatprep.mubr.msk.f32.mxu1 %vm396_vm0, %v338_v25  ;;  %v272_v24 = vld [vmem:[%s2711_s5 + $0x2f8] sm:$0xff]  ;;  %v370_v25 = vld [vmem:[%s2711_s5 + $0x608] sm:$0xff] }
  0xa7   : > { %911 = vmatmul.mubr.f32.gmra.mrb[62].mxu0 %v239_v26  ;;  %1156 = vmatmul.mubr.f32.gmra.mrb[62].mxu1 %v337_v27  ;;  %v271_v26 = vld [vmem:[%s2711_s5 + $0x2f0] sm:$0xff]  ;;  %v369_v27 = vld [vmem:[%s2711_s5 + $0x600] sm:$0xff] }
  0xa8   : > { %2029 = vmatprep.mubr.msk.f32.mxu0 %vm396_vm0, %v242_v28  ;;  %2078 = vmatprep.mubr.msk.f32.mxu1 %vm396_vm0, %v340_v29  ;;  %v274_v28 = vld [vmem:[%s2711_s5 + $0x308] sm:$0xff]  ;;  %v372_v29 = vld [vmem:[%s2711_s5 + $0x618] sm:$0xff] }
  0xab   : > { %916 = vmatmul.mubr.f32.gmra.mrb[64].mxu0 %v241_v30  ;;  %1161 = vmatmul.mubr.f32.gmra.mrb[64].mxu1 %v339_v31  ;;  %v273_v30 = vld [vmem:[%s2711_s5 + $0x300] sm:$0xff]  ;;  %v371_v31 = vld [vmem:[%s2711_s5 + $0x610] sm:$0xff]  ;;  %s1995_s5 = sshll.u32 %s3274_s20, 3 }
  0xac   : > { %2030 = vmatprep.mubr.msk.f32.mxu0 %vm396_vm0, %v244_v32  ;;  %2079 = vmatprep.mubr.msk.f32.mxu1 %vm396_vm0, %v342_v33  ;;  %v3057_v32 = vld [vmem:[%s3271_s2] ss:$0 sm:$0xff]  ;;  %s3077_s20 = scalar_lea.vmem %s3272_s3, %s1995_s5 }
  0xaf   : > { %921 = vmatmul.mubr.f32.gmra.mrb[66].mxu0 %v243_v34  ;;  %1166 = vmatmul.mubr.f32.gmra.mrb[66].mxu1 %v341_v35 }
  0xb0   : > { %2031 = vmatprep.mubr.msk.f32.mxu0 %vm396_vm0, %v246_v36  ;;  %2080 = vmatprep.mubr.msk.f32.mxu1 %vm396_vm0, %v344_v37 }
  0xb3   : > { %926 = vmatmul.mubr.f32.gmra.mrb[68].mxu0 %v245_v38  ;;  %1171 = vmatmul.mubr.f32.gmra.mrb[68].mxu1 %v343_v39 }
  0xb4   : > { %2032 = vmatprep.mubr.msk.f32.mxu0 %vm396_vm0, %v248_v40  ;;  %2081 = vmatprep.mubr.msk.f32.mxu1 %vm396_vm0, %v346_v41 }
  0xb7   : > { %931 = vmatmul.mubr.f32.gmra.mrb[70].mxu0 %v247_v42  ;;  %1176 = vmatmul.mubr.f32.gmra.mrb[70].mxu1 %v345_v43 }
  0xb8   : > { %2033 = vmatprep.mubr.msk.f32.mxu0 %vm396_vm0, %v250_v44  ;;  %2082 = vmatprep.mubr.msk.f32.mxu1 %vm396_vm0, %v348_v45 }
  0xbb   : > { %936 = vmatmul.mubr.f32.gmra.mrb[72].mxu0 %v249_v46  ;;  %1181 = vmatmul.mubr.f32.gmra.mrb[72].mxu1 %v347_v47 }
  0xbc   : > { %2034 = vmatprep.mubr.msk.f32.mxu0 %vm396_vm0, %v252_v48  ;;  %2083 = vmatprep.mubr.msk.f32.mxu1 %vm396_vm0, %v350_v49 }
  0xbf   : > { %941 = vmatmul.mubr.f32.gmra.mrb[74].mxu0 %v251_v50  ;;  %1186 = vmatmul.mubr.f32.gmra.mrb[74].mxu1 %v349_v51 }
  0xc0   : > { %2035 = vmatprep.mubr.msk.f32.mxu0 %vm396_vm0, %v254_v52  ;;  %2084 = vmatprep.mubr.msk.f32.mxu1 %vm396_vm0, %v352_v53 }
  0xc3   : > { %946 = vmatmul.mubr.f32.gmra.mrb[76].mxu0 %v253_v54  ;;  %1191 = vmatmul.mubr.f32.gmra.mrb[76].mxu1 %v351_v55 }
  0xc4   : > { %2036 = vmatprep.mubr.msk.f32.mxu0 %vm396_vm0, %v256_v56  ;;  %2085 = vmatprep.mubr.msk.f32.mxu1 %vm396_vm0, %v354_v57 }
  0xc7   : > { %951 = vmatmul.mubr.f32.gmra.mrb[78].mxu0 %v255_v58  ;;  %1196 = vmatmul.mubr.f32.gmra.mrb[78].mxu1 %v353_v59 }
  0xc8   : > { %2037 = vmatprep.mubr.msk.f32.mxu0 %vm396_vm0, %v258_v60  ;;  %2086 = vmatprep.mubr.msk.f32.mxu1 %vm396_vm0, %v356_v61 }
  0xcb   : > { %956 = vmatmul.mubr.f32.gmra.mrb[80].mxu0 %v257_v62  ;;  %1201 = vmatmul.mubr.f32.gmra.mrb[80].mxu1 %v355_v63 }
  0xcc   : > { %2038 = vmatprep.mubr.msk.f32.mxu0 %vm396_vm0, %v260_v0  ;;  %2087 = vmatprep.mubr.msk.f32.mxu1 %vm396_vm0, %v358_v1 }
  0xcf   : > { %961 = vmatmul.mubr.f32.gmra.mrb[82].mxu0 %v259_v2  ;;  %1206 = vmatmul.mubr.f32.gmra.mrb[82].mxu1 %v357_v3 }
  0xd0   : > { %2039 = vmatprep.mubr.msk.f32.mxu0 %vm396_vm0, %v262_v4  ;;  %2088 = vmatprep.mubr.msk.f32.mxu1 %vm396_vm0, %v360_v5 }
  0xd3   : > { %966 = vmatmul.mubr.f32.gmra.mrb[84].mxu0 %v261_v6  ;;  %1211 = vmatmul.mubr.f32.gmra.mrb[84].mxu1 %v359_v7 }
  0xd4   : > { %2040 = vmatprep.mubr.msk.f32.mxu0 %vm396_vm0, %v264_v8  ;;  %2089 = vmatprep.mubr.msk.f32.mxu1 %vm396_vm0, %v362_v9 }
  0xd7   : > { %971 = vmatmul.mubr.f32.gmra.mrb[86].mxu0 %v263_v10  ;;  %1216 = vmatmul.mubr.f32.gmra.mrb[86].mxu1 %v361_v11 }
  0xd8   : > { %2041 = vmatprep.mubr.msk.f32.mxu0 %vm396_vm0, %v266_v12  ;;  %2090 = vmatprep.mubr.msk.f32.mxu1 %vm396_vm0, %v364_v13 }
  0xdb   : > { %976 = vmatmul.mubr.f32.gmra.mrb[88].mxu0 %v265_v14  ;;  %1221 = vmatmul.mubr.f32.gmra.mrb[88].mxu1 %v363_v15 }
  0xdc   : > { %2042 = vmatprep.mubr.msk.f32.mxu0 %vm396_vm0, %v268_v16  ;;  %2091 = vmatprep.mubr.msk.f32.mxu1 %vm396_vm0, %v366_v17 }
  0xdf   : > { %981 = vmatmul.mubr.f32.gmra.mrb[90].mxu0 %v267_v18  ;;  %1226 = vmatmul.mubr.f32.gmra.mrb[90].mxu1 %v365_v19 }
  0xe0   : > { %2043 = vmatprep.mubr.msk.f32.mxu0 %vm396_vm0, %v270_v20  ;;  %2092 = vmatprep.mubr.msk.f32.mxu1 %vm396_vm0, %v368_v21 }
  0xe3   : > { %986 = vmatmul.mubr.f32.gmra.mrb[92].mxu0 %v269_v22  ;;  %1231 = vmatmul.mubr.f32.gmra.mrb[92].mxu1 %v367_v23 }
  0xe4   : > { %2044 = vmatprep.mubr.msk.f32.mxu0 %vm396_vm0, %v272_v24  ;;  %2093 = vmatprep.mubr.msk.f32.mxu1 %vm396_vm0, %v370_v25 }
  0xe7   : > { %991 = vmatmul.mubr.f32.gmra.mrb[94].mxu0 %v271_v26  ;;  %1236 = vmatmul.mubr.f32.gmra.mrb[94].mxu1 %v369_v27 }
  0xe8   : > { %2045 = vmatprep.mubr.msk.f32.mxu0 %vm396_vm0, %v274_v28  ;;  %2094 = vmatprep.mubr.msk.f32.mxu1 %vm396_vm0, %v372_v29 }
  0xeb   : > { %996 = vmatmul.mubr.f32.gmra.mrb[96].mxu0 %v273_v30  ;;  %1241 = vmatmul.mubr.f32.gmra.mrb[96].mxu1 %v371_v31 }
  0xfe   : > { %v757_v33 = vpop.f32.mrb[0].mxu0  ;;  %v1002_v34 = vpop.f32.mrb[0].mxu1 }
  0xff   : > { %v758_v35 = vadd.f32 %v3057_v32, %v757_v33  ;;  %v1003_v36 = vadd.f32 %v3057_v32, %v1002_v34  ;;  %v759_v37 = vpop.f32.mrb[1].mxu0  ;;  %v1004_v38 = vpop.f32.mrb[1].mxu1 }
 0x101   : > { %v2095_v39 = vmul.f32 -1.442695, %v758_v35  ;;  %v2144_v40 = vmul.f32 -1.442695, %v1003_v36 }
 0x102   : > { %v762_v41 = vpop.f32.mrb[2].mxu0  ;;  %v1007_v42 = vpop.f32.mrb[2].mxu1 }
 0x103   : > { %2250 = vpow2.f32 %v2095_v39  ;;  %v763_v43 = vadd.f32 %v3057_v32, %v762_v41  ;;  %v1008_v44 = vadd.f32 %v3057_v32, %v1007_v42  ;;  %v764_v45 = vpop.f32.mrb[3].mxu0  ;;  %v1009_v46 = vpop.f32.mrb[3].mxu1 }
 0x104   : > { %2252 = vpow2.f32 %v2144_v40 }
 0x105   : > { %v2096_v47 = vmul.f32 -1.442695, %v763_v43  ;;  %v2145_v48 = vmul.f32 -1.442695, %v1008_v44 }
 0x106   : > { %v767_v49 = vpop.f32.mrb[4].mxu0  ;;  %v1012_v50 = vpop.f32.mrb[4].mxu1 }
 0x107   : > { %2254 = vpow2.f32 %v2096_v47  ;;  %v768_v51 = vadd.f32 %v3057_v32, %v767_v49  ;;  %v1013_v52 = vadd.f32 %v3057_v32, %v1012_v50  ;;  %v769_v53 = vpop.f32.mrb[5].mxu0  ;;  %v1014_v54 = vpop.f32.mrb[5].mxu1 }
 0x108   : > { %2256 = vpow2.f32 %v2145_v48 }
 0x109   : > { %v2097_v55 = vmul.f32 -1.442695, %v768_v51  ;;  %v2146_v56 = vmul.f32 -1.442695, %v1013_v52 }
 0x10a   : > { %v772_v57 = vpop.f32.mrb[6].mxu0  ;;  %v1017_v58 = vpop.f32.mrb[6].mxu1 }
 0x10b   : > { %2258 = vpow2.f32 %v2097_v55  ;;  %v773_v59 = vadd.f32 %v3057_v32, %v772_v57  ;;  %v1018_v60 = vadd.f32 %v3057_v32, %v1017_v58  ;;  %v774_v61 = vpop.f32.mrb[7].mxu0  ;;  %v1019_v62 = vpop.f32.mrb[7].mxu1 }
 0x10c   : > { %2260 = vpow2.f32 %v2146_v56 }
 0x10d   : > { %v2251_v63 = vpop.eup %2250  ;;  %v2098_v0 = vmul.f32 -1.442695, %v773_v59  ;;  %v2147_v3 = vmul.f32 -1.442695, %v1018_v60 }
 0x10e   : > { %v2253_v1 = vpop.eup %2252  ;;  %v1540_v2 = vadd.f32 1.0, %v2251_v63  ;;  %v777_v4 = vpop.f32.mrb[8].mxu0 }
 0x10f   : > { %v1022_v5 = vpop.f32.mrb[8].mxu1  ;;  %v1589_v6 = vadd.f32 1.0, %v2253_v1  ;;  %2262 = vpow2.f32 %v2098_v0  ;;  %v778_v7 = vadd.f32 %v3057_v32, %v777_v4  ;;  %v779_v9 = vpop.f32.mrb[9].mxu0 }
 0x110   : > { %v1023_v8 = vadd.f32 %v3057_v32, %v1022_v5  ;;  %v1024_v10 = vpop.f32.mrb[9].mxu1  ;;  %2264 = vrcp.f32 %v1540_v2 }
 0x111   : > { %v2255_v11 = vpop.eup %2254  ;;  %2266 = vrcp.f32 %v1589_v6  ;;  %v2099_v12 = vmul.f32 -1.442695, %v778_v7 }
 0x112   : > { %v2257_v13 = vpop.eup %2256  ;;  %v1541_v14 = vadd.f32 1.0, %v2255_v11  ;;  %2268 = vpow2.f32 %v2147_v3  ;;  %v2148_v15 = vmul.f32 -1.442695, %v1023_v8  ;;  %v782_v16 = vpop.f32.mrb[10].mxu0 }
 0x113   : > { %v1027_v17 = vpop.f32.mrb[10].mxu1  ;;  %v1590_v18 = vadd.f32 1.0, %v2257_v13  ;;  %2270 = vpow2.f32 %v2099_v12  ;;  %v783_v19 = vadd.f32 %v3057_v32, %v782_v16  ;;  %v784_v21 = vpop.f32.mrb[11].mxu0 }
 0x114   : > { %v1028_v20 = vadd.f32 %v3057_v32, %v1027_v17  ;;  %v1029_v22 = vpop.f32.mrb[11].mxu1  ;;  %2272 = vrcp.f32 %v1541_v14 }
 0x115   : > { %v2259_v23 = vpop.eup %2258  ;;  %2274 = vrcp.f32 %v1590_v18  ;;  %v2100_v24 = vmul.f32 -1.442695, %v783_v19 }
 0x116   : > { %v2261_v25 = vpop.eup %2260  ;;  %v1542_v26 = vadd.f32 1.0, %v2259_v23  ;;  %2276 = vpow2.f32 %v2148_v15  ;;  %v2149_v27 = vmul.f32 -1.442695, %v1028_v20  ;;  %v787_v28 = vpop.f32.mrb[12].mxu0 }
 0x117   : > { %v1032_v29 = vpop.f32.mrb[12].mxu1  ;;  %v1591_v30 = vadd.f32 1.0, %v2261_v25  ;;  %2278 = vpow2.f32 %v2100_v24  ;;  %v788_v31 = vadd.f32 %v3057_v32, %v787_v28  ;;  %v789_v34 = vpop.f32.mrb[13].mxu0 }
 0x118   : > { %v1033_v33 = vadd.f32 %v3057_v32, %v1032_v29  ;;  %v1034_v35 = vpop.f32.mrb[13].mxu1  ;;  %2280 = vrcp.f32 %v1542_v26 }
 0x119   : > { %v2263_v36 = vpop.eup %2262  ;;  %2282 = vrcp.f32 %v1591_v30  ;;  %v2101_v37 = vmul.f32 -1.442695, %v788_v31 }
 0x11a   : > { %v2150_v38 = vmul.f32 -1.442695, %v1033_v33  ;;  %v2265_v39 = vpop.eup %2264  ;;  %v1543_v40 = vadd.f32 1.0, %v2263_v36  ;;  %2284 = vpow2.f32 %v2149_v27  ;;  %v792_v41 = vpop.f32.mrb[14].mxu0 }
 0x11b   : > { %v1037_v42 = vpop.f32.mrb[14].mxu1  ;;  %v2267_v43 = vpop.eup %2266  ;;  %1834 = vst [vmem:[%s3077_s20] sm:$0xff] %v2265_v39  ;;  %2286 = vpow2.f32 %v2101_v37  ;;  %v793_v44 = vadd.f32 %v3057_v32, %v792_v41 }
 0x11c   : > { %v1038_v45 = vadd.f32 %v3057_v32, %v1037_v42  ;;  %v794_v46 = vpop.f32.mrb[15].mxu0  ;;  %v1039_v47 = vpop.f32.mrb[15].mxu1  ;;  %1883 = vst [vmem:[%s3077_s20 + $0x188] sm:$0xff] %v2267_v43  ;;  %2288 = vrcp.f32 %v1543_v40 }
 0x11d   : > { %v2269_v48 = vpop.eup %2268  ;;  %2290 = vpow2.f32 %v2150_v38  ;;  %v2102_v51 = vmul.f32 -1.442695, %v793_v44 }
 0x11e   : > { %v2271_v49 = vpop.eup %2270  ;;  %v1592_v50 = vadd.f32 1.0, %v2269_v48  ;;  %v2151_v54 = vmul.f32 -1.442695, %v1038_v45  ;;  %v797_v55 = vpop.f32.mrb[16].mxu0 }
 0x11f   : > { %v2273_v52 = vpop.eup %2272  ;;  %v1544_v53 = vadd.f32 1.0, %v2271_v49  ;;  %v1042_v56 = vpop.f32.mrb[16].mxu1  ;;  %v798_v58 = vadd.f32 %v3057_v32, %v797_v55 }
 0x120   : > { %v2275_v57 = vpop.eup %2274  ;;  %1835 = vst [vmem:[%s3077_s20 + $0x8] sm:$0xff] %v2273_v52  ;;  %2292 = vrcp.f32 %v1592_v50  ;;  %v1043_v59 = vadd.f32 %v3057_v32, %v1042_v56  ;;  %v799_v60 = vpop.f32.mrb[17].mxu0 }
 0x121   : > { %v1044_v61 = vpop.f32.mrb[17].mxu1  ;;  %v2277_v62 = vpop.eup %2276  ;;  %1884 = vst [vmem:[%s3077_s20 + $0x190] sm:$0xff] %v2275_v57  ;;  %2294 = vrcp.f32 %v1544_v53  ;;  %v2103_v1 = vmul.f32 -1.442695, %v798_v58 }
 0x122   : > { %v2279_v63 = vpop.eup %2278  ;;  %v1593_v0 = vadd.f32 1.0, %v2277_v62  ;;  %2296 = vpow2.f32 %v2102_v51  ;;  %v2152_v4 = vmul.f32 -1.442695, %v1043_v59  ;;  %v802_v5 = vpop.f32.mrb[18].mxu0 }
 0x123   : > { %v2281_v2 = vpop.eup %2280  ;;  %v1545_v3 = vadd.f32 1.0, %v2279_v63  ;;  %2298 = vpow2.f32 %v2151_v54  ;;  %v1047_v6 = vpop.f32.mrb[18].mxu1  ;;  %v803_v8 = vadd.f32 %v3057_v32, %v802_v5 }
 0x124   : > { %v2283_v7 = vpop.eup %2282  ;;  %1836 = vst [vmem:[%s3077_s20 + $0x10] sm:$0xff] %v2281_v2  ;;  %2300 = vrcp.f32 %v1593_v0  ;;  %v1048_v9 = vadd.f32 %v3057_v32, %v1047_v6  ;;  %v804_v10 = vpop.f32.mrb[19].mxu0 }
 0x125   : > { %v1049_v11 = vpop.f32.mrb[19].mxu1  ;;  %v2285_v12 = vpop.eup %2284  ;;  %1885 = vst [vmem:[%s3077_s20 + $0x198] sm:$0xff] %v2283_v7  ;;  %2302 = vrcp.f32 %v1545_v3  ;;  %v2104_v15 = vmul.f32 -1.442695, %v803_v8 }
 0x126   : > { %v2287_v13 = vpop.eup %2286  ;;  %v1594_v14 = vadd.f32 1.0, %v2285_v12  ;;  %2304 = vpow2.f32 %v2103_v1  ;;  %v807_v18 = vpop.f32.mrb[20].mxu0  ;;  %v2153_v21 = vmul.f32 -1.442695, %v1048_v9 }
 0x127   : > { %v2289_v16 = vpop.eup %2288  ;;  %v1546_v17 = vadd.f32 1.0, %v2287_v13  ;;  %2306 = vpow2.f32 %v2152_v4  ;;  %v1052_v19 = vpop.f32.mrb[20].mxu1  ;;  %v808_v22 = vadd.f32 %v3057_v32, %v807_v18 }
 0x128   : > { %v2291_v20 = vpop.eup %2290  ;;  %1837 = vst [vmem:[%s3077_s20 + $0x18] sm:$0xff] %v2289_v16  ;;  %2308 = vrcp.f32 %v1594_v14  ;;  %v1053_v23 = vadd.f32 %v3057_v32, %v1052_v19  ;;  %v809_v24 = vpop.f32.mrb[21].mxu0 }
 0x129   : > { %v1054_v25 = vpop.f32.mrb[21].mxu1  ;;  %2310 = vrcp.f32 %v1546_v17  ;;  %v1595_v26 = vadd.f32 1.0, %v2291_v20  ;;  %v2105_v28 = vmul.f32 -1.442695, %v808_v22 }
 0x12a   : > { %v2293_v27 = vpop.eup %2292  ;;  %2312 = vpow2.f32 %v2104_v15  ;;  %v2154_v29 = vmul.f32 -1.442695, %v1053_v23  ;;  %v812_v31 = vpop.f32.mrb[22].mxu0 }
 0x12b   : > { %v2295_v30 = vpop.eup %2294  ;;  %1886 = vst [vmem:[%s3077_s20 + $0x1a0] sm:$0xff] %v2293_v27  ;;  %2314 = vrcp.f32 %v1595_v26  ;;  %v1057_v33 = vpop.f32.mrb[22].mxu1  ;;  %v813_v35 = vadd.f32 %v3057_v32, %v812_v31 }
 0x12c   : > { %v2297_v34 = vpop.eup %2296  ;;  %1838 = vst [vmem:[%s3077_s20 + $0x20] sm:$0xff] %v2295_v30  ;;  %2316 = vpow2.f32 %v2153_v21  ;;  %v1058_v36 = vadd.f32 %v3057_v32, %v1057_v33  ;;  %v814_v37 = vpop.f32.mrb[23].mxu0 }
 0x12d   : > { %v1059_v38 = vpop.f32.mrb[23].mxu1  ;;  %v2299_v39 = vpop.eup %2298  ;;  %v1547_v40 = vadd.f32 1.0, %v2297_v34  ;;  %2318 = vpow2.f32 %v2105_v28  ;;  %v2106_v43 = vmul.f32 -1.442695, %v813_v35 }
 0x12e   : > { %v2301_v41 = vpop.eup %2300  ;;  %v1596_v42 = vadd.f32 1.0, %v2299_v39  ;;  %2320 = vpow2.f32 %v2154_v29  ;;  %v2155_v44 = vmul.f32 -1.442695, %v1058_v36  ;;  %v817_v46 = vpop.f32.mrb[24].mxu0 }
 0x12f   : > { %v2303_v45 = vpop.eup %2302  ;;  %1887 = vst [vmem:[%s3077_s20 + $0x1a8] sm:$0xff] %v2301_v41  ;;  %2322 = vrcp.f32 %v1547_v40  ;;  %v1062_v47 = vpop.f32.mrb[24].mxu1  ;;  %v818_v49 = vadd.f32 %v3057_v32, %v817_v46 }
 0x130   : > { %v2305_v48 = vpop.eup %2304  ;;  %1839 = vst [vmem:[%s3077_s20 + $0x28] sm:$0xff] %v2303_v45  ;;  %2324 = vrcp.f32 %v1596_v42  ;;  %v1063_v50 = vadd.f32 %v3057_v32, %v1062_v47  ;;  %v819_v51 = vpop.f32.mrb[25].mxu0 }
 0x131   : > { %v1064_v52 = vpop.f32.mrb[25].mxu1  ;;  %v2307_v53 = vpop.eup %2306  ;;  %v1548_v54 = vadd.f32 1.0, %v2305_v48  ;;  %2326 = vpow2.f32 %v2106_v43  ;;  %v2107_v57 = vmul.f32 -1.442695, %v818_v49 }
 0x132   : > { %v2309_v55 = vpop.eup %2308  ;;  %v1597_v56 = vadd.f32 1.0, %v2307_v53  ;;  %2328 = vpow2.f32 %v2155_v44  ;;  %v2156_v58 = vmul.f32 -1.442695, %v1063_v50  ;;  %v822_v60 = vpop.f32.mrb[26].mxu0 }
 0x133   : > { %v2311_v59 = vpop.eup %2310  ;;  %1888 = vst [vmem:[%s3077_s20 + $0x1b0] sm:$0xff] %v2309_v55  ;;  %2330 = vrcp.f32 %v1548_v54  ;;  %v1067_v61 = vpop.f32.mrb[26].mxu1  ;;  %v823_v63 = vadd.f32 %v3057_v32, %v822_v60 }
 0x134   : > { %v2313_v62 = vpop.eup %2312  ;;  %1840 = vst [vmem:[%s3077_s20 + $0x30] sm:$0xff] %v2311_v59  ;;  %2332 = vrcp.f32 %v1597_v56  ;;  %v1068_v0 = vadd.f32 %v3057_v32, %v1067_v61  ;;  %v824_v1 = vpop.f32.mrb[27].mxu0 }
 0x135   : > { %v1069_v2 = vpop.f32.mrb[27].mxu1  ;;  %v2315_v3 = vpop.eup %2314  ;;  %v1549_v4 = vadd.f32 1.0, %v2313_v62  ;;  %2334 = vpow2.f32 %v2107_v57  ;;  %v2108_v6 = vmul.f32 -1.442695, %v823_v63 }
 0x136   : > { %v2317_v5 = vpop.eup %2316  ;;  %1889 = vst [vmem:[%s3077_s20 + $0x1b8] sm:$0xff] %v2315_v3  ;;  %2336 = vpow2.f32 %v2156_v58  ;;  %v2157_v9 = vmul.f32 -1.442695, %v1068_v0  ;;  %v827_v10 = vpop.f32.mrb[28].mxu0 }
 0x137   : > { %v2319_v7 = vpop.eup %2318  ;;  %2338 = vrcp.f32 %v1549_v4  ;;  %v1598_v8 = vadd.f32 1.0, %v2317_v5  ;;  %v1072_v11 = vpop.f32.mrb[28].mxu1  ;;  %v828_v14 = vadd.f32 %v3057_v32, %v827_v10 }
 0x138   : > { %v2321_v12 = vpop.eup %2320  ;;  %v1550_v13 = vadd.f32 1.0, %v2319_v7  ;;  %2340 = vpow2.f32 %v2108_v6  ;;  %v1073_v15 = vadd.f32 %v3057_v32, %v1072_v11  ;;  %v829_v16 = vpop.f32.mrb[29].mxu0 }
 0x139   : > { %v1074_v17 = vpop.f32.mrb[29].mxu1  ;;  %v2323_v18 = vpop.eup %2322  ;;  %2342 = vrcp.f32 %v1598_v8  ;;  %v1599_v19 = vadd.f32 1.0, %v2321_v12  ;;  %v2109_v21 = vmul.f32 -1.442695, %v828_v14 }
 0x13a   : > { %v2325_v20 = vpop.eup %2324  ;;  %1841 = vst [vmem:[%s3077_s20 + $0x38] sm:$0xff] %v2323_v18  ;;  %2344 = vrcp.f32 %v1550_v13  ;;  %v2158_v23 = vmul.f32 -1.442695, %v1073_v15  ;;  %v832_v24 = vpop.f32.mrb[30].mxu0 }
 0x13b   : > { %v2327_v22 = vpop.eup %2326  ;;  %1890 = vst [vmem:[%s3077_s20 + $0x1c0] sm:$0xff] %v2325_v20  ;;  %2346 = vrcp.f32 %v1599_v19  ;;  %v1077_v25 = vpop.f32.mrb[30].mxu1  ;;  %v833_v28 = vadd.f32 %v3057_v32, %v832_v24 }
 0x13c   : > { %v2329_v26 = vpop.eup %2328  ;;  %v1551_v27 = vadd.f32 1.0, %v2327_v22  ;;  %2348 = vpow2.f32 %v2157_v9  ;;  %v1078_v29 = vadd.f32 %v3057_v32, %v1077_v25  ;;  %v834_v30 = vpop.f32.mrb[31].mxu0 }
 0x13d   : > { %v1079_v31 = vpop.f32.mrb[31].mxu1  ;;  %v2331_v33 = vpop.eup %2330  ;;  %v1600_v34 = vadd.f32 1.0, %v2329_v26  ;;  %2350 = vpow2.f32 %v2109_v21  ;;  %v2110_v36 = vmul.f32 -1.442695, %v833_v28 }
 0x13e   : > { %v2333_v35 = vpop.eup %2332  ;;  %1842 = vst [vmem:[%s3077_s20 + $0x40] sm:$0xff] %v2331_v33  ;;  %2352 = vrcp.f32 %v1551_v27  ;;  %v2159_v38 = vmul.f32 -1.442695, %v1078_v29  ;;  %v837_v39 = vpop.f32.mrb[32].mxu0 }
 0x13f   : > { %v2335_v37 = vpop.eup %2334  ;;  %1891 = vst [vmem:[%s3077_s20 + $0x1c8] sm:$0xff] %v2333_v35  ;;  %2354 = vrcp.f32 %v1600_v34  ;;  %v1082_v40 = vpop.f32.mrb[32].mxu1  ;;  %v838_v43 = vadd.f32 %v3057_v32, %v837_v39 }
 0x140   : > { %v2337_v41 = vpop.eup %2336  ;;  %v1552_v42 = vadd.f32 1.0, %v2335_v37  ;;  %2356 = vpow2.f32 %v2158_v23  ;;  %v1083_v44 = vadd.f32 %v3057_v32, %v1082_v40  ;;  %v839_v45 = vpop.f32.mrb[33].mxu0 }
 0x141   : > { %v1084_v46 = vpop.f32.mrb[33].mxu1  ;;  %v2339_v47 = vpop.eup %2338  ;;  %v1601_v48 = vadd.f32 1.0, %v2337_v41  ;;  %2358 = vpow2.f32 %v2110_v36  ;;  %v2111_v50 = vmul.f32 -1.442695, %v838_v43 }
 0x142   : > { %v2341_v49 = vpop.eup %2340  ;;  %1843 = vst [vmem:[%s3077_s20 + $0x48] sm:$0xff] %v2339_v47  ;;  %2360 = vrcp.f32 %v1552_v42  ;;  %v2160_v53 = vmul.f32 -1.442695, %v1083_v44  ;;  %v842_v54 = vpop.f32.mrb[34].mxu0 }
 0x143   : > { %v2343_v51 = vpop.eup %2342  ;;  %2362 = vrcp.f32 %v1601_v48  ;;  %v1553_v52 = vadd.f32 1.0, %v2341_v49  ;;  %v1087_v55 = vpop.f32.mrb[34].mxu1  ;;  %v843_v57 = vadd.f32 %v3057_v32, %v842_v54 }
 0x144   : > { %v2345_v56 = vpop.eup %2344  ;;  %1892 = vst [vmem:[%s3077_s20 + $0x1d0] sm:$0xff] %v2343_v51  ;;  %2364 = vpow2.f32 %v2159_v38  ;;  %v1088_v58 = vadd.f32 %v3057_v32, %v1087_v55  ;;  %v844_v59 = vpop.f32.mrb[35].mxu0 }
 0x145   : > { %v1089_v60 = vpop.f32.mrb[35].mxu1  ;;  %v2347_v61 = vpop.eup %2346  ;;  %1844 = vst [vmem:[%s3077_s20 + $0x50] sm:$0xff] %v2345_v56  ;;  %2366 = vrcp.f32 %v1553_v52  ;;  %v2112_v63 = vmul.f32 -1.442695, %v843_v57 }
 0x146   : > { %v2349_v62 = vpop.eup %2348  ;;  %1893 = vst [vmem:[%s3077_s20 + $0x1d8] sm:$0xff] %v2347_v61  ;;  %2368 = vpow2.f32 %v2111_v50  ;;  %v2161_v2 = vmul.f32 -1.442695, %v1088_v58  ;;  %v847_v3 = vpop.f32.mrb[36].mxu0 }
 0x147   : > { %v2351_v0 = vpop.eup %2350  ;;  %v1602_v1 = vadd.f32 1.0, %v2349_v62  ;;  %2370 = vpow2.f32 %v2160_v53  ;;  %v1092_v4 = vpop.f32.mrb[36].mxu1  ;;  %v848_v7 = vadd.f32 %v3057_v32, %v847_v3 }
 0x148   : > { %v2353_v5 = vpop.eup %2352  ;;  %v1554_v6 = vadd.f32 1.0, %v2351_v0  ;;  %2372 = vpow2.f32 %v2112_v63  ;;  %v1093_v8 = vadd.f32 %v3057_v32, %v1092_v4  ;;  %v849_v9 = vpop.f32.mrb[37].mxu0 }
 0x149   : > { %v1094_v10 = vpop.f32.mrb[37].mxu1  ;;  %v2355_v11 = vpop.eup %2354  ;;  %1845 = vst [vmem:[%s3077_s20 + $0x58] sm:$0xff] %v2353_v5  ;;  %2374 = vrcp.f32 %v1602_v1  ;;  %v2113_v13 = vmul.f32 -1.442695, %v848_v7 }
 0x14a   : > { %v2357_v12 = vpop.eup %2356  ;;  %1894 = vst [vmem:[%s3077_s20 + $0x1e0] sm:$0xff] %v2355_v11  ;;  %2376 = vrcp.f32 %v1554_v6  ;;  %v2162_v16 = vmul.f32 -1.442695, %v1093_v8  ;;  %v852_v17 = vpop.f32.mrb[38].mxu0 }
 0x14b   : > { %v2359_v14 = vpop.eup %2358  ;;  %v1603_v15 = vadd.f32 1.0, %v2357_v12  ;;  %2378 = vpow2.f32 %v2161_v2  ;;  %v1097_v18 = vpop.f32.mrb[38].mxu1  ;;  %v853_v21 = vadd.f32 %v3057_v32, %v852_v17 }
 0x14c   : > { %v2361_v19 = vpop.eup %2360  ;;  %v1555_v20 = vadd.f32 1.0, %v2359_v14  ;;  %2380 = vpow2.f32 %v2113_v13  ;;  %v1098_v22 = vadd.f32 %v3057_v32, %v1097_v18  ;;  %v854_v23 = vpop.f32.mrb[39].mxu0 }
 0x14d   : > { %v1099_v24 = vpop.f32.mrb[39].mxu1  ;;  %v2363_v25 = vpop.eup %2362  ;;  %1846 = vst [vmem:[%s3077_s20 + $0x60] sm:$0xff] %v2361_v19  ;;  %2382 = vrcp.f32 %v1603_v15  ;;  %v2114_v27 = vmul.f32 -1.442695, %v853_v21 }
 0x14e   : > { %v2365_v26 = vpop.eup %2364  ;;  %1895 = vst [vmem:[%s3077_s20 + $0x1e8] sm:$0xff] %v2363_v25  ;;  %2384 = vrcp.f32 %v1555_v20  ;;  %v2163_v28 = vmul.f32 -1.442695, %v1098_v22  ;;  %v857_v31 = vpop.f32.mrb[40].mxu0 }
 0x14f   : > { %v2367_v29 = vpop.eup %2366  ;;  %v1604_v30 = vadd.f32 1.0, %v2365_v26  ;;  %2386 = vpow2.f32 %v2162_v16  ;;  %v1102_v33 = vpop.f32.mrb[40].mxu1  ;;  %v858_v35 = vadd.f32 %v3057_v32, %v857_v31 }
 0x150   : > { %v2369_v34 = vpop.eup %2368  ;;  %1847 = vst [vmem:[%s3077_s20 + $0x68] sm:$0xff] %v2367_v29  ;;  %2388 = vpow2.f32 %v2114_v27  ;;  %v1103_v36 = vadd.f32 %v3057_v32, %v1102_v33  ;;  %v859_v37 = vpop.f32.mrb[41].mxu0 }
 0x151   : > { %v1104_v38 = vpop.f32.mrb[41].mxu1  ;;  %v2371_v39 = vpop.eup %2370  ;;  %2390 = vrcp.f32 %v1604_v30  ;;  %v1556_v40 = vadd.f32 1.0, %v2369_v34  ;;  %v2115_v43 = vmul.f32 -1.442695, %v858_v35 }
 0x152   : > { %v2373_v41 = vpop.eup %2372  ;;  %v1605_v42 = vadd.f32 1.0, %v2371_v39  ;;  %2392 = vpow2.f32 %v2163_v28  ;;  %v2164_v46 = vmul.f32 -1.442695, %v1103_v36  ;;  %v862_v47 = vpop.f32.mrb[42].mxu0 }
 0x153   : > { %v2375_v44 = vpop.eup %2374  ;;  %2394 = vrcp.f32 %v1556_v40  ;;  %v1557_v45 = vadd.f32 1.0, %v2373_v41  ;;  %v1107_v48 = vpop.f32.mrb[42].mxu1  ;;  %v863_v50 = vadd.f32 %v3057_v32, %v862_v47 }
 0x154   : > { %v2377_v49 = vpop.eup %2376  ;;  %1896 = vst [vmem:[%s3077_s20 + $0x1f0] sm:$0xff] %v2375_v44  ;;  %2396 = vrcp.f32 %v1605_v42  ;;  %v1108_v51 = vadd.f32 %v3057_v32, %v1107_v48  ;;  %v864_v52 = vpop.f32.mrb[43].mxu0 }
 0x155   : > { %v1109_v53 = vpop.f32.mrb[43].mxu1  ;;  %v2379_v54 = vpop.eup %2378  ;;  %1848 = vst [vmem:[%s3077_s20 + $0x70] sm:$0xff] %v2377_v49  ;;  %2398 = vrcp.f32 %v1557_v45  ;;  %v2116_v57 = vmul.f32 -1.442695, %v863_v50 }
 0x156   : > { %v2381_v55 = vpop.eup %2380  ;;  %v1606_v56 = vadd.f32 1.0, %v2379_v54  ;;  %2400 = vpow2.f32 %v2115_v43  ;;  %v2165_v60 = vmul.f32 -1.442695, %v1108_v51  ;;  %v867_v61 = vpop.f32.mrb[44].mxu0 }
 0x157   : > { %v2383_v58 = vpop.eup %2382  ;;  %v1558_v59 = vadd.f32 1.0, %v2381_v55  ;;  %2402 = vpow2.f32 %v2164_v46  ;;  %v1112_v62 = vpop.f32.mrb[44].mxu1  ;;  %v868_v0 = vadd.f32 %v3057_v32, %v867_v61 }
 0x158   : > { %v2385_v63 = vpop.eup %2384  ;;  %1897 = vst [vmem:[%s3077_s20 + $0x1f8] sm:$0xff] %v2383_v58  ;;  %2404 = vrcp.f32 %v1606_v56  ;;  %v1113_v1 = vadd.f32 %v3057_v32, %v1112_v62  ;;  %v869_v2 = vpop.f32.mrb[45].mxu0 }
 0x159   : > { %v1114_v3 = vpop.f32.mrb[45].mxu1  ;;  %v2387_v4 = vpop.eup %2386  ;;  %1849 = vst [vmem:[%s3077_s20 + $0x78] sm:$0xff] %v2385_v63  ;;  %2406 = vrcp.f32 %v1558_v59  ;;  %v2117_v7 = vmul.f32 -1.442695, %v868_v0 }
 0x15a   : > { %v2389_v5 = vpop.eup %2388  ;;  %v1607_v6 = vadd.f32 1.0, %v2387_v4  ;;  %2408 = vpow2.f32 %v2116_v57  ;;  %v872_v10 = vpop.f32.mrb[46].mxu0  ;;  %v2166_v13 = vmul.f32 -1.442695, %v1113_v1 }
 0x15b   : > { %v2391_v8 = vpop.eup %2390  ;;  %v1559_v9 = vadd.f32 1.0, %v2389_v5  ;;  %2410 = vpow2.f32 %v2165_v60  ;;  %v1117_v11 = vpop.f32.mrb[46].mxu1  ;;  %v873_v14 = vadd.f32 %v3057_v32, %v872_v10 }
 0x15c   : > { %v2393_v12 = vpop.eup %2392  ;;  %1898 = vst [vmem:[%s3077_s20 + $0x200] sm:$0xff] %v2391_v8  ;;  %2412 = vrcp.f32 %v1607_v6  ;;  %v1118_v15 = vadd.f32 %v3057_v32, %v1117_v11  ;;  %v874_v16 = vpop.f32.mrb[47].mxu0 }
 0x15d   : > { %v1119_v17 = vpop.f32.mrb[47].mxu1  ;;  %v2395_v18 = vpop.eup %2394  ;;  %2414 = vrcp.f32 %v1559_v9  ;;  %v1608_v19 = vadd.f32 1.0, %v2393_v12  ;;  %v2118_v21 = vmul.f32 -1.442695, %v873_v14 }
 0x15e   : > { %v2397_v20 = vpop.eup %2396  ;;  %1850 = vst [vmem:[%s3077_s20 + $0x80] sm:$0xff] %v2395_v18  ;;  %2416 = vpow2.f32 %v2117_v7  ;;  %v2167_v22 = vmul.f32 -1.442695, %v1118_v15  ;;  %v877_v24 = vpop.f32.mrb[48].mxu0 }
 0x15f   : > { %v2399_v23 = vpop.eup %2398  ;;  %1899 = vst [vmem:[%s3077_s20 + $0x208] sm:$0xff] %v2397_v20  ;;  %2418 = vrcp.f32 %v1608_v19  ;;  %v1122_v25 = vpop.f32.mrb[48].mxu1  ;;  %v878_v27 = vadd.f32 %v3057_v32, %v877_v24 }
 0x160   : > { %v2401_v26 = vpop.eup %2400  ;;  %1851 = vst [vmem:[%s3077_s20 + $0x88] sm:$0xff] %v2399_v23  ;;  %2420 = vpow2.f32 %v2166_v13  ;;  %v1123_v28 = vadd.f32 %v3057_v32, %v1122_v25  ;;  %v879_v29 = vpop.f32.mrb[49].mxu0 }
 0x161   : > { %v1124_v30 = vpop.f32.mrb[49].mxu1  ;;  %v2403_v31 = vpop.eup %2402  ;;  %v1560_v33 = vadd.f32 1.0, %v2401_v26  ;;  %2422 = vpow2.f32 %v2118_v21  ;;  %v2119_v36 = vmul.f32 -1.442695, %v878_v27 }
 0x162   : > { %v2405_v34 = vpop.eup %2404  ;;  %v1609_v35 = vadd.f32 1.0, %v2403_v31  ;;  %2424 = vpow2.f32 %v2167_v22  ;;  %v2168_v37 = vmul.f32 -1.442695, %v1123_v28  ;;  %v882_v39 = vpop.f32.mrb[50].mxu0 }
 0x163   : > { %v2407_v38 = vpop.eup %2406  ;;  %1900 = vst [vmem:[%s3077_s20 + $0x210] sm:$0xff] %v2405_v34  ;;  %2426 = vrcp.f32 %v1560_v33  ;;  %v1127_v40 = vpop.f32.mrb[50].mxu1  ;;  %v883_v42 = vadd.f32 %v3057_v32, %v882_v39 }
 0x164   : > { %v2409_v41 = vpop.eup %2408  ;;  %1852 = vst [vmem:[%s3077_s20 + $0x90] sm:$0xff] %v2407_v38  ;;  %2428 = vrcp.f32 %v1609_v35  ;;  %v1128_v43 = vadd.f32 %v3057_v32, %v1127_v40  ;;  %v884_v44 = vpop.f32.mrb[51].mxu0 }
 0x165   : > { %v1129_v45 = vpop.f32.mrb[51].mxu1  ;;  %v2411_v46 = vpop.eup %2410  ;;  %v1561_v47 = vadd.f32 1.0, %v2409_v41  ;;  %2430 = vpow2.f32 %v2119_v36  ;;  %v2120_v50 = vmul.f32 -1.442695, %v883_v42 }
 0x166   : > { %v2413_v48 = vpop.eup %2412  ;;  %v1610_v49 = vadd.f32 1.0, %v2411_v46  ;;  %2432 = vpow2.f32 %v2168_v37  ;;  %v2169_v51 = vmul.f32 -1.442695, %v1128_v43  ;;  %v887_v53 = vpop.f32.mrb[52].mxu0 }
 0x167   : > { %v2415_v52 = vpop.eup %2414  ;;  %1901 = vst [vmem:[%s3077_s20 + $0x218] sm:$0xff] %v2413_v48  ;;  %2434 = vrcp.f32 %v1561_v47  ;;  %v1132_v54 = vpop.f32.mrb[52].mxu1  ;;  %v888_v56 = vadd.f32 %v3057_v32, %v887_v53 }
 0x168   : > { %v2417_v55 = vpop.eup %2416  ;;  %1853 = vst [vmem:[%s3077_s20 + $0x98] sm:$0xff] %v2415_v52  ;;  %2436 = vrcp.f32 %v1610_v49  ;;  %v1133_v57 = vadd.f32 %v3057_v32, %v1132_v54  ;;  %v889_v58 = vpop.f32.mrb[53].mxu0 }
 0x169   : > { %v1134_v59 = vpop.f32.mrb[53].mxu1  ;;  %v2419_v60 = vpop.eup %2418  ;;  %v1562_v61 = vadd.f32 1.0, %v2417_v55  ;;  %2438 = vpow2.f32 %v2120_v50  ;;  %v2121_v63 = vmul.f32 -1.442695, %v888_v56 }
 0x16a   : > { %v2421_v62 = vpop.eup %2420  ;;  %1902 = vst [vmem:[%s3077_s20 + $0x220] sm:$0xff] %v2419_v60  ;;  %2440 = vpow2.f32 %v2169_v51  ;;  %v2170_v2 = vmul.f32 -1.442695, %v1133_v57  ;;  %v892_v3 = vpop.f32.mrb[54].mxu0 }
 0x16b   : > { %v2423_v0 = vpop.eup %2422  ;;  %2442 = vrcp.f32 %v1562_v61  ;;  %v1611_v1 = vadd.f32 1.0, %v2421_v62  ;;  %v1137_v4 = vpop.f32.mrb[54].mxu1  ;;  %v893_v7 = vadd.f32 %v3057_v32, %v892_v3 }
 0x16c   : > { %v2425_v5 = vpop.eup %2424  ;;  %v1563_v6 = vadd.f32 1.0, %v2423_v0  ;;  %2444 = vpow2.f32 %v2121_v63  ;;  %v1138_v8 = vadd.f32 %v3057_v32, %v1137_v4  ;;  %v894_v9 = vpop.f32.mrb[55].mxu0  ;;  %v3166_v32 = vld [vmem:[%s3271_s2] ss:$0 sm:$0xff] }
 0x16d   : > { %v1139_v10 = vpop.f32.mrb[55].mxu1  ;;  %v2427_v11 = vpop.eup %2426  ;;  %2446 = vrcp.f32 %v1611_v1  ;;  %v1612_v12 = vadd.f32 1.0, %v2425_v5  ;;  %v2122_v14 = vmul.f32 -1.442695, %v893_v7 }
 0x16e   : > { %v2429_v13 = vpop.eup %2428  ;;  %1854 = vst [vmem:[%s3077_s20 + $0xa0] sm:$0xff] %v2427_v11  ;;  %2448 = vrcp.f32 %v1563_v6  ;;  %v2171_v16 = vmul.f32 -1.442695, %v1138_v8  ;;  %v897_v17 = vpop.f32.mrb[56].mxu0 }
 0x16f   : > { %v2431_v15 = vpop.eup %2430  ;;  %1903 = vst [vmem:[%s3077_s20 + $0x228] sm:$0xff] %v2429_v13  ;;  %2450 = vrcp.f32 %v1612_v12  ;;  %v1142_v18 = vpop.f32.mrb[56].mxu1  ;;  %v898_v21 = vadd.f32 %v3166_v32, %v897_v17 }
 0x170   : > { %v2433_v19 = vpop.eup %2432  ;;  %v1564_v20 = vadd.f32 1.0, %v2431_v15  ;;  %2452 = vpow2.f32 %v2170_v2  ;;  %v1143_v22 = vadd.f32 %v3166_v32, %v1142_v18  ;;  %v899_v23 = vpop.f32.mrb[57].mxu0 }
 0x171   : > { %v1144_v24 = vpop.f32.mrb[57].mxu1  ;;  %v2435_v25 = vpop.eup %2434  ;;  %v1613_v26 = vadd.f32 1.0, %v2433_v19  ;;  %2454 = vpow2.f32 %v2122_v14  ;;  %v2123_v28 = vmul.f32 -1.442695, %v898_v21 }
 0x172   : > { %v2437_v27 = vpop.eup %2436  ;;  %1855 = vst [vmem:[%s3077_s20 + $0xa8] sm:$0xff] %v2435_v25  ;;  %2456 = vrcp.f32 %v1564_v20  ;;  %v2172_v30 = vmul.f32 -1.442695, %v1143_v22  ;;  %v902_v31 = vpop.f32.mrb[58].mxu0 }
 0x173   : > { %v2439_v29 = vpop.eup %2438  ;;  %1904 = vst [vmem:[%s3077_s20 + $0x230] sm:$0xff] %v2437_v27  ;;  %2458 = vrcp.f32 %v1613_v26  ;;  %v1147_v33 = vpop.f32.mrb[58].mxu1  ;;  %v903_v36 = vadd.f32 %v3166_v32, %v902_v31 }
 0x174   : > { %v2441_v34 = vpop.eup %2440  ;;  %v1565_v35 = vadd.f32 1.0, %v2439_v29  ;;  %2460 = vpow2.f32 %v2171_v16  ;;  %v1148_v37 = vadd.f32 %v3166_v32, %v1147_v33  ;;  %v904_v38 = vpop.f32.mrb[59].mxu0 }
 0x175   : > { %v1149_v39 = vpop.f32.mrb[59].mxu1  ;;  %v2443_v40 = vpop.eup %2442  ;;  %v1614_v41 = vadd.f32 1.0, %v2441_v34  ;;  %2462 = vpow2.f32 %v2123_v28  ;;  %v2124_v43 = vmul.f32 -1.442695, %v903_v36 }
 0x176   : > { %v2445_v42 = vpop.eup %2444  ;;  %1856 = vst [vmem:[%s3077_s20 + $0xb0] sm:$0xff] %v2443_v40  ;;  %2464 = vrcp.f32 %v1565_v35  ;;  %v2173_v46 = vmul.f32 -1.442695, %v1148_v37  ;;  %v907_v47 = vpop.f32.mrb[60].mxu0 }
 0x177   : > { %v2447_v44 = vpop.eup %2446  ;;  %2466 = vrcp.f32 %v1614_v41  ;;  %v1566_v45 = vadd.f32 1.0, %v2445_v42  ;;  %v1152_v48 = vpop.f32.mrb[60].mxu1  ;;  %v908_v50 = vadd.f32 %v3166_v32, %v907_v47 }
 0x178   : > { %v2449_v49 = vpop.eup %2448  ;;  %1905 = vst [vmem:[%s3077_s20 + $0x238] sm:$0xff] %v2447_v44  ;;  %2468 = vpow2.f32 %v2172_v30  ;;  %v1153_v51 = vadd.f32 %v3166_v32, %v1152_v48  ;;  %v909_v52 = vpop.f32.mrb[61].mxu0 }
 0x179   : > { %v1154_v53 = vpop.f32.mrb[61].mxu1  ;;  %v2451_v54 = vpop.eup %2450  ;;  %1857 = vst [vmem:[%s3077_s20 + $0xb8] sm:$0xff] %v2449_v49  ;;  %2470 = vrcp.f32 %v1566_v45  ;;  %v2125_v56 = vmul.f32 -1.442695, %v908_v50 }
 0x17a   : > { %v2453_v55 = vpop.eup %2452  ;;  %1906 = vst [vmem:[%s3077_s20 + $0x240] sm:$0xff] %v2451_v54  ;;  %2472 = vpow2.f32 %v2124_v43  ;;  %v2174_v59 = vmul.f32 -1.442695, %v1153_v51  ;;  %v912_v60 = vpop.f32.mrb[62].mxu0 }
 0x17b   : > { %v2455_v57 = vpop.eup %2454  ;;  %v1615_v58 = vadd.f32 1.0, %v2453_v55  ;;  %2474 = vpow2.f32 %v2173_v46  ;;  %v1157_v61 = vpop.f32.mrb[62].mxu1  ;;  %v913_v0 = vadd.f32 %v3166_v32, %v912_v60 }
 0x17c   : > { %v2457_v62 = vpop.eup %2456  ;;  %v1567_v63 = vadd.f32 1.0, %v2455_v57  ;;  %2476 = vpow2.f32 %v2125_v56  ;;  %v1158_v1 = vadd.f32 %v3166_v32, %v1157_v61  ;;  %v914_v2 = vpop.f32.mrb[63].mxu0 }
 0x17d   : > { %v1159_v3 = vpop.f32.mrb[63].mxu1  ;;  %v2459_v4 = vpop.eup %2458  ;;  %1858 = vst [vmem:[%s3077_s20 + $0xc0] sm:$0xff] %v2457_v62  ;;  %2478 = vrcp.f32 %v1615_v58  ;;  %v2126_v6 = vmul.f32 -1.442695, %v913_v0 }
 0x17e   : > { %v2461_v5 = vpop.eup %2460  ;;  %1907 = vst [vmem:[%s3077_s20 + $0x248] sm:$0xff] %v2459_v4  ;;  %2480 = vrcp.f32 %v1567_v63  ;;  %v2175_v9 = vmul.f32 -1.442695, %v1158_v1  ;;  %v917_v10 = vpop.f32.mrb[64].mxu0 }
 0x17f   : > { %v2463_v7 = vpop.eup %2462  ;;  %v1616_v8 = vadd.f32 1.0, %v2461_v5  ;;  %2482 = vpow2.f32 %v2174_v59  ;;  %v1162_v11 = vpop.f32.mrb[64].mxu1  ;;  %v918_v14 = vadd.f32 %v3166_v32, %v917_v10 }
 0x180   : > { %v2465_v12 = vpop.eup %2464  ;;  %v1568_v13 = vadd.f32 1.0, %v2463_v7  ;;  %2484 = vpow2.f32 %v2126_v6  ;;  %v1163_v15 = vadd.f32 %v3166_v32, %v1162_v11  ;;  %v919_v16 = vpop.f32.mrb[65].mxu0 }
 0x181   : > { %v1164_v17 = vpop.f32.mrb[65].mxu1  ;;  %v2467_v18 = vpop.eup %2466  ;;  %1859 = vst [vmem:[%s3077_s20 + $0xc8] sm:$0xff] %v2465_v12  ;;  %2486 = vrcp.f32 %v1616_v8  ;;  %v2127_v20 = vmul.f32 -1.442695, %v918_v14 }
 0x182   : > { %v2469_v19 = vpop.eup %2468  ;;  %1908 = vst [vmem:[%s3077_s20 + $0x250] sm:$0xff] %v2467_v18  ;;  %2488 = vrcp.f32 %v1568_v13  ;;  %v2176_v21 = vmul.f32 -1.442695, %v1163_v15  ;;  %v922_v24 = vpop.f32.mrb[66].mxu0 }
 0x183   : > { %v2471_v22 = vpop.eup %2470  ;;  %v1617_v23 = vadd.f32 1.0, %v2469_v19  ;;  %2490 = vpow2.f32 %v2175_v9  ;;  %v1167_v25 = vpop.f32.mrb[66].mxu1  ;;  %v923_v27 = vadd.f32 %v3166_v32, %v922_v24 }
 0x184   : > { %v2473_v26 = vpop.eup %2472  ;;  %1860 = vst [vmem:[%s3077_s20 + $0xd0] sm:$0xff] %v2471_v22  ;;  %2492 = vpow2.f32 %v2127_v20  ;;  %v1168_v28 = vadd.f32 %v3166_v32, %v1167_v25  ;;  %v924_v29 = vpop.f32.mrb[67].mxu0 }
 0x185   : > { %v1169_v30 = vpop.f32.mrb[67].mxu1  ;;  %v2475_v31 = vpop.eup %2474  ;;  %2494 = vrcp.f32 %v1617_v23  ;;  %v1569_v33 = vadd.f32 1.0, %v2473_v26  ;;  %v2128_v36 = vmul.f32 -1.442695, %v923_v27 }
 0x186   : > { %v2477_v34 = vpop.eup %2476  ;;  %v1618_v35 = vadd.f32 1.0, %v2475_v31  ;;  %2496 = vpow2.f32 %v2176_v21  ;;  %v2177_v39 = vmul.f32 -1.442695, %v1168_v28  ;;  %v927_v40 = vpop.f32.mrb[68].mxu0 }
 0x187   : > { %v2479_v37 = vpop.eup %2478  ;;  %2498 = vrcp.f32 %v1569_v33  ;;  %v1570_v38 = vadd.f32 1.0, %v2477_v34  ;;  %v1172_v41 = vpop.f32.mrb[68].mxu1  ;;  %v928_v43 = vadd.f32 %v3166_v32, %v927_v40 }
 0x188   : > { %v2481_v42 = vpop.eup %2480  ;;  %1909 = vst [vmem:[%s3077_s20 + $0x258] sm:$0xff] %v2479_v37  ;;  %2500 = vrcp.f32 %v1618_v35  ;;  %v1173_v44 = vadd.f32 %v3166_v32, %v1172_v41  ;;  %v929_v45 = vpop.f32.mrb[69].mxu0 }
 0x189   : > { %v1174_v46 = vpop.f32.mrb[69].mxu1  ;;  %v2483_v47 = vpop.eup %2482  ;;  %1861 = vst [vmem:[%s3077_s20 + $0xd8] sm:$0xff] %v2481_v42  ;;  %2502 = vrcp.f32 %v1570_v38  ;;  %v2129_v50 = vmul.f32 -1.442695, %v928_v43 }
 0x18a   : > { %v2485_v48 = vpop.eup %2484  ;;  %v1619_v49 = vadd.f32 1.0, %v2483_v47  ;;  %2504 = vpow2.f32 %v2128_v36  ;;  %v2178_v53 = vmul.f32 -1.442695, %v1173_v44  ;;  %v932_v54 = vpop.f32.mrb[70].mxu0 }
 0x18b   : > { %v2487_v51 = vpop.eup %2486  ;;  %v1571_v52 = vadd.f32 1.0, %v2485_v48  ;;  %2506 = vpow2.f32 %v2177_v39  ;;  %v1177_v55 = vpop.f32.mrb[70].mxu1  ;;  %v933_v57 = vadd.f32 %v3166_v32, %v932_v54 }
 0x18c   : > { %v2489_v56 = vpop.eup %2488  ;;  %1910 = vst [vmem:[%s3077_s20 + $0x260] sm:$0xff] %v2487_v51  ;;  %2508 = vrcp.f32 %v1619_v49  ;;  %v1178_v58 = vadd.f32 %v3166_v32, %v1177_v55  ;;  %v934_v59 = vpop.f32.mrb[71].mxu0 }
 0x18d   : > { %v1179_v60 = vpop.f32.mrb[71].mxu1  ;;  %v2491_v61 = vpop.eup %2490  ;;  %1862 = vst [vmem:[%s3077_s20 + $0xe0] sm:$0xff] %v2489_v56  ;;  %2510 = vrcp.f32 %v1571_v52  ;;  %v2130_v0 = vmul.f32 -1.442695, %v933_v57 }
 0x18e   : > { %v2493_v62 = vpop.eup %2492  ;;  %v1620_v63 = vadd.f32 1.0, %v2491_v61  ;;  %2512 = vpow2.f32 %v2129_v50  ;;  %v937_v3 = vpop.f32.mrb[72].mxu0  ;;  %v2179_v6 = vmul.f32 -1.442695, %v1178_v58 }
 0x18f   : > { %v2495_v1 = vpop.eup %2494  ;;  %v1572_v2 = vadd.f32 1.0, %v2493_v62  ;;  %2514 = vpow2.f32 %v2178_v53  ;;  %v1182_v4 = vpop.f32.mrb[72].mxu1  ;;  %v938_v7 = vadd.f32 %v3166_v32, %v937_v3 }
 0x190   : > { %v2497_v5 = vpop.eup %2496  ;;  %1911 = vst [vmem:[%s3077_s20 + $0x268] sm:$0xff] %v2495_v1  ;;  %2516 = vrcp.f32 %v1620_v63  ;;  %v1183_v8 = vadd.f32 %v3166_v32, %v1182_v4  ;;  %v939_v9 = vpop.f32.mrb[73].mxu0 }
 0x191   : > { %v1184_v10 = vpop.f32.mrb[73].mxu1  ;;  %v2499_v11 = vpop.eup %2498  ;;  %2518 = vrcp.f32 %v1572_v2  ;;  %v1621_v12 = vadd.f32 1.0, %v2497_v5  ;;  %v2131_v14 = vmul.f32 -1.442695, %v938_v7 }
 0x192   : > { %v2501_v13 = vpop.eup %2500  ;;  %1863 = vst [vmem:[%s3077_s20 + $0xe8] sm:$0xff] %v2499_v11  ;;  %2520 = vpow2.f32 %v2130_v0  ;;  %v2180_v15 = vmul.f32 -1.442695, %v1183_v8  ;;  %v942_v17 = vpop.f32.mrb[74].mxu0 }
 0x193   : > { %v2503_v16 = vpop.eup %2502  ;;  %1912 = vst [vmem:[%s3077_s20 + $0x270] sm:$0xff] %v2501_v13  ;;  %2522 = vrcp.f32 %v1621_v12  ;;  %v1187_v18 = vpop.f32.mrb[74].mxu1  ;;  %v943_v20 = vadd.f32 %v3166_v32, %v942_v17 }
 0x194   : > { %v2505_v19 = vpop.eup %2504  ;;  %1864 = vst [vmem:[%s3077_s20 + $0xf0] sm:$0xff] %v2503_v16  ;;  %2524 = vpow2.f32 %v2179_v6  ;;  %v1188_v21 = vadd.f32 %v3166_v32, %v1187_v18  ;;  %v944_v22 = vpop.f32.mrb[75].mxu0 }
 0x195   : > { %v1189_v23 = vpop.f32.mrb[75].mxu1  ;;  %v2507_v24 = vpop.eup %2506  ;;  %v1573_v25 = vadd.f32 1.0, %v2505_v19  ;;  %2526 = vpow2.f32 %v2131_v14  ;;  %v2132_v28 = vmul.f32 -1.442695, %v943_v20 }
 0x196   : > { %v2509_v26 = vpop.eup %2508  ;;  %v1622_v27 = vadd.f32 1.0, %v2507_v24  ;;  %2528 = vpow2.f32 %v2180_v15  ;;  %v2181_v29 = vmul.f32 -1.442695, %v1188_v21  ;;  %v947_v31 = vpop.f32.mrb[76].mxu0 }
 0x197   : > { %v2511_v30 = vpop.eup %2510  ;;  %1913 = vst [vmem:[%s3077_s20 + $0x278] sm:$0xff] %v2509_v26  ;;  %2530 = vrcp.f32 %v1573_v25  ;;  %v1192_v33 = vpop.f32.mrb[76].mxu1  ;;  %v948_v35 = vadd.f32 %v3166_v32, %v947_v31 }
 0x198   : > { %v2513_v34 = vpop.eup %2512  ;;  %1865 = vst [vmem:[%s3077_s20 + $0xf8] sm:$0xff] %v2511_v30  ;;  %2532 = vrcp.f32 %v1622_v27  ;;  %v1193_v36 = vadd.f32 %v3166_v32, %v1192_v33  ;;  %v949_v37 = vpop.f32.mrb[77].mxu0 }
 0x199   : > { %v1194_v38 = vpop.f32.mrb[77].mxu1  ;;  %v2515_v39 = vpop.eup %2514  ;;  %v1574_v40 = vadd.f32 1.0, %v2513_v34  ;;  %2534 = vpow2.f32 %v2132_v28  ;;  %v2133_v43 = vmul.f32 -1.442695, %v948_v35 }
 0x19a   : > { %v2517_v41 = vpop.eup %2516  ;;  %v1623_v42 = vadd.f32 1.0, %v2515_v39  ;;  %2536 = vpow2.f32 %v2181_v29  ;;  %v2182_v44 = vmul.f32 -1.442695, %v1193_v36  ;;  %v952_v46 = vpop.f32.mrb[78].mxu0 }
 0x19b   : > { %v2519_v45 = vpop.eup %2518  ;;  %1914 = vst [vmem:[%s3077_s20 + $0x280] sm:$0xff] %v2517_v41  ;;  %2538 = vrcp.f32 %v1574_v40  ;;  %v1197_v47 = vpop.f32.mrb[78].mxu1  ;;  %v953_v49 = vadd.f32 %v3166_v32, %v952_v46 }
 0x19c   : > { %v2521_v48 = vpop.eup %2520  ;;  %1866 = vst [vmem:[%s3077_s20 + $0x100] sm:$0xff] %v2519_v45  ;;  %2540 = vrcp.f32 %v1623_v42  ;;  %v1198_v50 = vadd.f32 %v3166_v32, %v1197_v47  ;;  %v954_v51 = vpop.f32.mrb[79].mxu0 }
 0x19d   : > { %v1199_v52 = vpop.f32.mrb[79].mxu1  ;;  %v2523_v53 = vpop.eup %2522  ;;  %v1575_v54 = vadd.f32 1.0, %v2521_v48  ;;  %2542 = vpow2.f32 %v2133_v43  ;;  %v2134_v56 = vmul.f32 -1.442695, %v953_v49 }
 0x19e   : > { %v2525_v55 = vpop.eup %2524  ;;  %1915 = vst [vmem:[%s3077_s20 + $0x288] sm:$0xff] %v2523_v53  ;;  %2544 = vpow2.f32 %v2182_v44  ;;  %v2183_v59 = vmul.f32 -1.442695, %v1198_v50  ;;  %v957_v60 = vpop.f32.mrb[80].mxu0 }
 0x19f   : > { %v2527_v57 = vpop.eup %2526  ;;  %2546 = vrcp.f32 %v1575_v54  ;;  %v1624_v58 = vadd.f32 1.0, %v2525_v55  ;;  %v1202_v61 = vpop.f32.mrb[80].mxu1  ;;  %v958_v0 = vadd.f32 %v3166_v32, %v957_v60 }
 0x1a0   : > { %v2529_v62 = vpop.eup %2528  ;;  %v1576_v63 = vadd.f32 1.0, %v2527_v57  ;;  %2548 = vpow2.f32 %v2134_v56  ;;  %v1203_v1 = vadd.f32 %v3166_v32, %v1202_v61  ;;  %v959_v2 = vpop.f32.mrb[81].mxu0 }
 0x1a1   : > { %v1204_v3 = vpop.f32.mrb[81].mxu1  ;;  %v2531_v4 = vpop.eup %2530  ;;  %2550 = vrcp.f32 %v1624_v58  ;;  %v1625_v5 = vadd.f32 1.0, %v2529_v62  ;;  %v2135_v7 = vmul.f32 -1.442695, %v958_v0 }
 0x1a2   : > { %v2533_v6 = vpop.eup %2532  ;;  %1867 = vst [vmem:[%s3077_s20 + $0x108] sm:$0xff] %v2531_v4  ;;  %2552 = vrcp.f32 %v1576_v63  ;;  %v2184_v9 = vmul.f32 -1.442695, %v1203_v1  ;;  %v962_v10 = vpop.f32.mrb[82].mxu0 }
 0x1a3   : > { %v2535_v8 = vpop.eup %2534  ;;  %1916 = vst [vmem:[%s3077_s20 + $0x290] sm:$0xff] %v2533_v6  ;;  %2554 = vrcp.f32 %v1625_v5  ;;  %v1207_v11 = vpop.f32.mrb[82].mxu1  ;;  %v963_v14 = vadd.f32 %v3166_v32, %v962_v10 }
 0x1a4   : > { %v2537_v12 = vpop.eup %2536  ;;  %v1577_v13 = vadd.f32 1.0, %v2535_v8  ;;  %2556 = vpow2.f32 %v2183_v59  ;;  %v1208_v15 = vadd.f32 %v3166_v32, %v1207_v11  ;;  %v964_v16 = vpop.f32.mrb[83].mxu0 }
 0x1a5   : > { %v1209_v17 = vpop.f32.mrb[83].mxu1  ;;  %v2539_v18 = vpop.eup %2538  ;;  %v1626_v19 = vadd.f32 1.0, %v2537_v12  ;;  %2558 = vpow2.f32 %v2135_v7  ;;  %v2136_v21 = vmul.f32 -1.442695, %v963_v14 }
 0x1a6   : > { %v2541_v20 = vpop.eup %2540  ;;  %1868 = vst [vmem:[%s3077_s20 + $0x110] sm:$0xff] %v2539_v18  ;;  %2560 = vrcp.f32 %v1577_v13  ;;  %v2185_v23 = vmul.f32 -1.442695, %v1208_v15  ;;  %v967_v24 = vpop.f32.mrb[84].mxu0 }
 0x1a7   : > { %v2543_v22 = vpop.eup %2542  ;;  %1917 = vst [vmem:[%s3077_s20 + $0x298] sm:$0xff] %v2541_v20  ;;  %2562 = vrcp.f32 %v1626_v19  ;;  %v1212_v25 = vpop.f32.mrb[84].mxu1  ;;  %v968_v28 = vadd.f32 %v3166_v32, %v967_v24 }
 0x1a8   : > { %v2545_v26 = vpop.eup %2544  ;;  %v1578_v27 = vadd.f32 1.0, %v2543_v22  ;;  %2564 = vpow2.f32 %v2184_v9  ;;  %v1213_v29 = vadd.f32 %v3166_v32, %v1212_v25  ;;  %v969_v30 = vpop.f32.mrb[85].mxu0 }
 0x1a9   : > { %v1214_v31 = vpop.f32.mrb[85].mxu1  ;;  %v2547_v33 = vpop.eup %2546  ;;  %v1627_v34 = vadd.f32 1.0, %v2545_v26  ;;  %2566 = vpow2.f32 %v2136_v21  ;;  %v2137_v36 = vmul.f32 -1.442695, %v968_v28 }
 0x1aa   : > { %v2549_v35 = vpop.eup %2548  ;;  %1869 = vst [vmem:[%s3077_s20 + $0x118] sm:$0xff] %v2547_v33  ;;  %2568 = vrcp.f32 %v1578_v27  ;;  %v2186_v39 = vmul.f32 -1.442695, %v1213_v29  ;;  %v972_v40 = vpop.f32.mrb[86].mxu0 }
 0x1ab   : > { %v2551_v37 = vpop.eup %2550  ;;  %2570 = vrcp.f32 %v1627_v34  ;;  %v1579_v38 = vadd.f32 1.0, %v2549_v35  ;;  %v1217_v41 = vpop.f32.mrb[86].mxu1  ;;  %v973_v43 = vadd.f32 %v3166_v32, %v972_v40 }
 0x1ac   : > { %v2553_v42 = vpop.eup %2552  ;;  %1918 = vst [vmem:[%s3077_s20 + $0x2a0] sm:$0xff] %v2551_v37  ;;  %2572 = vpow2.f32 %v2185_v23  ;;  %v1218_v44 = vadd.f32 %v3166_v32, %v1217_v41  ;;  %v974_v45 = vpop.f32.mrb[87].mxu0 }
 0x1ad   : > { %v1219_v46 = vpop.f32.mrb[87].mxu1  ;;  %v2555_v47 = vpop.eup %2554  ;;  %1870 = vst [vmem:[%s3077_s20 + $0x120] sm:$0xff] %v2553_v42  ;;  %2574 = vrcp.f32 %v1579_v38  ;;  %v2138_v49 = vmul.f32 -1.442695, %v973_v43 }
 0x1ae   : > { %v2557_v48 = vpop.eup %2556  ;;  %1919 = vst [vmem:[%s3077_s20 + $0x2a8] sm:$0xff] %v2555_v47  ;;  %2576 = vpow2.f32 %v2137_v36  ;;  %v2187_v52 = vmul.f32 -1.442695, %v1218_v44  ;;  %v977_v53 = vpop.f32.mrb[88].mxu0 }
 0x1af   : > { %v2559_v50 = vpop.eup %2558  ;;  %v1628_v51 = vadd.f32 1.0, %v2557_v48  ;;  %2578 = vpow2.f32 %v2186_v39  ;;  %v1222_v54 = vpop.f32.mrb[88].mxu1  ;;  %v978_v57 = vadd.f32 %v3166_v32, %v977_v53 }
 0x1b0   : > { %v2561_v55 = vpop.eup %2560  ;;  %v1580_v56 = vadd.f32 1.0, %v2559_v50  ;;  %2580 = vpow2.f32 %v2138_v49  ;;  %v1223_v58 = vadd.f32 %v3166_v32, %v1222_v54  ;;  %v979_v59 = vpop.f32.mrb[89].mxu0 }
 0x1b1   : > { %v1224_v60 = vpop.f32.mrb[89].mxu1  ;;  %v2563_v61 = vpop.eup %2562  ;;  %1871 = vst [vmem:[%s3077_s20 + $0x128] sm:$0xff] %v2561_v55  ;;  %2582 = vrcp.f32 %v1628_v51  ;;  %v2139_v63 = vmul.f32 -1.442695, %v978_v57 }
 0x1b2   : > { %v2565_v62 = vpop.eup %2564  ;;  %1920 = vst [vmem:[%s3077_s20 + $0x2b0] sm:$0xff] %v2563_v61  ;;  %2584 = vrcp.f32 %v1580_v56  ;;  %v2188_v2 = vmul.f32 -1.442695, %v1223_v58  ;;  %v982_v3 = vpop.f32.mrb[90].mxu0 }
 0x1b3   : > { %v2567_v0 = vpop.eup %2566  ;;  %v1629_v1 = vadd.f32 1.0, %v2565_v62  ;;  %2586 = vpow2.f32 %v2187_v52  ;;  %v1227_v4 = vpop.f32.mrb[90].mxu1  ;;  %v983_v7 = vadd.f32 %v3166_v32, %v982_v3 }
 0x1b4   : > { %v2569_v5 = vpop.eup %2568  ;;  %v1581_v6 = vadd.f32 1.0, %v2567_v0  ;;  %2588 = vpow2.f32 %v2139_v63  ;;  %v1228_v8 = vadd.f32 %v3166_v32, %v1227_v4  ;;  %v984_v9 = vpop.f32.mrb[91].mxu0 }
 0x1b5   : > { %v1229_v10 = vpop.f32.mrb[91].mxu1  ;;  %v2571_v11 = vpop.eup %2570  ;;  %1872 = vst [vmem:[%s3077_s20 + $0x130] sm:$0xff] %v2569_v5  ;;  %2590 = vrcp.f32 %v1629_v1  ;;  %v2140_v13 = vmul.f32 -1.442695, %v983_v7 }
 0x1b6   : > { %v2573_v12 = vpop.eup %2572  ;;  %1921 = vst [vmem:[%s3077_s20 + $0x2b8] sm:$0xff] %v2571_v11  ;;  %2592 = vrcp.f32 %v1581_v6  ;;  %v2189_v14 = vmul.f32 -1.442695, %v1228_v8  ;;  %v987_v17 = vpop.f32.mrb[92].mxu0 }
 0x1b7   : > { %v2575_v15 = vpop.eup %2574  ;;  %v1630_v16 = vadd.f32 1.0, %v2573_v12  ;;  %2594 = vpow2.f32 %v2188_v2  ;;  %v1232_v18 = vpop.f32.mrb[92].mxu1  ;;  %v988_v20 = vadd.f32 %v3166_v32, %v987_v17 }
 0x1b8   : > { %v2577_v19 = vpop.eup %2576  ;;  %1873 = vst [vmem:[%s3077_s20 + $0x138] sm:$0xff] %v2575_v15  ;;  %2596 = vpow2.f32 %v2140_v13  ;;  %v1233_v21 = vadd.f32 %v3166_v32, %v1232_v18  ;;  %v989_v22 = vpop.f32.mrb[93].mxu0 }
 0x1b9   : > { %v1234_v23 = vpop.f32.mrb[93].mxu1  ;;  %v2579_v24 = vpop.eup %2578  ;;  %2598 = vrcp.f32 %v1630_v16  ;;  %v1582_v25 = vadd.f32 1.0, %v2577_v19  ;;  %v2141_v28 = vmul.f32 -1.442695, %v988_v20 }
 0x1ba   : > { %v2581_v26 = vpop.eup %2580  ;;  %v1631_v27 = vadd.f32 1.0, %v2579_v24  ;;  %2600 = vpow2.f32 %v2189_v14  ;;  %v2190_v31 = vmul.f32 -1.442695, %v1233_v21  ;;  %v992_v33 = vpop.f32.mrb[94].mxu0 }
 0x1bb   : > { %v2583_v29 = vpop.eup %2582  ;;  %2602 = vrcp.f32 %v1582_v25  ;;  %v1583_v30 = vadd.f32 1.0, %v2581_v26  ;;  %v1237_v34 = vpop.f32.mrb[94].mxu1  ;;  %v993_v36 = vadd.f32 %v3166_v32, %v992_v33 }
 0x1bc   : > { %v2585_v35 = vpop.eup %2584  ;;  %1922 = vst [vmem:[%s3077_s20 + $0x2c0] sm:$0xff] %v2583_v29  ;;  %2604 = vrcp.f32 %v1631_v27  ;;  %v1238_v37 = vadd.f32 %v3166_v32, %v1237_v34  ;;  %v994_v38 = vpop.f32.mrb[95].mxu0 }
 0x1bd   : > { %v1239_v39 = vpop.f32.mrb[95].mxu1  ;;  %v2587_v40 = vpop.eup %2586  ;;  %1874 = vst [vmem:[%s3077_s20 + $0x140] sm:$0xff] %v2585_v35  ;;  %2606 = vrcp.f32 %v1583_v30  ;;  %v2142_v43 = vmul.f32 -1.442695, %v993_v36 }
 0x1be   : > { %v2589_v41 = vpop.eup %2588  ;;  %v1632_v42 = vadd.f32 1.0, %v2587_v40  ;;  %2608 = vpow2.f32 %v2141_v28  ;;  %v2191_v46 = vmul.f32 -1.442695, %v1238_v37  ;;  %v997_v47 = vpop.f32.mrb[96].mxu0 }
 0x1bf   : > { %v2591_v44 = vpop.eup %2590  ;;  %v1584_v45 = vadd.f32 1.0, %v2589_v41  ;;  %2610 = vpow2.f32 %v2190_v31  ;;  %v1242_v48 = vpop.f32.mrb[96].mxu1  ;;  %v998_v50 = vadd.f32 %v3166_v32, %v997_v47 }
 0x1c0   : > { %v2593_v49 = vpop.eup %2592  ;;  %1923 = vst [vmem:[%s3077_s20 + $0x2c8] sm:$0xff] %v2591_v44  ;;  %2612 = vrcp.f32 %v1632_v42  ;;  %v1243_v51 = vadd.f32 %v3166_v32, %v1242_v48  ;;  %v999_v52 = vpop.f32.mrb[97].mxu0 }
 0x1c1   : > { %v1244_v53 = vpop.f32.mrb[97].mxu1  ;;  %v2595_v54 = vpop.eup %2594  ;;  %1875 = vst [vmem:[%s3077_s20 + $0x148] sm:$0xff] %v2593_v49  ;;  %2614 = vrcp.f32 %v1584_v45  ;;  %v2143_v57 = vmul.f32 -1.442695, %v998_v50 }
 0x1c2   : > { %v2597_v55 = vpop.eup %2596  ;;  %v1633_v56 = vadd.f32 1.0, %v2595_v54  ;;  %2616 = vpow2.f32 %v2142_v43  ;;  %v2192_v61 = vmul.f32 -1.442695, %v1243_v51 }
 0x1c3   : > { %v2599_v58 = vpop.eup %2598  ;;  %v1585_v59 = vadd.f32 1.0, %v2597_v55  ;;  %2618 = vpow2.f32 %v2191_v46 }
 0x1c4   : > { %v2601_v60 = vpop.eup %2600  ;;  %1924 = vst [vmem:[%s3077_s20 + $0x2d0] sm:$0xff] %v2599_v58  ;;  %2620 = vrcp.f32 %v1633_v56 }
 0x1c5   : > { %v2603_v32 = vpop.eup %2602  ;;  %2622 = vrcp.f32 %v1585_v59  ;;  %v1634_v62 = vadd.f32 1.0, %v2601_v60 }
 0x1c6   : > { %v2605_v63 = vpop.eup %2604  ;;  %1876 = vst [vmem:[%s3077_s20 + $0x150] sm:$0xff] %v2603_v32  ;;  %2624 = vpow2.f32 %v2143_v57 }
 0x1c7   : > { %v2607_v0 = vpop.eup %2606  ;;  %1925 = vst [vmem:[%s3077_s20 + $0x2d8] sm:$0xff] %v2605_v63  ;;  %2626 = vrcp.f32 %v1634_v62 }
 0x1c8   : > { %v2609_v1 = vpop.eup %2608  ;;  %1877 = vst [vmem:[%s3077_s20 + $0x158] sm:$0xff] %v2607_v0  ;;  %2628 = vpow2.f32 %v2192_v61 }
 0x1c9   : > { %v2611_v2 = vpop.eup %2610  ;;  %v1586_v3 = vadd.f32 1.0, %v2609_v1 }
 0x1ca   : > { %v2613_v4 = vpop.eup %2612  ;;  %v1635_v5 = vadd.f32 1.0, %v2611_v2 }
 0x1cb   : > { %v2615_v6 = vpop.eup %2614  ;;  %1926 = vst [vmem:[%s3077_s20 + $0x2e0] sm:$0xff] %v2613_v4  ;;  %2630 = vrcp.f32 %v1586_v3 }
 0x1cc   : > { %v2617_v7 = vpop.eup %2616  ;;  %1878 = vst [vmem:[%s3077_s20 + $0x160] sm:$0xff] %v2615_v6  ;;  %2632 = vrcp.f32 %v1635_v5 }
 0x1cd   : > { %v2619_v8 = vpop.eup %2618  ;;  %v1587_v9 = vadd.f32 1.0, %v2617_v7 }
 0x1ce   : > { %v2621_v10 = vpop.eup %2620  ;;  %v1636_v11 = vadd.f32 1.0, %v2619_v8 }
 0x1cf   : > { %v2623_v12 = vpop.eup %2622  ;;  %1927 = vst [vmem:[%s3077_s20 + $0x2e8] sm:$0xff] %v2621_v10  ;;  %2634 = vrcp.f32 %v1587_v9 }
 0x1d0   : > { %v2625_v13 = vpop.eup %2624  ;;  %1879 = vst [vmem:[%s3077_s20 + $0x168] sm:$0xff] %v2623_v12  ;;  %2636 = vrcp.f32 %v1636_v11 }
 0x1d1   : > { %v2627_v14 = vpop.eup %2626  ;;  %v1588_v15 = vadd.f32 1.0, %v2625_v13 }
 0x1d2   : > { %v2629_v16 = vpop.eup %2628  ;;  %1928 = vst [vmem:[%s3077_s20 + $0x2f0] sm:$0xff] %v2627_v14 }
 0x1d3   : > { %2638 = vrcp.f32 %v1588_v15  ;;  %v1637_v17 = vadd.f32 1.0, %v2629_v16 }
 0x1d5   : > { %v2631_v18 = vpop.eup %2630  ;;  %2640 = vrcp.f32 %v1637_v17 }
 0x1d6   : > { %v2633_v19 = vpop.eup %2632  ;;  %1880 = vst [vmem:[%s3077_s20 + $0x170] sm:$0xff] %v2631_v18 }
 0x1d7   : > { %1929 = vst [vmem:[%s3077_s20 + $0x2f8] sm:$0xff] %v2633_v19 }
 0x1d9   : > { %v2635_v20 = vpop.eup %2634 }
 0x1da   : > { %v2637_v21 = vpop.eup %2636  ;;  %1881 = vst [vmem:[%s3077_s20 + $0x178] sm:$0xff] %v2635_v20 }
 0x1db   : > { %1930 = vst [vmem:[%s3077_s20 + $0x300] sm:$0xff] %v2637_v21 }
 0x1dd   : > { %v2639_v22 = vpop.eup %2638 }
 0x1de   : > { %1882 = vst [vmem:[%s3077_s20 + $0x180] sm:$0xff] %v2639_v22 }
 0x1df   : > { %v2641_v23 = vpop.eup %2640 }
 0x1e0   : > { %1931 = vst [vmem:[%s3077_s20 + $0x308] sm:$0xff] %v2641_v23 }
 0x1e1 PF: > { %s13_s12 = sadd.s32 1, %s2649_s12  }
 0x1e2   : > { %p10_p4 = scmp.ge.s32.totalorder %s13_s12, 4  }
 0x1e4   :  { %12 = sbr.rel (!%p10_p4) target bundleno = 1 (0x1), region = 62 }

</bundles_post_ra>
